<compile_context>
chip_gen: v7x
topology: tpu7x:2x2x1
jax: 0.10.0
libtpu: 0.0.40
codegen_flags: <defaults>
</compile_context>

<pallas_src>
import functools

import jax
import jax.numpy as jnp
from jax.experimental import pallas as pl
from jax.experimental.pallas import tpu as pltpu

EPS = 1e-5
LANES = 128                       # lane width: keep output channels lane-dense
VMEM_LIMIT = 32 * 1024 * 1024     # scoped-VMEM budget with headroom (ok on v5e..v7x)


def _round_up(x, m):
    return (x + m - 1) // m * m


# ---------------------------------------------------------------------------
# Kernel 1: 3x3 conv (in-kernel im2col taps -> GEMM) + per-block BN partials.
# ---------------------------------------------------------------------------
def _conv_bn_stats_kernel(x_ref, w_ref, y_ref, s_ref):
    """x_ref: (1, 1, TH+2, W+2, Cin)  halo'd row-block of the zero-padded image
       w_ref: (9, Cin, Cpad)          3x3 weights, tap-major, out-channel padded
       y_ref: (1, TH*W, Cpad)         pre-BN conv output (f32)
       s_ref: (1, 1, 2, Cpad)         per-block [sum, sum_of_squares] (f32)
    """
    _, _, thp, wdp, cin = x_ref.shape
    th, wd = thp - 2, wdp - 2
    cpad = w_ref.shape[-1]

    # The 9 spatially-shifted taps, read from the resident VMEM tile
    # (no 9x im2col traffic from HBM).
    taps = []
    for kh in range(3):
        for kw in range(3):
            taps.append(x_ref[0, 0, kh:kh + th, kw:kw + wd, :].reshape(th * wd, cin))

    if cin % LANES == 0:
        # Lane-aligned channels: fold all 9 taps into the contraction dim and
        # issue a single MXU matmul with K = 9*Cin (fewer MXU pushes / drains).
        patches = jnp.concatenate(taps, axis=-1)                     # (TH*W, 9*Cin)
        acc = jnp.dot(patches, w_ref[...].reshape(9 * cin, cpad),
                      preferred_element_type=jnp.float32)
    else:
        # Tiny / unaligned Cin (first conv of the block): 9 accumulated matmuls
        # with an f32 accumulator (avoids unaligned lane concatenation).
        acc = jnp.dot(taps[0], w_ref[0], preferred_element_type=jnp.float32)
        for t in range(1, 9):
            acc = acc + jnp.dot(taps[t], w_ref[t],
                                preferred_element_type=jnp.float32)

    y_ref[0] = acc
    # Per-block BN partial reductions (finalized globally in the wrapper).
    s_ref[0, 0, 0:1, :] = jnp.sum(acc, axis=0, keepdims=True)
    s_ref[0, 0, 1:2, :] = jnp.sum(acc * acc, axis=0, keepdims=True)


# ---------------------------------------------------------------------------
# Kernel 2: fused BatchNorm (precomputed scale/shift) + ReLU, tiled elementwise.
# ---------------------------------------------------------------------------
def _bn_relu_kernel(y_ref, scale_ref, shift_ref, o_ref):
    y = y_ref[0]                                     # (TM, Cpad) f32
    z = y * scale_ref[...] + shift_ref[...]          # broadcast over rows
    o_ref[0] = jnp.maximum(z, 0.0).astype(o_ref.dtype)


# ---------------------------------------------------------------------------
# Wrappers.
# ---------------------------------------------------------------------------
def _conv_pass(x_nhwc, w_folded, th):
    """Tiled conv pass. Returns pre-BN output (B, H*W, Cpad) f32 and per-block
    BN partials (B, n_blk, 2, Cpad) f32."""
    b, h, wd, cin = x_nhwc.shape
    cpad = w_folded.shape[-1]
    n_blk = h // th

    xp = jnp.pad(x_nhwc, ((0, 0), (1, 1), (1, 1), (0, 0)))   # zero-pad H and W
    # Overlapping row-blocks with a 1-row halo (built once in HBM by XLA,
    # (TH+2)/TH amplification instead of the 9x of a full im2col).
    xb = jnp.stack([xp[:, r * th:r * th + th + 2] for r in range(n_blk)], axis=1)
    # xb: (B, n_blk, TH+2, W+2, Cin)

    y_pre, stats = pl.pallas_call(
        _conv_bn_stats_kernel,
        out_shape=(jax.ShapeDtypeStruct((b, h * wd, cpad), jnp.float32),
                   jax.ShapeDtypeStruct((b, n_blk, 2, cpad), jnp.float32)),
        grid=(b, n_blk),
        in_specs=[
            pl.BlockSpec((1, 1, th + 2, wd + 2, cin),
                         lambda bi, ri: (bi, ri, 0, 0, 0)),
            # Weights resident across the whole grid (constant block index).
            pl.BlockSpec((9, w_folded.shape[1], cpad),
                         lambda bi, ri: (0, 0, 0)),
        ],
        out_specs=(
            pl.BlockSpec((1, th * wd, cpad), lambda bi, ri: (bi, ri, 0)),
            pl.BlockSpec((1, 1, 2, cpad), lambda bi, ri: (bi, ri, 0, 0)),
        ),
        compiler_params=pltpu.CompilerParams(
            dimension_semantics=("parallel", "parallel"),
            vmem_limit_bytes=VMEM_LIMIT),
    )(xb, w_folded)
    return y_pre, stats


def _bn_relu_pass(y_pre, scale, shift, tile_rows, out_dtype):
    b, n, cpad = y_pre.shape
    n_blk = n // tile_rows
    return pl.pallas_call(
        _bn_relu_kernel,
        out_shape=jax.ShapeDtypeStruct((b, n, cpad), out_dtype),
        grid=(b, n_blk),
        in_specs=[
            pl.BlockSpec((1, tile_rows, cpad), lambda bi, ri: (bi, ri, 0)),
            pl.BlockSpec((1, cpad), lambda bi, ri: (0, 0)),
            pl.BlockSpec((1, cpad), lambda bi, ri: (0, 0)),
        ],
        out_specs=pl.BlockSpec((1, tile_rows, cpad), lambda bi, ri: (bi, ri, 0)),
        compiler_params=pltpu.CompilerParams(
            dimension_semantics=("parallel", "parallel"),
            vmem_limit_bytes=VMEM_LIMIT),
    )(y_pre, scale, shift)


def _fold_weight(w_oihw, cin_pad, cout_pad, dtype):
    """OIHW -> (9, Cin_pad, Cout_pad), tap-major, zero padded channels."""
    cout, cin, _, _ = w_oihw.shape
    w_hwio = jnp.transpose(w_oihw, (2, 3, 1, 0))                     # (3,3,Cin,Cout)
    w_hwio = jnp.pad(w_hwio, ((0, 0), (0, 0),
                              (0, cin_pad - cin), (0, cout_pad - cout)))
    return w_hwio.reshape(9, cin_pad, cout_pad).astype(dtype)


def _stage(x_nhwc, w_folded, gamma, beta, th, out_dtype):
    """One Conv3x3 -> BatchNorm(batch stats) -> ReLU stage."""
    b, h, wd, _ = x_nhwc.shape
    cpad = w_folded.shape[-1]
    n = b * h * wd

    y_pre, stats = _conv_pass(x_nhwc, w_folded, th)
    s = jnp.sum(stats, axis=(0, 1))                  # (2, Cpad), global over B*H*W
    mean = s[0] / float(n)
    # Biased variance (train-mode BatchNorm normalization); f32 accumulation.
    var = jnp.maximum(s[1] / float(n) - mean * mean, 0.0)
    inv_std = jax.lax.rsqrt(var + EPS)

    gpad = jnp.pad(gamma.astype(jnp.float32), (0, cpad - gamma.shape[0]))
    bpad = jnp.pad(beta.astype(jnp.float32), (0, cpad - beta.shape[0]))
    scale = (gpad * inv_std).reshape(1, cpad)
    shift = (bpad - mean * gpad * inv_std).reshape(1, cpad)

    y = _bn_relu_pass(y_pre, scale, shift, th * wd, out_dtype)
    return y.reshape(b, h, wd, cpad)


@functools.partial(jax.jit, static_argnames=("compute_dtype",))
def double_conv(x_nchw, w1, g1, b1, w2, g2, b2, *, compute_dtype=jnp.bfloat16):
    """DoubleConv forward. x_nchw: (B, Cin, H, W); conv weights OIHW (no bias).

    MXU operands are cast to `compute_dtype` (default bf16); accumulation and
    all BatchNorm / elementwise math stay in f32.
    """
    b, cin, h, wd = x_nchw.shape
    cout = w1.shape[0]
    cpad = _round_up(cout, LANES)      # lane-dense outputs / GEMM N dim
    # Row-tile height (tunable): 8 keeps blocks small; halve the VMEM budget
    # on v7x (64 MiB/TC) when scaling up block sizes for production shapes.
    th = 8 if h % 8 == 0 else h

    x = jnp.transpose(x_nchw, (0, 2, 3, 1)).astype(compute_dtype)    # NCHW->NHWC
    w1f = _fold_weight(w1, cin, cpad, compute_dtype)                 # (9, Cin,  Cpad)
    w2f = _fold_weight(w2, cpad, cpad, compute_dtype)                # (9, Cpad, Cpad)

    y1 = _stage(x, w1f, g1, b1, th, compute_dtype)     # intermediate kept narrow
    y2 = _stage(y1, w2f, g2, b2, th, jnp.float32)
    return jnp.transpose(y2[..., :cout], (0, 3, 1, 2))               # NHWC->NCHW


# ---------------------------------------------------------------------------
# Pure-JAX reference mirroring the PyTorch module (training-mode BN).
# ---------------------------------------------------------------------------
def _reference_double_conv(x, w1, g1, b1, w2, g2, b2, matmul_dtype=jnp.float32):
    def conv(x_, w_):
        return jax.lax.conv_general_dilated(
            x_.astype(matmul_dtype), w_.astype(matmul_dtype),
            window_strides=(1, 1), padding="SAME",
            dimension_numbers=("NCHW", "OIHW", "NCHW"),
            preferred_element_type=jnp.float32,
            precision=jax.lax.Precision.HIGHEST)

    def bn_relu(y, g, bta):
        mean = jnp.mean(y, axis=(0, 2, 3), keepdims=True)
        var = jnp.mean((y - mean) ** 2, axis=(0, 2, 3), keepdims=True)
        out = (y - mean) * jax.lax.rsqrt(var + EPS)
        out = out * g.reshape(1, -1, 1, 1) + bta.reshape(1, -1, 1, 1)
        return jnp.maximum(out, 0.0)

    y = bn_relu(conv(x, w1), g1, b1)
    return bn_relu(conv(y, w2), g2, b2)


if __name__ == "__main__":
    B, C_IN, C_OUT, H, W = 2, 4, 8, 16, 16

    key = jax.random.PRNGKey(0)
    kx, kw1, kw2, kg1, kb1, kg2, kb2 = jax.random.split(key, 7)

    x = jax.random.normal(kx, (B, C_IN, H, W), dtype=jnp.float32)
    w1 = 0.2 * jax.random.normal(kw1, (C_OUT, C_IN, 3, 3), dtype=jnp.float32)
    w2 = 0.2 * jax.random.normal(kw2, (C_OUT, C_OUT, 3, 3), dtype=jnp.float32)
    g1 = 1.0 + 0.1 * jax.random.normal(kg1, (C_OUT,), dtype=jnp.float32)
    b1 = 0.1 * jax.random.normal(kb1, (C_OUT,), dtype=jnp.float32)
    g2 = 1.0 + 0.1 * jax.random.normal(kg2, (C_OUT,), dtype=jnp.float32)
    b2 = 0.1 * jax.random.normal(kb2, (C_OUT,), dtype=jnp.float32)

    # Fast path: bf16 MXU operands, f32 accumulation / BN math.
    out_bf16 = jax.block_until_ready(double_conv(x, w1, g1, b1, w2, g2, b2))
    assert out_bf16.shape == (B, C_OUT, H, W) and out_bf16.dtype == jnp.float32

    # f32 path (same kernels, f32 operands) for an exact-semantics check.
    out_f32 = jax.block_until_ready(
        double_conv(x, w1, g1, b1, w2, g2, b2, compute_dtype=jnp.float32))

    ref_f32 = jax.block_until_ready(
        _reference_double_conv(x, w1, g1, b1, w2, g2, b2, jnp.float32))
    ref_bf16 = jax.block_until_ready(
        _reference_double_conv(x, w1, g1, b1, w2, g2, b2, jnp.bfloat16))

    # 1) Exact module semantics (f32 operands vs f32 reference).
    assert jnp.allclose(out_f32, ref_f32, atol=5e-3, rtol=5e-3), (
        float(jnp.max(jnp.abs(out_f32 - ref_f32))))
    # 2) bf16 fast path vs a bf16-matmul reference (apples-to-apples).
    assert jnp.allclose(out_bf16, ref_bf16, atol=1e-2, rtol=1e-2), (
        float(jnp.max(jnp.abs(out_bf16 - ref_bf16))))
    # 3) Sanity: bf16 fast path stays close to the full-f32 reference.
    assert jnp.allclose(out_bf16, ref_f32, atol=1e-1, rtol=1e-1), (
        float(jnp.max(jnp.abs(out_bf16 - ref_f32))))

    print("KERNEL_OK")
</pallas_src>

<mosaic_0001>
module attributes {stable_mosaic.version = 11 : i64} {
  func.func @_conv_bn_stats_kernel(%arg0: i32, %arg1: i32, %arg2: memref<1x1x10x18x4xbf16, #tpu.memory_space<vmem>>, %arg3: memref<9x4x128xbf16, #tpu.memory_space<vmem>>, %arg4: memref<1x128x128xf32, #tpu.memory_space<vmem>>, %arg5: memref<1x1x2x128xf32, #tpu.memory_space<vmem>>) attributes {dimension_semantics = [#tpu.dimension_semantics<parallel>, #tpu.dimension_semantics<parallel>], iteration_bounds = array<i64: 2, 2>, scalar_prefetch = 0 : i64, scratch_operands = 0 : i64, tpu.core_type = #tpu.core_type<tc>, window_params = [{transform_indices = @transform_0, window_bounds = array<i64: 1, 1, 10, 18, 4>}, {pipeline_mode = #tpu.pipeline_mode<synchronous>, transform_indices = @transform_1, window_bounds = array<i64: 9, 4, 128>}, {transform_indices = @transform_2, window_bounds = array<i64: 1, 128, 128>}, {transform_indices = @transform_3, window_bounds = array<i64: 1, 1, 2, 128>}]} {
    %c0 = arith.constant 0 : index
    %c0_0 = arith.constant 0 : index
    %c0_1 = arith.constant 0 : index
    %c0_2 = arith.constant 0 : index
    %c0_3 = arith.constant 0 : index
    %0 = vector.load %arg2[%c0, %c0_0, %c0_1, %c0_2, %c0_3] : memref<1x1x10x18x4xbf16, #tpu.memory_space<vmem>>, vector<1x1x8x16x4xbf16>
    %1 = vector.shape_cast %0 : vector<1x1x8x16x4xbf16> to vector<8x16x4xbf16>
    %2 = vector.shape_cast %1 : vector<8x16x4xbf16> to vector<128x4xbf16>
    %c0_4 = arith.constant 0 : index
    %c0_5 = arith.constant 0 : index
    %c0_6 = arith.constant 0 : index
    %c1 = arith.constant 1 : index
    %c0_7 = arith.constant 0 : index
    %3 = vector.load %arg2[%c0_4, %c0_5, %c0_6, %c1, %c0_7] : memref<1x1x10x18x4xbf16, #tpu.memory_space<vmem>>, vector<1x1x8x16x4xbf16>
    %4 = vector.shape_cast %3 : vector<1x1x8x16x4xbf16> to vector<8x16x4xbf16>
    %5 = vector.shape_cast %4 : vector<8x16x4xbf16> to vector<128x4xbf16>
    %c0_8 = arith.constant 0 : index
    %c0_9 = arith.constant 0 : index
    %c0_10 = arith.constant 0 : index
    %c2 = arith.constant 2 : index
    %c0_11 = arith.constant 0 : index
    %6 = vector.load %arg2[%c0_8, %c0_9, %c0_10, %c2, %c0_11] : memref<1x1x10x18x4xbf16, #tpu.memory_space<vmem>>, vector<1x1x8x16x4xbf16>
    %7 = vector.shape_cast %6 : vector<1x1x8x16x4xbf16> to vector<8x16x4xbf16>
    %8 = vector.shape_cast %7 : vector<8x16x4xbf16> to vector<128x4xbf16>
    %c0_12 = arith.constant 0 : index
    %c0_13 = arith.constant 0 : index
    %c1_14 = arith.constant 1 : index
    %c0_15 = arith.constant 0 : index
    %c0_16 = arith.constant 0 : index
    %9 = vector.load %arg2[%c0_12, %c0_13, %c1_14, %c0_15, %c0_16] : memref<1x1x10x18x4xbf16, #tpu.memory_space<vmem>>, vector<1x1x8x16x4xbf16>
    %10 = vector.shape_cast %9 : vector<1x1x8x16x4xbf16> to vector<8x16x4xbf16>
    %11 = vector.shape_cast %10 : vector<8x16x4xbf16> to vector<128x4xbf16>
    %c0_17 = arith.constant 0 : index
    %c0_18 = arith.constant 0 : index
    %c1_19 = arith.constant 1 : index
    %c1_20 = arith.constant 1 : index
    %c0_21 = arith.constant 0 : index
    %12 = vector.load %arg2[%c0_17, %c0_18, %c1_19, %c1_20, %c0_21] : memref<1x1x10x18x4xbf16, #tpu.memory_space<vmem>>, vector<1x1x8x16x4xbf16>
    %13 = vector.shape_cast %12 : vector<1x1x8x16x4xbf16> to vector<8x16x4xbf16>
    %14 = vector.shape_cast %13 : vector<8x16x4xbf16> to vector<128x4xbf16>
    %c0_22 = arith.constant 0 : index
    %c0_23 = arith.constant 0 : index
    %c1_24 = arith.constant 1 : index
    %c2_25 = arith.constant 2 : index
    %c0_26 = arith.constant 0 : index
    %15 = vector.load %arg2[%c0_22, %c0_23, %c1_24, %c2_25, %c0_26] : memref<1x1x10x18x4xbf16, #tpu.memory_space<vmem>>, vector<1x1x8x16x4xbf16>
    %16 = vector.shape_cast %15 : vector<1x1x8x16x4xbf16> to vector<8x16x4xbf16>
    %17 = vector.shape_cast %16 : vector<8x16x4xbf16> to vector<128x4xbf16>
    %c0_27 = arith.constant 0 : index
    %c0_28 = arith.constant 0 : index
    %c2_29 = arith.constant 2 : index
    %c0_30 = arith.constant 0 : index
    %c0_31 = arith.constant 0 : index
    %18 = vector.load %arg2[%c0_27, %c0_28, %c2_29, %c0_30, %c0_31] : memref<1x1x10x18x4xbf16, #tpu.memory_space<vmem>>, vector<1x1x8x16x4xbf16>
    %19 = vector.shape_cast %18 : vector<1x1x8x16x4xbf16> to vector<8x16x4xbf16>
    %20 = vector.shape_cast %19 : vector<8x16x4xbf16> to vector<128x4xbf16>
    %c0_32 = arith.constant 0 : index
    %c0_33 = arith.constant 0 : index
    %c2_34 = arith.constant 2 : index
    %c1_35 = arith.constant 1 : index
    %c0_36 = arith.constant 0 : index
    %21 = vector.load %arg2[%c0_32, %c0_33, %c2_34, %c1_35, %c0_36] : memref<1x1x10x18x4xbf16, #tpu.memory_space<vmem>>, vector<1x1x8x16x4xbf16>
    %22 = vector.shape_cast %21 : vector<1x1x8x16x4xbf16> to vector<8x16x4xbf16>
    %23 = vector.shape_cast %22 : vector<8x16x4xbf16> to vector<128x4xbf16>
    %c0_37 = arith.constant 0 : index
    %c0_38 = arith.constant 0 : index
    %c2_39 = arith.constant 2 : index
    %c2_40 = arith.constant 2 : index
    %c0_41 = arith.constant 0 : index
    %24 = vector.load %arg2[%c0_37, %c0_38, %c2_39, %c2_40, %c0_41] : memref<1x1x10x18x4xbf16, #tpu.memory_space<vmem>>, vector<1x1x8x16x4xbf16>
    %25 = vector.shape_cast %24 : vector<1x1x8x16x4xbf16> to vector<8x16x4xbf16>
    %26 = vector.shape_cast %25 : vector<8x16x4xbf16> to vector<128x4xbf16>
    %c0_42 = arith.constant 0 : index
    %c0_43 = arith.constant 0 : index
    %c0_44 = arith.constant 0 : index
    %27 = vector.load %arg3[%c0_42, %c0_43, %c0_44] : memref<9x4x128xbf16, #tpu.memory_space<vmem>>, vector<1x4x128xbf16>
    %28 = vector.shape_cast %27 : vector<1x4x128xbf16> to vector<4x128xbf16>
    %cst = arith.constant dense<0.000000e+00> : vector<128x128xf32>
    %29 = tpu.matmul %2, %28, %cst {dimension_numbers = #tpu.dot_dimension_numbers<[1], [0], [0], [1], [0, 0, 1, 1], [], []>} : vector<128x4xbf16>, vector<4x128xbf16>, vector<128x128xf32> -> vector<128x128xf32>
    %c1_45 = arith.constant 1 : index
    %c0_46 = arith.constant 0 : index
    %c0_47 = arith.constant 0 : index
    %30 = vector.load %arg3[%c1_45, %c0_46, %c0_47] : memref<9x4x128xbf16, #tpu.memory_space<vmem>>, vector<1x4x128xbf16>
    %31 = vector.shape_cast %30 : vector<1x4x128xbf16> to vector<4x128xbf16>
    %cst_48 = arith.constant dense<0.000000e+00> : vector<128x128xf32>
    %32 = tpu.matmul %5, %31, %cst_48 {dimension_numbers = #tpu.dot_dimension_numbers<[1], [0], [0], [1], [0, 0, 1, 1], [], []>} : vector<128x4xbf16>, vector<4x128xbf16>, vector<128x128xf32> -> vector<128x128xf32>
    %33 = arith.addf %29, %32 : vector<128x128xf32>
    %c2_49 = arith.constant 2 : index
    %c0_50 = arith.constant 0 : index
    %c0_51 = arith.constant 0 : index
    %34 = vector.load %arg3[%c2_49, %c0_50, %c0_51] : memref<9x4x128xbf16, #tpu.memory_space<vmem>>, vector<1x4x128xbf16>
    %35 = vector.shape_cast %34 : vector<1x4x128xbf16> to vector<4x128xbf16>
    %cst_52 = arith.constant dense<0.000000e+00> : vector<128x128xf32>
    %36 = tpu.matmul %8, %35, %cst_52 {dimension_numbers = #tpu.dot_dimension_numbers<[1], [0], [0], [1], [0, 0, 1, 1], [], []>} : vector<128x4xbf16>, vector<4x128xbf16>, vector<128x128xf32> -> vector<128x128xf32>
    %37 = arith.addf %33, %36 : vector<128x128xf32>
    %c3 = arith.constant 3 : index
    %c0_53 = arith.constant 0 : index
    %c0_54 = arith.constant 0 : index
    %38 = vector.load %arg3[%c3, %c0_53, %c0_54] : memref<9x4x128xbf16, #tpu.memory_space<vmem>>, vector<1x4x128xbf16>
    %39 = vector.shape_cast %38 : vector<1x4x128xbf16> to vector<4x128xbf16>
    %cst_55 = arith.constant dense<0.000000e+00> : vector<128x128xf32>
    %40 = tpu.matmul %11, %39, %cst_55 {dimension_numbers = #tpu.dot_dimension_numbers<[1], [0], [0], [1], [0, 0, 1, 1], [], []>} : vector<128x4xbf16>, vector<4x128xbf16>, vector<128x128xf32> -> vector<128x128xf32>
    %41 = arith.addf %37, %40 : vector<128x128xf32>
    %c4 = arith.constant 4 : index
    %c0_56 = arith.constant 0 : index
    %c0_57 = arith.constant 0 : index
    %42 = vector.load %arg3[%c4, %c0_56, %c0_57] : memref<9x4x128xbf16, #tpu.memory_space<vmem>>, vector<1x4x128xbf16>
    %43 = vector.shape_cast %42 : vector<1x4x128xbf16> to vector<4x128xbf16>
    %cst_58 = arith.constant dense<0.000000e+00> : vector<128x128xf32>
    %44 = tpu.matmul %14, %43, %cst_58 {dimension_numbers = #tpu.dot_dimension_numbers<[1], [0], [0], [1], [0, 0, 1, 1], [], []>} : vector<128x4xbf16>, vector<4x128xbf16>, vector<128x128xf32> -> vector<128x128xf32>
    %45 = arith.addf %41, %44 : vector<128x128xf32>
    %c5 = arith.constant 5 : index
    %c0_59 = arith.constant 0 : index
    %c0_60 = arith.constant 0 : index
    %46 = vector.load %arg3[%c5, %c0_59, %c0_60] : memref<9x4x128xbf16, #tpu.memory_space<vmem>>, vector<1x4x128xbf16>
    %47 = vector.shape_cast %46 : vector<1x4x128xbf16> to vector<4x128xbf16>
    %cst_61 = arith.constant dense<0.000000e+00> : vector<128x128xf32>
    %48 = tpu.matmul %17, %47, %cst_61 {dimension_numbers = #tpu.dot_dimension_numbers<[1], [0], [0], [1], [0, 0, 1, 1], [], []>} : vector<128x4xbf16>, vector<4x128xbf16>, vector<128x128xf32> -> vector<128x128xf32>
    %49 = arith.addf %45, %48 : vector<128x128xf32>
    %c6 = arith.constant 6 : index
    %c0_62 = arith.constant 0 : index
    %c0_63 = arith.constant 0 : index
    %50 = vector.load %arg3[%c6, %c0_62, %c0_63] : memref<9x4x128xbf16, #tpu.memory_space<vmem>>, vector<1x4x128xbf16>
    %51 = vector.shape_cast %50 : vector<1x4x128xbf16> to vector<4x128xbf16>
    %cst_64 = arith.constant dense<0.000000e+00> : vector<128x128xf32>
    %52 = tpu.matmul %20, %51, %cst_64 {dimension_numbers = #tpu.dot_dimension_numbers<[1], [0], [0], [1], [0, 0, 1, 1], [], []>} : vector<128x4xbf16>, vector<4x128xbf16>, vector<128x128xf32> -> vector<128x128xf32>
    %53 = arith.addf %49, %52 : vector<128x128xf32>
    %c7 = arith.constant 7 : index
    %c0_65 = arith.constant 0 : index
    %c0_66 = arith.constant 0 : index
    %54 = vector.load %arg3[%c7, %c0_65, %c0_66] : memref<9x4x128xbf16, #tpu.memory_space<vmem>>, vector<1x4x128xbf16>
    %55 = vector.shape_cast %54 : vector<1x4x128xbf16> to vector<4x128xbf16>
    %cst_67 = arith.constant dense<0.000000e+00> : vector<128x128xf32>
    %56 = tpu.matmul %23, %55, %cst_67 {dimension_numbers = #tpu.dot_dimension_numbers<[1], [0], [0], [1], [0, 0, 1, 1], [], []>} : vector<128x4xbf16>, vector<4x128xbf16>, vector<128x128xf32> -> vector<128x128xf32>
    %57 = arith.addf %53, %56 : vector<128x128xf32>
    %c8 = arith.constant 8 : index
    %c0_68 = arith.constant 0 : index
    %c0_69 = arith.constant 0 : index
    %58 = vector.load %arg3[%c8, %c0_68, %c0_69] : memref<9x4x128xbf16, #tpu.memory_space<vmem>>, vector<1x4x128xbf16>
    %59 = vector.shape_cast %58 : vector<1x4x128xbf16> to vector<4x128xbf16>
    %cst_70 = arith.constant dense<0.000000e+00> : vector<128x128xf32>
    %60 = tpu.matmul %26, %59, %cst_70 {dimension_numbers = #tpu.dot_dimension_numbers<[1], [0], [0], [1], [0, 0, 1, 1], [], []>} : vector<128x4xbf16>, vector<4x128xbf16>, vector<128x128xf32> -> vector<128x128xf32>
    %61 = arith.addf %57, %60 : vector<128x128xf32>
    %c0_71 = arith.constant 0 : index
    %c0_72 = arith.constant 0 : index
    %c0_73 = arith.constant 0 : index
    %62 = vector.load %arg4[%c0_71, %c0_72, %c0_73] : memref<1x128x128xf32, #tpu.memory_space<vmem>>, vector<1x128x128xf32>
    %63 = vector.shape_cast %62 : vector<1x128x128xf32> to vector<128x128xf32>
    %64 = vector.shape_cast %61 : vector<128x128xf32> to vector<1x128x128xf32>
    tpu.vector_store %arg4[%c0_71, %c0_72, %c0_73], %64 {strides = array<i32>} : memref<1x128x128xf32, #tpu.memory_space<vmem>>, vector<1x128x128xf32>,
    %cst_74 = arith.constant dense<0.000000e+00> : vector<128xf32>
    %65 = vector.multi_reduction <add>, %61, %cst_74 [0] : vector<128x128xf32> to vector<128xf32>
    %66 = vector.shape_cast %65 : vector<128xf32> to vector<1x128xf32>
    %c0_75 = arith.constant 0 : index
    %c0_76 = arith.constant 0 : index
    %c0_77 = arith.constant 0 : index
    %c0_78 = arith.constant 0 : index
    %67 = vector.load %arg5[%c0_75, %c0_76, %c0_77, %c0_78] : memref<1x1x2x128xf32, #tpu.memory_space<vmem>>, vector<1x1x1x128xf32>
    %68 = vector.shape_cast %67 : vector<1x1x1x128xf32> to vector<1x128xf32>
    %69 = vector.shape_cast %66 : vector<1x128xf32> to vector<1x1x1x128xf32>
    tpu.vector_store %arg5[%c0_75, %c0_76, %c0_77, %c0_78], %69 {strides = array<i32>} : memref<1x1x2x128xf32, #tpu.memory_space<vmem>>, vector<1x1x1x128xf32>,
    %70 = arith.mulf %61, %61 : vector<128x128xf32>
    %cst_79 = arith.constant dense<0.000000e+00> : vector<128xf32>
    %71 = vector.multi_reduction <add>, %70, %cst_79 [0] : vector<128x128xf32> to vector<128xf32>
    %72 = vector.shape_cast %71 : vector<128xf32> to vector<1x128xf32>
    %c0_80 = arith.constant 0 : index
    %c0_81 = arith.constant 0 : index
    %c1_82 = arith.constant 1 : index
    %c0_83 = arith.constant 0 : index
    %73 = vector.load %arg5[%c0_80, %c0_81, %c1_82, %c0_83] : memref<1x1x2x128xf32, #tpu.memory_space<vmem>>, vector<1x1x1x128xf32>
    %74 = vector.shape_cast %73 : vector<1x1x1x128xf32> to vector<1x128xf32>
    %75 = vector.shape_cast %72 : vector<1x128xf32> to vector<1x1x1x128xf32>
    tpu.vector_store %arg5[%c0_80, %c0_81, %c1_82, %c0_83], %75 {strides = array<i32>} : memref<1x1x2x128xf32, #tpu.memory_space<vmem>>, vector<1x1x1x128xf32>,
    return
  }
  func.func @transform_0(%arg0: i32, %arg1: i32) -> (i32, i32, i32, i32, i32) {
    %c0_i32 = arith.constant 0 : i32
    %c0_i32_0 = arith.constant 0 : i32
    %c0_i32_1 = arith.constant 0 : i32
    %c0_i32_2 = arith.constant 0 : i32
    return %arg0, %arg1, %c0_i32, %c0_i32_0, %c0_i32_1 : i32, i32, i32, i32, i32
  }
  func.func @transform_1(%arg0: i32, %arg1: i32) -> (i32, i32, i32) {
    %c0_i32 = arith.constant 0 : i32
    %c0_i32_0 = arith.constant 0 : i32
    %c0_i32_1 = arith.constant 0 : i32
    %c0_i32_2 = arith.constant 0 : i32
    return %c0_i32, %c0_i32_0, %c0_i32_1 : i32, i32, i32
  }
  func.func @transform_2(%arg0: i32, %arg1: i32) -> (i32, i32, i32) {
    %c0_i32 = arith.constant 0 : i32
    %c0_i32_0 = arith.constant 0 : i32
    return %arg0, %arg1, %c0_i32 : i32, i32, i32
  }
  func.func @transform_3(%arg0: i32, %arg1: i32) -> (i32, i32, i32, i32) {
    %c0_i32 = arith.constant 0 : i32
    %c0_i32_0 = arith.constant 0 : i32
    %c0_i32_1 = arith.constant 0 : i32
    return %arg0, %arg1, %c0_i32, %c0_i32_0 : i32, i32, i32, i32
  }
}

module attributes {stable_mosaic.version = 11 : i64} {
  func.func @_bn_relu_kernel(%arg0: i32, %arg1: i32, %arg2: memref<1x128x128xf32, #tpu.memory_space<vmem>>, %arg3: memref<1x128xf32, #tpu.memory_space<vmem>>, %arg4: memref<1x128xf32, #tpu.memory_space<vmem>>, %arg5: memref<1x128x128xbf16, #tpu.memory_space<vmem>>) attributes {dimension_semantics = [#tpu.dimension_semantics<parallel>, #tpu.dimension_semantics<parallel>], iteration_bounds = array<i64: 2, 2>, scalar_prefetch = 0 : i64, scratch_operands = 0 : i64, tpu.core_type = #tpu.core_type<tc>, window_params = [{transform_indices = @transform_0, window_bounds = array<i64: 1, 128, 128>}, {pipeline_mode = #tpu.pipeline_mode<synchronous>, transform_indices = @transform_1, window_bounds = array<i64: 1, 128>}, {pipeline_mode = #tpu.pipeline_mode<synchronous>, transform_indices = @transform_2, window_bounds = array<i64: 1, 128>}, {transform_indices = @transform_3, window_bounds = array<i64: 1, 128, 128>}]} {
    %c0 = arith.constant 0 : index
    %c0_0 = arith.constant 0 : index
    %c0_1 = arith.constant 0 : index
    %0 = vector.load %arg2[%c0, %c0_0, %c0_1] : memref<1x128x128xf32, #tpu.memory_space<vmem>>, vector<1x128x128xf32>
    %1 = vector.shape_cast %0 : vector<1x128x128xf32> to vector<128x128xf32>
    %c0_2 = arith.constant 0 : index
    %c0_3 = arith.constant 0 : index
    %2 = vector.load %arg3[%c0_2, %c0_3] : memref<1x128xf32, #tpu.memory_space<vmem>>, vector<1x128xf32>
    %3 = vector.broadcast %2 : vector<1x128xf32> to vector<128x128xf32>
    %4 = arith.mulf %1, %3 : vector<128x128xf32>
    %c0_4 = arith.constant 0 : index
    %c0_5 = arith.constant 0 : index
    %5 = vector.load %arg4[%c0_4, %c0_5] : memref<1x128xf32, #tpu.memory_space<vmem>>, vector<1x128xf32>
    %6 = vector.broadcast %5 : vector<1x128xf32> to vector<128x128xf32>
    %7 = arith.addf %4, %6 : vector<128x128xf32>
    %cst = arith.constant 0.000000e+00 : f32
    %8 = vector.broadcast %cst : f32 to vector<128x128xf32>
    %9 = arith.maximumf %7, %8 : vector<128x128xf32>
    %10 = arith.truncf %9 : vector<128x128xf32> to vector<128x128xbf16>
    %c0_6 = arith.constant 0 : index
    %c0_7 = arith.constant 0 : index
    %c0_8 = arith.constant 0 : index
    %11 = vector.load %arg5[%c0_6, %c0_7, %c0_8] : memref<1x128x128xbf16, #tpu.memory_space<vmem>>, vector<1x128x128xbf16>
    %12 = vector.shape_cast %11 : vector<1x128x128xbf16> to vector<128x128xbf16>
    %13 = vector.shape_cast %10 : vector<128x128xbf16> to vector<1x128x128xbf16>
    tpu.vector_store %arg5[%c0_6, %c0_7, %c0_8], %13 {strides = array<i32>} : memref<1x128x128xbf16, #tpu.memory_space<vmem>>, vector<1x128x128xbf16>,
    return
  }
  func.func @transform_0(%arg0: i32, %arg1: i32) -> (i32, i32, i32) {
    %c0_i32 = arith.constant 0 : i32
    %c0_i32_0 = arith.constant 0 : i32
    return %arg0, %arg1, %c0_i32 : i32, i32, i32
  }
  func.func @transform_1(%arg0: i32, %arg1: i32) -> (i32, i32) {
    %c0_i32 = arith.constant 0 : i32
    %c0_i32_0 = arith.constant 0 : i32
    %c0_i32_1 = arith.constant 0 : i32
    return %c0_i32, %c0_i32_0 : i32, i32
  }
  func.func @transform_2(%arg0: i32, %arg1: i32) -> (i32, i32) {
    %c0_i32 = arith.constant 0 : i32
    %c0_i32_0 = arith.constant 0 : i32
    %c0_i32_1 = arith.constant 0 : i32
    return %c0_i32, %c0_i32_0 : i32, i32
  }
  func.func @transform_3(%arg0: i32, %arg1: i32) -> (i32, i32, i32) {
    %c0_i32 = arith.constant 0 : i32
    %c0_i32_0 = arith.constant 0 : i32
    return %arg0, %arg1, %c0_i32 : i32, i32, i32
  }
}

module attributes {stable_mosaic.version = 11 : i64} {
  func.func @_conv_bn_stats_kernel(%arg0: i32, %arg1: i32, %arg2: memref<1x1x10x18x128xbf16, #tpu.memory_space<vmem>>, %arg3: memref<9x128x128xbf16, #tpu.memory_space<vmem>>, %arg4: memref<1x128x128xf32, #tpu.memory_space<vmem>>, %arg5: memref<1x1x2x128xf32, #tpu.memory_space<vmem>>) attributes {dimension_semantics = [#tpu.dimension_semantics<parallel>, #tpu.dimension_semantics<parallel>], iteration_bounds = array<i64: 2, 2>, scalar_prefetch = 0 : i64, scratch_operands = 0 : i64, tpu.core_type = #tpu.core_type<tc>, window_params = [{transform_indices = @transform_0, window_bounds = array<i64: 1, 1, 10, 18, 128>}, {pipeline_mode = #tpu.pipeline_mode<synchronous>, transform_indices = @transform_1, window_bounds = array<i64: 9, 128, 128>}, {transform_indices = @transform_2, window_bounds = array<i64: 1, 128, 128>}, {transform_indices = @transform_3, window_bounds = array<i64: 1, 1, 2, 128>}]} {
    %c0 = arith.constant 0 : index
    %c0_0 = arith.constant 0 : index
    %c0_1 = arith.constant 0 : index
    %c0_2 = arith.constant 0 : index
    %c0_3 = arith.constant 0 : index
    %0 = vector.load %arg2[%c0, %c0_0, %c0_1, %c0_2, %c0_3] : memref<1x1x10x18x128xbf16, #tpu.memory_space<vmem>>, vector<1x1x8x16x128xbf16>
    %1 = vector.shape_cast %0 : vector<1x1x8x16x128xbf16> to vector<8x16x128xbf16>
    %2 = vector.shape_cast %1 : vector<8x16x128xbf16> to vector<128x128xbf16>
    %c0_4 = arith.constant 0 : index
    %c0_5 = arith.constant 0 : index
    %c0_6 = arith.constant 0 : index
    %c1 = arith.constant 1 : index
    %c0_7 = arith.constant 0 : index
    %3 = vector.load %arg2[%c0_4, %c0_5, %c0_6, %c1, %c0_7] : memref<1x1x10x18x128xbf16, #tpu.memory_space<vmem>>, vector<1x1x8x16x128xbf16>
    %4 = vector.shape_cast %3 : vector<1x1x8x16x128xbf16> to vector<8x16x128xbf16>
    %5 = vector.shape_cast %4 : vector<8x16x128xbf16> to vector<128x128xbf16>
    %c0_8 = arith.constant 0 : index
    %c0_9 = arith.constant 0 : index
    %c0_10 = arith.constant 0 : index
    %c2 = arith.constant 2 : index
    %c0_11 = arith.constant 0 : index
    %6 = vector.load %arg2[%c0_8, %c0_9, %c0_10, %c2, %c0_11] : memref<1x1x10x18x128xbf16, #tpu.memory_space<vmem>>, vector<1x1x8x16x128xbf16>
    %7 = vector.shape_cast %6 : vector<1x1x8x16x128xbf16> to vector<8x16x128xbf16>
    %8 = vector.shape_cast %7 : vector<8x16x128xbf16> to vector<128x128xbf16>
    %c0_12 = arith.constant 0 : index
    %c0_13 = arith.constant 0 : index
    %c1_14 = arith.constant 1 : index
    %c0_15 = arith.constant 0 : index
    %c0_16 = arith.constant 0 : index
    %9 = vector.load %arg2[%c0_12, %c0_13, %c1_14, %c0_15, %c0_16] : memref<1x1x10x18x128xbf16, #tpu.memory_space<vmem>>, vector<1x1x8x16x128xbf16>
    %10 = vector.shape_cast %9 : vector<1x1x8x16x128xbf16> to vector<8x16x128xbf16>
    %11 = vector.shape_cast %10 : vector<8x16x128xbf16> to vector<128x128xbf16>
    %c0_17 = arith.constant 0 : index
    %c0_18 = arith.constant 0 : index
    %c1_19 = arith.constant 1 : index
    %c1_20 = arith.constant 1 : index
    %c0_21 = arith.constant 0 : index
    %12 = vector.load %arg2[%c0_17, %c0_18, %c1_19, %c1_20, %c0_21] : memref<1x1x10x18x128xbf16, #tpu.memory_space<vmem>>, vector<1x1x8x16x128xbf16>
    %13 = vector.shape_cast %12 : vector<1x1x8x16x128xbf16> to vector<8x16x128xbf16>
    %14 = vector.shape_cast %13 : vector<8x16x128xbf16> to vector<128x128xbf16>
    %c0_22 = arith.constant 0 : index
    %c0_23 = arith.constant 0 : index
    %c1_24 = arith.constant 1 : index
    %c2_25 = arith.constant 2 : index
    %c0_26 = arith.constant 0 : index
    %15 = vector.load %arg2[%c0_22, %c0_23, %c1_24, %c2_25, %c0_26] : memref<1x1x10x18x128xbf16, #tpu.memory_space<vmem>>, vector<1x1x8x16x128xbf16>
    %16 = vector.shape_cast %15 : vector<1x1x8x16x128xbf16> to vector<8x16x128xbf16>
    %17 = vector.shape_cast %16 : vector<8x16x128xbf16> to vector<128x128xbf16>
    %c0_27 = arith.constant 0 : index
    %c0_28 = arith.constant 0 : index
    %c2_29 = arith.constant 2 : index
    %c0_30 = arith.constant 0 : index
    %c0_31 = arith.constant 0 : index
    %18 = vector.load %arg2[%c0_27, %c0_28, %c2_29, %c0_30, %c0_31] : memref<1x1x10x18x128xbf16, #tpu.memory_space<vmem>>, vector<1x1x8x16x128xbf16>
    %19 = vector.shape_cast %18 : vector<1x1x8x16x128xbf16> to vector<8x16x128xbf16>
    %20 = vector.shape_cast %19 : vector<8x16x128xbf16> to vector<128x128xbf16>
    %c0_32 = arith.constant 0 : index
    %c0_33 = arith.constant 0 : index
    %c2_34 = arith.constant 2 : index
    %c1_35 = arith.constant 1 : index
    %c0_36 = arith.constant 0 : index
    %21 = vector.load %arg2[%c0_32, %c0_33, %c2_34, %c1_35, %c0_36] : memref<1x1x10x18x128xbf16, #tpu.memory_space<vmem>>, vector<1x1x8x16x128xbf16>
    %22 = vector.shape_cast %21 : vector<1x1x8x16x128xbf16> to vector<8x16x128xbf16>
    %23 = vector.shape_cast %22 : vector<8x16x128xbf16> to vector<128x128xbf16>
    %c0_37 = arith.constant 0 : index
    %c0_38 = arith.constant 0 : index
    %c2_39 = arith.constant 2 : index
    %c2_40 = arith.constant 2 : index
    %c0_41 = arith.constant 0 : index
    %24 = vector.load %arg2[%c0_37, %c0_38, %c2_39, %c2_40, %c0_41] : memref<1x1x10x18x128xbf16, #tpu.memory_space<vmem>>, vector<1x1x8x16x128xbf16>
    %25 = vector.shape_cast %24 : vector<1x1x8x16x128xbf16> to vector<8x16x128xbf16>
    %26 = vector.shape_cast %25 : vector<8x16x128xbf16> to vector<128x128xbf16>
    %27 = tpu.concatenate %2, %5, %8, %11, %14, %17, %20, %23, %26 in 1 : vector<128x128xbf16>, vector<128x128xbf16>, vector<128x128xbf16>, vector<128x128xbf16>, vector<128x128xbf16>, vector<128x128xbf16>, vector<128x128xbf16>, vector<128x128xbf16>, vector<128x128xbf16> -> vector<128x1152xbf16>
    %c0_42 = arith.constant 0 : index
    %c0_43 = arith.constant 0 : index
    %c0_44 = arith.constant 0 : index
    %28 = vector.load %arg3[%c0_42, %c0_43, %c0_44] : memref<9x128x128xbf16, #tpu.memory_space<vmem>>, vector<9x128x128xbf16>
    %29 = vector.shape_cast %28 : vector<9x128x128xbf16> to vector<1152x128xbf16>
    %cst = arith.constant dense<0.000000e+00> : vector<128x128xf32>
    %30 = tpu.matmul %27, %29, %cst {dimension_numbers = #tpu.dot_dimension_numbers<[1], [0], [0], [1], [0, 0, 1, 1], [], []>} : vector<128x1152xbf16>, vector<1152x128xbf16>, vector<128x128xf32> -> vector<128x128xf32>
    %c0_45 = arith.constant 0 : index
    %c0_46 = arith.constant 0 : index
    %c0_47 = arith.constant 0 : index
    %31 = vector.load %arg4[%c0_45, %c0_46, %c0_47] : memref<1x128x128xf32, #tpu.memory_space<vmem>>, vector<1x128x128xf32>
    %32 = vector.shape_cast %31 : vector<1x128x128xf32> to vector<128x128xf32>
    %33 = vector.shape_cast %30 : vector<128x128xf32> to vector<1x128x128xf32>
    tpu.vector_store %arg4[%c0_45, %c0_46, %c0_47], %33 {strides = array<i32>} : memref<1x128x128xf32, #tpu.memory_space<vmem>>, vector<1x128x128xf32>,
    %cst_48 = arith.constant dense<0.000000e+00> : vector<128xf32>
    %34 = vector.multi_reduction <add>, %30, %cst_48 [0] : vector<128x128xf32> to vector<128xf32>
    %35 = vector.shape_cast %34 : vector<128xf32> to vector<1x128xf32>
    %c0_49 = arith.constant 0 : index
    %c0_50 = arith.constant 0 : index
    %c0_51 = arith.constant 0 : index
    %c0_52 = arith.constant 0 : index
    %36 = vector.load %arg5[%c0_49, %c0_50, %c0_51, %c0_52] : memref<1x1x2x128xf32, #tpu.memory_space<vmem>>, vector<1x1x1x128xf32>
    %37 = vector.shape_cast %36 : vector<1x1x1x128xf32> to vector<1x128xf32>
    %38 = vector.shape_cast %35 : vector<1x128xf32> to vector<1x1x1x128xf32>
    tpu.vector_store %arg5[%c0_49, %c0_50, %c0_51, %c0_52], %38 {strides = array<i32>} : memref<1x1x2x128xf32, #tpu.memory_space<vmem>>, vector<1x1x1x128xf32>,
    %39 = arith.mulf %30, %30 : vector<128x128xf32>
    %cst_53 = arith.constant dense<0.000000e+00> : vector<128xf32>
    %40 = vector.multi_reduction <add>, %39, %cst_53 [0] : vector<128x128xf32> to vector<128xf32>
    %41 = vector.shape_cast %40 : vector<128xf32> to vector<1x128xf32>
    %c0_54 = arith.constant 0 : index
    %c0_55 = arith.constant 0 : index
    %c1_56 = arith.constant 1 : index
    %c0_57 = arith.constant 0 : index
    %42 = vector.load %arg5[%c0_54, %c0_55, %c1_56, %c0_57] : memref<1x1x2x128xf32, #tpu.memory_space<vmem>>, vector<1x1x1x128xf32>
    %43 = vector.shape_cast %42 : vector<1x1x1x128xf32> to vector<1x128xf32>
    %44 = vector.shape_cast %41 : vector<1x128xf32> to vector<1x1x1x128xf32>
    tpu.vector_store %arg5[%c0_54, %c0_55, %c1_56, %c0_57], %44 {strides = array<i32>} : memref<1x1x2x128xf32, #tpu.memory_space<vmem>>, vector<1x1x1x128xf32>,
    return
  }
  func.func @transform_0(%arg0: i32, %arg1: i32) -> (i32, i32, i32, i32, i32) {
    %c0_i32 = arith.constant 0 : i32
    %c0_i32_0 = arith.constant 0 : i32
    %c0_i32_1 = arith.constant 0 : i32
    %c0_i32_2 = arith.constant 0 : i32
    return %arg0, %arg1, %c0_i32, %c0_i32_0, %c0_i32_1 : i32, i32, i32, i32, i32
  }
  func.func @transform_1(%arg0: i32, %arg1: i32) -> (i32, i32, i32) {
    %c0_i32 = arith.constant 0 : i32
    %c0_i32_0 = arith.constant 0 : i32
    %c0_i32_1 = arith.constant 0 : i32
    %c0_i32_2 = arith.constant 0 : i32
    return %c0_i32, %c0_i32_0, %c0_i32_1 : i32, i32, i32
  }
  func.func @transform_2(%arg0: i32, %arg1: i32) -> (i32, i32, i32) {
    %c0_i32 = arith.constant 0 : i32
    %c0_i32_0 = arith.constant 0 : i32
    return %arg0, %arg1, %c0_i32 : i32, i32, i32
  }
  func.func @transform_3(%arg0: i32, %arg1: i32) -> (i32, i32, i32, i32) {
    %c0_i32 = arith.constant 0 : i32
    %c0_i32_0 = arith.constant 0 : i32
    %c0_i32_1 = arith.constant 0 : i32
    return %arg0, %arg1, %c0_i32, %c0_i32_0 : i32, i32, i32, i32
  }
}

module attributes {stable_mosaic.version = 11 : i64} {
  func.func @_bn_relu_kernel(%arg0: i32, %arg1: i32, %arg2: memref<1x128x128xf32, #tpu.memory_space<vmem>>, %arg3: memref<1x128xf32, #tpu.memory_space<vmem>>, %arg4: memref<1x128xf32, #tpu.memory_space<vmem>>, %arg5: memref<1x128x128xf32, #tpu.memory_space<vmem>>) attributes {dimension_semantics = [#tpu.dimension_semantics<parallel>, #tpu.dimension_semantics<parallel>], iteration_bounds = array<i64: 2, 2>, scalar_prefetch = 0 : i64, scratch_operands = 0 : i64, tpu.core_type = #tpu.core_type<tc>, window_params = [{transform_indices = @transform_0, window_bounds = array<i64: 1, 128, 128>}, {pipeline_mode = #tpu.pipeline_mode<synchronous>, transform_indices = @transform_1, window_bounds = array<i64: 1, 128>}, {pipeline_mode = #tpu.pipeline_mode<synchronous>, transform_indices = @transform_2, window_bounds = array<i64: 1, 128>}, {transform_indices = @transform_3, window_bounds = array<i64: 1, 128, 128>}]} {
    %c0 = arith.constant 0 : index
    %c0_0 = arith.constant 0 : index
    %c0_1 = arith.constant 0 : index
    %0 = vector.load %arg2[%c0, %c0_0, %c0_1] : memref<1x128x128xf32, #tpu.memory_space<vmem>>, vector<1x128x128xf32>
    %1 = vector.shape_cast %0 : vector<1x128x128xf32> to vector<128x128xf32>
    %c0_2 = arith.constant 0 : index
    %c0_3 = arith.constant 0 : index
    %2 = vector.load %arg3[%c0_2, %c0_3] : memref<1x128xf32, #tpu.memory_space<vmem>>, vector<1x128xf32>
    %3 = vector.broadcast %2 : vector<1x128xf32> to vector<128x128xf32>
    %4 = arith.mulf %1, %3 : vector<128x128xf32>
    %c0_4 = arith.constant 0 : index
    %c0_5 = arith.constant 0 : index
    %5 = vector.load %arg4[%c0_4, %c0_5] : memref<1x128xf32, #tpu.memory_space<vmem>>, vector<1x128xf32>
    %6 = vector.broadcast %5 : vector<1x128xf32> to vector<128x128xf32>
    %7 = arith.addf %4, %6 : vector<128x128xf32>
    %cst = arith.constant 0.000000e+00 : f32
    %8 = vector.broadcast %cst : f32 to vector<128x128xf32>
    %9 = arith.maximumf %7, %8 : vector<128x128xf32>
    %c0_6 = arith.constant 0 : index
    %c0_7 = arith.constant 0 : index
    %c0_8 = arith.constant 0 : index
    %10 = vector.load %arg5[%c0_6, %c0_7, %c0_8] : memref<1x128x128xf32, #tpu.memory_space<vmem>>, vector<1x128x128xf32>
    %11 = vector.shape_cast %10 : vector<1x128x128xf32> to vector<128x128xf32>
    %12 = vector.shape_cast %9 : vector<128x128xf32> to vector<1x128x128xf32>
    tpu.vector_store %arg5[%c0_6, %c0_7, %c0_8], %12 {strides = array<i32>} : memref<1x128x128xf32, #tpu.memory_space<vmem>>, vector<1x128x128xf32>,
    return
  }
  func.func @transform_0(%arg0: i32, %arg1: i32) -> (i32, i32, i32) {
    %c0_i32 = arith.constant 0 : i32
    %c0_i32_0 = arith.constant 0 : i32
    return %arg0, %arg1, %c0_i32 : i32, i32, i32
  }
  func.func @transform_1(%arg0: i32, %arg1: i32) -> (i32, i32) {
    %c0_i32 = arith.constant 0 : i32
    %c0_i32_0 = arith.constant 0 : i32
    %c0_i32_1 = arith.constant 0 : i32
    return %c0_i32, %c0_i32_0 : i32, i32
  }
  func.func @transform_2(%arg0: i32, %arg1: i32) -> (i32, i32) {
    %c0_i32 = arith.constant 0 : i32
    %c0_i32_0 = arith.constant 0 : i32
    %c0_i32_1 = arith.constant 0 : i32
    return %c0_i32, %c0_i32_0 : i32, i32
  }
  func.func @transform_3(%arg0: i32, %arg1: i32) -> (i32, i32, i32) {
    %c0_i32 = arith.constant 0 : i32
    %c0_i32_0 = arith.constant 0 : i32
    return %arg0, %arg1, %c0_i32 : i32, i32, i32
  }
}

</mosaic_0001>

<bundles_post_ra>
// kernel: double_conv.5
= control target key start
LH: loop header
LB: loop body
LE: loop exit
PB: predicated region body
PF: predicated region fallthrough
CT: control target
= control target key end

     0   :  { %s652_s12 = smov 0   ;;  %s654_s13 = smov 0   ;;  %s777_s0 = inlined_call_operand.vmem [shape: f32[2,256,128], index: 0, kind: input, shape index: {}]   ;;  %s778_s1 = inlined_call_operand.vmem [shape: f32[1,128], index: 1, kind: input, shape index: {}]   ;;  %s779_s2 = inlined_call_operand.vmem [shape: f32[1,128], index: 2, kind: input, shape index: {}]   ;;  %s780_s3 = inlined_call_operand.vmem [shape: bf16[2,256,128], index: 3, kind: output, shape index: {}]  }
   0x1   :  { %s656_s14 = smov 0   ;;  %s658_s15 = smov 0  }
   0x2   :  { %s660_s16 = smov 0  }
   0x3 LB: > { %s22_s17 = sadd.s32 1, %s622_s14  ;;  %s25_s18 = sadd.s32 1, %s626_s15  ;;  %s630_s16 = sphi %s660_s16, %s13_s16   ;;  %s626_s15 = sphi %s658_s15, %s784_s15   ;;  %s622_s14 = sphi %s656_s14, %s783_s14   ;;  %s618_s13 = sphi %s654_s13, %s782_s13   ;;  %s614_s12 = sphi %s652_s12, %s781_s12  }
   0x4   : > { %p23_p0 = scmp.ge.s32.totalorder %s22_s17, 2  ;;  %p462_p1 = scmp.ge.s32.totalorder %s630_s16, 1 }
   0x5   : > { %p158_p2 = scmp.lt.s32.totalorder %s630_s16, 5 }
   0x6   : > { %s786_s17 = smov (%p23_p0, %s22_s17), 0  ;;  %s788_s18 = smov (!%p23_p0, %s25_s18), %s626_s15 }
   0x7   : > { %p159_p3 = pnand %p462_p1, %p158_p2  ;;  %p27_p4 = scmp.ge.s32.totalorder %s788_s18, 2 }
   0x8   : > { %s463_s19 = sshll.u32 (!%p159_p3), %s614_s12, 4  ;;  %p191_p5 = scmp.lt.s32.totalorder (!%p159_p3), %s618_s13, 1  ;;  %v688_v0 = vld [vmem:[%s778_s1] ss:$0 sm:$0xff] (!%p159_p3) }
   0x9   : > { %s790_s18 = smov (%p27_p4, %s788_s18), 0  ;;  %162 = sbr.rel (%p159_p3) target bundleno = 42 (0x2a), region = 32 }
   0xa   : > { %p193_p6 = scmp.lt.s32.totalorder (!%p159_p3), %s463_s19, 31  ;;  %v698_v1 = vld [vmem:[%s779_s2] ss:$0 sm:$0xff] (!%p159_p3) }
  0x10   : > { %s792_s13 = smov (!%p191_p5, %s618_s13), 1  ;;  %s794_s19 = smov (!%p193_p6, %s463_s19), 31 }
  0x11   : > { %s464_s20 = sshll.u32 %s792_s13, 5 }
  0x12   : > { %s682_s21 = sadd.s32 %s464_s20, %s794_s19 }
  0x13   : > { %s465_s22 = sshll.u32 %s682_s21, 3  ;;  %s468_s30 = sshll.u32 %s682_s21, 2 }
  0x14   : > { %s693_s27 = scalar_lea.vmem %s777_s0, %s465_s22  ;;  %s730_s6 = scalar_lea.vmem %s780_s3, %s468_s30 }
  0x15   : > { %v210_v2 = vld [vmem:[%s693_s27] sm:$0xff]  ;;  %v211_v3 = vld [vmem:[%s693_s27 + $0x8] sm:$0xff]  ;;  %v212_v4 = vld [vmem:[%s693_s27 + $0x10] sm:$0xff] }
  0x16   : > { %v233_v5 = vmul.f32 %v688_v0, %v210_v2  ;;  %v234_v6 = vmul.f32 %v688_v0, %v211_v3  ;;  %v213_v7 = vld [vmem:[%s693_s27 + $0x18] sm:$0xff]  ;;  %v235_v8 = vmul.f32 %v688_v0, %v212_v4  ;;  %v214_v9 = vld [vmem:[%s693_s27 + $0x20] sm:$0xff]  ;;  %v215_v10 = vld [vmem:[%s693_s27 + $0x28] sm:$0xff] }
  0x17   : > { %v236_v11 = vmul.f32 %v688_v0, %v213_v7  ;;  %v237_v12 = vmul.f32 %v688_v0, %v214_v9  ;;  %v238_v13 = vmul.f32 %v688_v0, %v215_v10  ;;  %v216_v14 = vld [vmem:[%s693_s27 + $0x30] sm:$0xff]  ;;  %v217_v15 = vld [vmem:[%s693_s27 + $0x38] sm:$0xff]  ;;  %v218_v24 = vld [vmem:[%s693_s27 + $0x40] sm:$0xff] }
  0x18   : > { %v256_v16 = vadd.f32 %v698_v1, %v233_v5  ;;  %v257_v17 = vadd.f32 %v698_v1, %v234_v6  ;;  %v258_v18 = vadd.f32 %v698_v1, %v235_v8  ;;  %v239_v19 = vmul.f32 %v688_v0, %v216_v14  ;;  %v219_v25 = vld [vmem:[%s693_s27 + $0x48] sm:$0xff]  ;;  %v220_v30 = vld [vmem:[%s693_s27 + $0x50] sm:$0xff]  ;;  %v221_v35 = vld [vmem:[%s693_s27 + $0x58] sm:$0xff] }
  0x19   : > { %v259_v20 = vadd.f32 %v698_v1, %v236_v11  ;;  %v260_v21 = vadd.f32 %v698_v1, %v237_v12  ;;  %v261_v22 = vadd.f32 %v698_v1, %v238_v13  ;;  %v240_v23 = vmul.f32 %v688_v0, %v217_v15  ;;  %v222_v36 = vld [vmem:[%s693_s27 + $0x60] sm:$0xff]  ;;  %v223_v41 = vld [vmem:[%s693_s27 + $0x68] sm:$0xff]  ;;  %v224_v42 = vld [vmem:[%s693_s27 + $0x70] sm:$0xff] }
  0x1a   : > { %v272_v26 = vmax.f32 %v256_v16, 0.0  ;;  %v273_v27 = vmax.f32 %v257_v17, 0.0  ;;  %v274_v28 = vmax.f32 %v258_v18, 0.0  ;;  %v262_v29 = vadd.f32 %v698_v1, %v239_v19  ;;  %v225_v51 = vld [vmem:[%s693_s27 + $0x78] sm:$0xff] }
  0x1b   : > { %v275_v31 = vmax.f32 %v259_v20, 0.0  ;;  %v276_v32 = vmax.f32 %v260_v21, 0.0  ;;  %v277_v33 = vmax.f32 %v261_v22, 0.0  ;;  %v263_v34 = vadd.f32 %v698_v1, %v240_v23 }
  0x1c   : > { %v508_v37 = vpack.c.bf16 %v273_v27, %v272_v26  ;;  %v278_v38 = vmax.f32 %v262_v29, 0.0  ;;  %v241_v39 = vmul.f32 %v688_v0, %v218_v24  ;;  %v242_v40 = vmul.f32 %v688_v0, %v219_v25 }
  0x1d   : > { %v513_v43 = vpack.c.bf16 %v275_v31, %v274_v28  ;;  %v518_v44 = vpack.c.bf16 %v277_v33, %v276_v32  ;;  %v279_v45 = vmax.f32 %v263_v34, 0.0  ;;  %v243_v46 = vmul.f32 %v688_v0, %v220_v30 }
  0x1e   : > { %509 = vst [vmem:[%s730_s6] sm:$0xff] %v508_v37   ;;  %v264_v47 = vadd.f32 %v698_v1, %v241_v39  ;;  %v265_v48 = vadd.f32 %v698_v1, %v242_v40  ;;  %v244_v49 = vmul.f32 %v688_v0, %v221_v35  ;;  %v245_v50 = vmul.f32 %v688_v0, %v222_v36 }
  0x1f   : > { %545 = vst [vmem:[%s730_s6 + $0x8] sm:$0xff] %v513_v43   ;;  %546 = vst [vmem:[%s730_s6 + $0x10] sm:$0xff] %v518_v44   ;;  %v523_v52 = vpack.c.bf16 %v279_v45, %v278_v38  ;;  %v266_v53 = vadd.f32 %v698_v1, %v243_v46  ;;  %v246_v54 = vmul.f32 %v688_v0, %v223_v41 }
  0x20   : > { %v247_v55 = vmul.f32 %v688_v0, %v224_v42  ;;  %v280_v56 = vmax.f32 %v264_v47, 0.0  ;;  %v281_v57 = vmax.f32 %v265_v48, 0.0  ;;  %v267_v58 = vadd.f32 %v698_v1, %v244_v49 }
  0x21   : > { %v268_v59 = vadd.f32 %v698_v1, %v245_v50  ;;  %547 = vst [vmem:[%s730_s6 + $0x18] sm:$0xff] %v523_v52   ;;  %v282_v60 = vmax.f32 %v266_v53, 0.0  ;;  %v269_v61 = vadd.f32 %v698_v1, %v246_v54  ;;  %v248_v62 = vmul.f32 %v688_v0, %v225_v51 }
  0x22   : > { %v270_v63 = vadd.f32 %v698_v1, %v247_v55  ;;  %v528_v2 = vpack.c.bf16 %v281_v57, %v280_v56  ;;  %v283_v3 = vmax.f32 %v267_v58, 0.0 }
  0x23   : > { %v284_v4 = vmax.f32 %v268_v59, 0.0  ;;  %v285_v5 = vmax.f32 %v269_v61, 0.0  ;;  %v271_v6 = vadd.f32 %v698_v1, %v248_v62 }
  0x24   : > { %v286_v7 = vmax.f32 %v270_v63, 0.0  ;;  %548 = vst [vmem:[%s730_s6 + $0x20] sm:$0xff] %v528_v2   ;;  %v533_v8 = vpack.c.bf16 %v283_v3, %v282_v60 }
  0x25   : > { %v538_v9 = vpack.c.bf16 %v285_v5, %v284_v4  ;;  %v287_v10 = vmax.f32 %v271_v6, 0.0 }
  0x26   : > { %549 = vst [vmem:[%s730_s6 + $0x28] sm:$0xff] %v533_v8  }
  0x27   : > { %550 = vst [vmem:[%s730_s6 + $0x30] sm:$0xff] %v538_v9   ;;  %v543_v11 = vpack.c.bf16 %v287_v10, %v286_v7 }
  0x29   : > { %551 = vst [vmem:[%s730_s6 + $0x38] sm:$0xff] %v543_v11  }
  0x2a PF: > { %s13_s16 = sadd.s32 1, %s630_s16   ;;  %s781_s12 = smov %s622_s14 }
  0x2b   : > { %p10_p7 = scmp.ge.s32.totalorder %s13_s16, 6   ;;  %s782_s13 = smov %s626_s15 }
  0x2c   : > { %s783_s14 = smov %s786_s17  ;;  %s784_s15 = smov %s790_s18 }
  0x2d   :  { %12 = sbr.rel (!%p10_p7) target bundleno = 3 (0x3), region = 62 }

// kernel: double_conv.7
= control target key start
LH: loop header
LB: loop body
LE: loop exit
PB: predicated region body
PF: predicated region fallthrough
CT: control target
= control target key end

     0   :  { %s509_s12 = smov 0   ;;  %s511_s13 = smov 0   ;;  %s638_s0 = inlined_call_operand.vmem [shape: f32[2,256,128], index: 0, kind: input, shape index: {}]   ;;  %s639_s1 = inlined_call_operand.vmem [shape: f32[1,128], index: 1, kind: input, shape index: {}]   ;;  %s640_s2 = inlined_call_operand.vmem [shape: f32[1,128], index: 2, kind: input, shape index: {}]   ;;  %s641_s3 = inlined_call_operand.vmem [shape: f32[2,256,128], index: 3, kind: output, shape index: {}]  }
   0x1   :  { %s513_s14 = smov 0   ;;  %s515_s15 = smov 0  }
   0x2   :  { %s517_s16 = smov 0  }
   0x3 LB: > { %s22_s17 = sadd.s32 1, %s479_s14  ;;  %s25_s18 = sadd.s32 1, %s483_s15  ;;  %s487_s16 = sphi %s517_s16, %s13_s16   ;;  %s483_s15 = sphi %s515_s15, %s645_s15   ;;  %s479_s14 = sphi %s513_s14, %s644_s14   ;;  %s475_s13 = sphi %s511_s13, %s643_s13   ;;  %s471_s12 = sphi %s509_s12, %s642_s12  }
   0x4   : > { %p23_p0 = scmp.ge.s32.totalorder %s22_s17, 2  ;;  %p398_p1 = scmp.ge.s32.totalorder %s487_s16, 1 }
   0x5   : > { %p158_p2 = scmp.lt.s32.totalorder %s487_s16, 5 }
   0x6   : > { %s647_s17 = smov (%p23_p0, %s22_s17), 0  ;;  %s649_s18 = smov (!%p23_p0, %s25_s18), %s483_s15 }
   0x7   : > { %p159_p3 = pnand %p398_p1, %p158_p2  ;;  %p27_p4 = scmp.ge.s32.totalorder %s649_s18, 2 }
   0x8   : > { %s399_s19 = sshll.u32 (!%p159_p3), %s471_s12, 4  ;;  %p191_p5 = scmp.lt.s32.totalorder (!%p159_p3), %s475_s13, 1  ;;  %v542_v0 = vld [vmem:[%s639_s1] ss:$0 sm:$0xff] (!%p159_p3) }
   0x9   : > { %s651_s18 = smov (%p27_p4, %s649_s18), 0  ;;  %162 = sbr.rel (%p159_p3) target bundleno = 39 (0x27), region = 32 }
   0xa   : > { %p193_p6 = scmp.lt.s32.totalorder (!%p159_p3), %s399_s19, 31  ;;  %v552_v1 = vld [vmem:[%s640_s2] ss:$0 sm:$0xff] (!%p159_p3) }
  0x10   : > { %s653_s13 = smov (!%p191_p5, %s475_s13), 1  ;;  %s655_s19 = smov (!%p193_p6, %s399_s19), 31 }
  0x11   : > { %s400_s20 = sshll.u32 %s653_s13, 5 }
  0x12   : > { %s196_s21 = sadd.s32 %s400_s20, %s655_s19 }
  0x13   : > { %s401_s22 = sshll.u32 %s196_s21, 3 }
  0x14   : > { %s547_s27 = scalar_lea.vmem %s638_s0, %s401_s22  ;;  %s575_s5 = scalar_lea.vmem %s641_s3, %s401_s22 }
  0x15   : > { %v210_v2 = vld [vmem:[%s547_s27] sm:$0xff]  ;;  %v211_v3 = vld [vmem:[%s547_s27 + $0x8] sm:$0xff]  ;;  %v212_v4 = vld [vmem:[%s547_s27 + $0x10] sm:$0xff] }
  0x16   : > { %v233_v5 = vmul.f32 %v542_v0, %v210_v2  ;;  %v234_v6 = vmul.f32 %v542_v0, %v211_v3  ;;  %v235_v7 = vmul.f32 %v542_v0, %v212_v4  ;;  %v213_v8 = vld [vmem:[%s547_s27 + $0x18] sm:$0xff]  ;;  %v214_v9 = vld [vmem:[%s547_s27 + $0x20] sm:$0xff]  ;;  %v215_v10 = vld [vmem:[%s547_s27 + $0x28] sm:$0xff] }
  0x17   : > { %v236_v11 = vmul.f32 %v542_v0, %v213_v8  ;;  %v237_v12 = vmul.f32 %v542_v0, %v214_v9  ;;  %v238_v13 = vmul.f32 %v542_v0, %v215_v10  ;;  %v216_v14 = vld [vmem:[%s547_s27 + $0x30] sm:$0xff]  ;;  %v217_v15 = vld [vmem:[%s547_s27 + $0x38] sm:$0xff]  ;;  %v218_v24 = vld [vmem:[%s547_s27 + $0x40] sm:$0xff] }
  0x18   : > { %v256_v16 = vadd.f32 %v552_v1, %v233_v5  ;;  %v257_v17 = vadd.f32 %v552_v1, %v234_v6  ;;  %v258_v18 = vadd.f32 %v552_v1, %v235_v7  ;;  %v239_v19 = vmul.f32 %v542_v0, %v216_v14  ;;  %v219_v25 = vld [vmem:[%s547_s27 + $0x48] sm:$0xff]  ;;  %v220_v26 = vld [vmem:[%s547_s27 + $0x50] sm:$0xff]  ;;  %v221_v31 = vld [vmem:[%s547_s27 + $0x58] sm:$0xff] }
  0x19   : > { %v259_v20 = vadd.f32 %v552_v1, %v236_v11  ;;  %v260_v21 = vadd.f32 %v552_v1, %v237_v12  ;;  %v261_v22 = vadd.f32 %v552_v1, %v238_v13  ;;  %v240_v23 = vmul.f32 %v542_v0, %v217_v15  ;;  %v222_v32 = vld [vmem:[%s547_s27 + $0x60] sm:$0xff]  ;;  %v223_v33 = vld [vmem:[%s547_s27 + $0x68] sm:$0xff]  ;;  %v224_v38 = vld [vmem:[%s547_s27 + $0x70] sm:$0xff] }
  0x1a   : > { %v272_v27 = vmax.f32 %v256_v16, 0.0  ;;  %v273_v28 = vmax.f32 %v257_v17, 0.0  ;;  %v274_v29 = vmax.f32 %v258_v18, 0.0  ;;  %v262_v30 = vadd.f32 %v552_v1, %v239_v19  ;;  %v225_v43 = vld [vmem:[%s547_s27 + $0x78] sm:$0xff] }
  0x1b   : > { %v275_v34 = vmax.f32 %v259_v20, 0.0  ;;  %v276_v35 = vmax.f32 %v260_v21, 0.0  ;;  %v277_v36 = vmax.f32 %v261_v22, 0.0  ;;  %v263_v37 = vadd.f32 %v552_v1, %v240_v23 }
  0x1c   : > { %288 = vst [vmem:[%s575_s5] sm:$0xff] %v272_v27  ;;  %289 = vst [vmem:[%s575_s5 + $0x8] sm:$0xff] %v273_v28  ;;  %v278_v39 = vmax.f32 %v262_v30, 0.0  ;;  %v241_v40 = vmul.f32 %v542_v0, %v218_v24  ;;  %v242_v41 = vmul.f32 %v542_v0, %v219_v25  ;;  %v243_v42 = vmul.f32 %v542_v0, %v220_v26 }
  0x1d   : > { %290 = vst [vmem:[%s575_s5 + $0x10] sm:$0xff] %v274_v29  ;;  %291 = vst [vmem:[%s575_s5 + $0x18] sm:$0xff] %v275_v34  ;;  %v279_v44 = vmax.f32 %v263_v37, 0.0  ;;  %v244_v45 = vmul.f32 %v542_v0, %v221_v31  ;;  %v245_v46 = vmul.f32 %v542_v0, %v222_v32  ;;  %v246_v47 = vmul.f32 %v542_v0, %v223_v33 }
  0x1e   : > { %292 = vst [vmem:[%s575_s5 + $0x20] sm:$0xff] %v276_v35  ;;  %293 = vst [vmem:[%s575_s5 + $0x28] sm:$0xff] %v277_v36  ;;  %v264_v48 = vadd.f32 %v552_v1, %v241_v40  ;;  %v265_v49 = vadd.f32 %v552_v1, %v242_v41  ;;  %v266_v50 = vadd.f32 %v552_v1, %v243_v42 }
  0x1f   : > { %294 = vst [vmem:[%s575_s5 + $0x30] sm:$0xff] %v278_v39  ;;  %v247_v51 = vmul.f32 %v542_v0, %v224_v38  ;;  %295 = vst [vmem:[%s575_s5 + $0x38] sm:$0xff] %v279_v44  ;;  %v267_v52 = vadd.f32 %v552_v1, %v244_v45  ;;  %v268_v53 = vadd.f32 %v552_v1, %v245_v46 }
  0x20   : > { %v269_v54 = vadd.f32 %v552_v1, %v246_v47  ;;  %v248_v55 = vmul.f32 %v542_v0, %v225_v43  ;;  %v280_v56 = vmax.f32 %v264_v48, 0.0  ;;  %v281_v57 = vmax.f32 %v265_v49, 0.0 }
  0x21   : > { %v282_v58 = vmax.f32 %v266_v50, 0.0  ;;  %v270_v59 = vadd.f32 %v552_v1, %v247_v51  ;;  %v283_v60 = vmax.f32 %v267_v52, 0.0  ;;  %v284_v61 = vmax.f32 %v268_v53, 0.0 }
  0x22   : > { %v285_v62 = vmax.f32 %v269_v54, 0.0  ;;  %v271_v63 = vadd.f32 %v552_v1, %v248_v55  ;;  %296 = vst [vmem:[%s575_s5 + $0x40] sm:$0xff] %v280_v56  ;;  %297 = vst [vmem:[%s575_s5 + $0x48] sm:$0xff] %v281_v57 }
  0x23   : > { %298 = vst [vmem:[%s575_s5 + $0x50] sm:$0xff] %v282_v58  ;;  %v286_v2 = vmax.f32 %v270_v59, 0.0  ;;  %299 = vst [vmem:[%s575_s5 + $0x58] sm:$0xff] %v283_v60 }
  0x24   : > { %300 = vst [vmem:[%s575_s5 + $0x60] sm:$0xff] %v284_v61  ;;  %301 = vst [vmem:[%s575_s5 + $0x68] sm:$0xff] %v285_v62  ;;  %v287_v0 = vmax.f32 %v271_v63, 0.0 }
  0x25   : > { %302 = vst [vmem:[%s575_s5 + $0x70] sm:$0xff] %v286_v2 }
  0x26   : > { %303 = vst [vmem:[%s575_s5 + $0x78] sm:$0xff] %v287_v0 }
  0x27 PF: > { %s13_s16 = sadd.s32 1, %s487_s16   ;;  %s642_s12 = smov %s479_s14 }
  0x28   : > { %p10_p7 = scmp.ge.s32.totalorder %s13_s16, 6   ;;  %s643_s13 = smov %s483_s15 }
  0x29   : > { %s644_s14 = smov %s647_s17  ;;  %s645_s15 = smov %s651_s18 }
  0x2a   :  { %12 = sbr.rel (!%p10_p7) target bundleno = 3 (0x3), region = 62 }

// kernel: double_conv.4
= control target key start
LH: loop header
LB: loop body
LE: loop exit
PB: predicated region body
PF: predicated region fallthrough
CT: control target
= control target key end

     0   :  { %s3624_s12 = smov 0   ;;  %s3626_s13 = smov 0   ;;  %s4619_s0 = inlined_call_operand.vmem [shape: bf16[2,2,10,18,4], index: 0, kind: input, shape index: {}]   ;;  %s4620_s1 = inlined_call_operand.vmem [shape: bf16[9,4,128], index: 1, kind: input, shape index: {}]   ;;  %s4621_s2 = inlined_call_operand.vmem [shape: f32[2,256,128], index: 2, kind: output, shape index: {0}]   ;;  %s4622_s3 = inlined_call_operand.vmem [shape: f32[2,2,2,128], index: 3, kind: output, shape index: {1}]  }
   0x1   :  { %s3628_s14 = smov 0   ;;  %s3630_s15 = smov 0  }
   0x2   :  { %s3632_s16 = smov 0  }
   0x3 LB: > { %s23_s17 = sadd.s32 1, %s3594_s14  ;;  %s26_s18 = sadd.s32 1, %s3598_s15  ;;  %s3602_s16 = sphi %s3632_s16, %s14_s16   ;;  %s3598_s15 = sphi %s3630_s15, %s4654_s15   ;;  %s3594_s14 = sphi %s3628_s14, %s4653_s14   ;;  %s3590_s13 = sphi %s3626_s13, %s4652_s13   ;;  %s3586_s12 = sphi %s3624_s12, %s4651_s12  }
   0x4   : > { %p24_p0 = scmp.ge.s32.totalorder %s23_s17, 2  ;;  %p2857_p1 = scmp.ge.s32.totalorder %s3602_s16, 1 }
   0x5   : > { %p162_p2 = scmp.lt.s32.totalorder %s3602_s16, 5 }
   0x6   : > { %s4656_s17 = smov (%p24_p0, %s23_s17), 0  ;;  %s4658_s18 = smov (!%p24_p0, %s26_s18), %s3598_s15 }
   0x7   : > { %p163_p3 = pnand %p2857_p1, %p162_p2  ;;  %p28_p4 = scmp.ge.s32.totalorder %s4658_s18, 2 }
   0x9   : > { %s4660_s18 = smov (%p28_p4, %s4658_s18), 0  ;;  %166 = sbr.rel (%p163_p3) target bundleno = 440 (0x1b8), region = 28 }
  0x10   : > { %v2952_v0 = vld [vmem:[%s4620_s1 + $0x2] sm:$0x3]  ;;  %vm1202_vm0 = vcmask 1041408   ;;  %v3019_v1 = vld [vmem:[%s4620_s1 + $0x8] sm:$0x3]  ;;  %p202_p5 = scmp.lt.s32.totalorder %s3590_s13, 1 }
  0x11   : > { %3479 = vmatprep.subr.msk.bf16.mxu1 %vm1202_vm0, %v2952_v0  ;;  %3483 = vmatprep.subr.msk.bf16.mxu0 %vm1202_vm0, %v3019_v1  ;;  %v1204_v2 = vsel %vm1202_vm0, %v2952_v0, 0  ;;  %v3666_v3 = vsel %vm1202_vm0, %v3019_v1, 0  ;;  %p204_p6 = scmp.lt.s32.totalorder %s3586_s12, 1  ;;  %v1150_v4 = vld [vmem:[%s4620_s1] sm:$0x3]  ;;  %vm1177_vm3 = vcmask 31744  }
  0x12   : > { %3188 = vmatpush3.bf16.msra.mxu1 %v1204_v2  ;;  %3260 = vmatpush3.bf16.msra.mxu0 %v3666_v3  ;;  %s4662_s13 = smov (!%p202_p5, %s3590_s13), 1  ;;  %v3036_v5 = vld [vmem:[%s4620_s1 + $0xa] sm:$0x3]  ;;  %vm254_vm1 = vsmask.f32 3328  ;;  %v3712_v17 = vsel %vm1202_vm0, %v1150_v4, 0 }
  0x13   : > { %s3676_s25 = scalar_select %p204_p6, %s3586_s12, 1  ;;  %3480 = vmatprep.subr.msk.bf16.mxu1 %vm1202_vm0, %v1150_v4  ;;  %3485 = vmatprep.subr.msk.bf16.mxu0 %vm1202_vm0, %v3036_v5  ;;  %vm255_vm2 = vsmask.f32 7440  ;;  %v3730_v36 = vsel %vm1202_vm0, %v3036_v5, 0  ;;  %v3746_v50 = vld [vmem:[%s4620_s1 + $0xc] sm:$0x3] }
  0x14   : > { %s3490_s28 = smul.u32 60, %s4662_s13  ;;  %vm3725_vm4 = vmor %vm254_vm1, %vm255_vm2  ;;  %v3762_v1 = vsel %vm1202_vm0, %v3746_v50, 0  ;;  %vm481_vm5 = vcmask 1042432   ;;  %vm482_vm6 = vcmask 1046532  }
  0x15   : > { %s3489_s29 = smul.u32 30, %s3676_s25  ;;  %vm3880_vm7 = vmor %vm481_vm5, %vm482_vm6 }
  0x17   : > { %s208_s30 = sadd.s32 %s3490_s28, %s3489_s29  ;;  %s2859_s28 = sshll.u32 %s3586_s12, 4 }
  0x18   : > { %s2858_s4 = sshll.u32 %s208_s30, 2  ;;  %p214_p7 = scmp.lt.s32.totalorder %s2859_s28, 31 }
  0x19   : > { %s3688_s7 = scalar_lea.vmem %s4619_s0, %s2858_s4  ;;  %s2860_s29 = sshll.u32 %s4662_s13, 5 }
  0x1a   : > { %v3691_v6 = vld [vmem:[%s3688_s7] sm:$0xf]  ;;  %v3694_v7 = vld [vmem:[%s3688_s7 + $0x4] sm:$0xf]  ;;  %v3697_v8 = vld [vmem:[%s3688_s7 + $0x8] sm:$0x1] }
  0x1b   : > { %v258_v9 = vshrl.u32 %v3691_v6, 16  ;;  %v261_v10 = vshll.u32 %v3691_v6, 16  ;;  %v267_v11 = vshll.u32 %v3694_v7, 16  ;;  %v271_v12 = vshrl.u32 %v3694_v7, 16  ;;  %v2872_v13 = vld [vmem:[%s3688_s7 + $0xc] sm:$0xf] }
  0x1c   : > { %v277_v14 = vshll.u32 %v3697_v8, 16  ;;  %v3706_v15 = vld [vmem:[%s3688_s7 + $0x10] sm:$0xf]  ;;  %v3709_v16 = vld [vmem:[%s3688_s7 + $0x14] sm:$0x1]  ;;  %v566_v23 = vshrl.u32 %v2872_v13, 16 }
  0x1d   : > { %v260_v18 = vrot.slane %v258_v9, 4  ;;  %v263_v19 = vrot.slane %v261_v10, 5  ;;  %v269_v20 = vrot.slane %v267_v11, 5  ;;  %v273_v21 = vrot.slane %v271_v12, 4  ;;  %v3718_v30 = vld [vmem:[%s3688_s7 + $0xc] sm:$0xf] }
  0x1e   : > { %v279_v22 = vrot.slane %v277_v14, 5  ;;  %v569_v24 = vshll.u32 %v2872_v13, 16  ;;  %v575_v25 = vshll.u32 %v3706_v15, 16  ;;  %v579_v28 = vshrl.u32 %v3706_v15, 16  ;;  %v3721_v31 = vld [vmem:[%s3688_s7 + $0x10] sm:$0xf] }
  0x1f   : > { %v264_v26 = vor.u32 %v263_v19, %v260_v18  ;;  %v274_v27 = vor.u32 %v273_v21, %v269_v20  ;;  %v585_v29 = vshll.u32 %v3709_v16, 16  ;;  %v568_v33 = vrot.slane %v566_v23, 4  ;;  %v3733_v42 = vld [vmem:[%s3688_s7 + $0x14] sm:$0x1]  ;;  %v2874_v55 = vld [vmem:[%s3688_s7 + $0x18] sm:$0xf] }
  0x20   : > { %v571_v34 = vrot.slane %v569_v24, 5  ;;  %v577_v35 = vrot.slane %v575_v25, 5  ;;  %v581_v39 = vrot.slane %v579_v28, 4  ;;  %v282_v43 = vshrl.u32 %v3718_v30, 16  ;;  %v3751_v60 = vld [vmem:[%s3688_s7 + $0x1c] sm:$0xf] }
  0x21   : > { %v265_v37 = vrot.slane %v264_v26, 4  ;;  %v275_v38 = vrot.slane %v274_v27, 4  ;;  %v587_v40 = vrot.slane %v585_v29, 5  ;;  %v285_v44 = vshll.u32 %v3718_v30, 16  ;;  %v3758_v0 = vld [vmem:[%s3688_s7 + $0x20] sm:$0x1] }
  0x22   : > { %v572_v41 = vor.u32 %v571_v34, %v568_v33  ;;  %v291_v45 = vshll.u32 %v3721_v31, 16  ;;  %v582_v48 = vor.u32 %v581_v39, %v577_v35  ;;  %v295_v49 = vshrl.u32 %v3721_v31, 16  ;;  %v3768_v14 = vld [vmem:[%s3688_s7 + $0x18] sm:$0xf]  ;;  %v3780_v27 = vld [vmem:[%s3688_s7 + $0x20] sm:$0x1] }
  0x23   : > { %v270_v46 = vsel %vm3725_vm4, %v265_v37, %v269_v20  ;;  %v280_v47 = vsel %vm3725_vm4, %v275_v38, %v279_v22  ;;  %v284_v53 = vrot.slane %v282_v43, 4  ;;  %v287_v54 = vrot.slane %v285_v44, 5  ;;  %v3773_v22 = vld [vmem:[%s3688_s7 + $0x1c] sm:$0xf]  ;;  %s4664_s28 = smov (!%p214_p7, %s2859_s28), 31  ;;  %s2862_s12 = sshll.u32 %s4662_s13, 1 }
  0x24   : > { %v2953_v51 = vcombine.low %v270_v46, %v280_v47  ;;  %v573_v52 = vrot.slane %v572_v41, 4  ;;  %v583_v56 = vrot.slane %v582_v48, 4  ;;  %v293_v57 = vrot.slane %v291_v45, 5  ;;  %v3794_v46 = vld [vmem:[%s4620_s1 + $0x4] sm:$0x3]  ;;  %s217_s30 = sadd.s32 %s2860_s29, %s4664_s28  ;;  %s226_s8 = sadd.s32 %s2862_s12, %s3676_s25 }
  0x25   : > { %v297_v58 = vrot.slane %v295_v49, 4  ;;  %v301_v59 = vshll.u32 %v3733_v42, 16  ;;  %v794_v62 = vrot.slane %v3709_v16, 5  ;;  %v288_v63 = vor.u32 %v287_v54, %v284_v53  ;;  %v3912_v16 = vld [vmem:[%s3688_s7 + $0x4c] sm:$0xf]  ;;  %s2861_s4 = sshll.u32 %s217_s30, 3 }
  0x26   : > { %3189 = vmatprep.mubr.msk.bf16.mxu1 %vm1177_vm3, %v2953_v51  ;;  %v578_v61 = vsel %vm3725_vm4, %v573_v52, %v577_v35  ;;  %v588_v2 = vsel %vm3725_vm4, %v583_v56, %v587_v40  ;;  %v590_v9 = vshrl.u32 %v2874_v55, 16  ;;  %v593_v12 = vshll.u32 %v2874_v55, 16  ;;  %v2876_v35 = vld [vmem:[%s3688_s7 + $0x24] sm:$0xf]  ;;  %v3798_v51 = vld [vmem:[%s3688_s7 + $0x28] sm:$0xf] }
  0x27   : > { %v298_v4 = vor.u32 %v297_v58, %v293_v57  ;;  %v303_v5 = vrot.slane %v301_v59, 5  ;;  %v3020_v10 = vcombine.low %v578_v61, %v588_v2  ;;  %v289_v11 = vrot.slane %v288_v63, 4  ;;  %v3807_v2 = vld [vmem:[%s3688_s7 + $0x24] sm:$0xf]  ;;  %s2863_s9 = sshll.u32 %s226_s8, 1 }
  0x28   : > { %v599_v13 = vshll.u32 %v3751_v60, 16  ;;  %v592_v19 = vrot.slane %v590_v9, 4  ;;  %v603_v20 = vshrl.u32 %v3751_v60, 16  ;;  %v609_v21 = vshll.u32 %v3758_v0, 16  ;;  %s228_s19 = scalar_lea.vmem %s4622_s3, %s2863_s9 }
  0x29   : > { %v299_v18 = vrot.slane %v298_v4, 4  ;;  %3261 = vmatprep.mubr.msk.bf16.mxu0 %vm1177_vm3, %v3020_v10  ;;  %v294_v23 = vsel %vm3725_vm4, %v289_v11, %v293_v57  ;;  %v595_v24 = vrot.slane %v593_v12, 5  ;;  %v798_v26 = vrot.slane %v3751_v60, 5  ;;  %v3802_v57 = vld [vmem:[%s3688_s7 + $0x2c] sm:$0x1] }
  0x2a   : > { %v601_v25 = vrot.slane %v599_v13, 5  ;;  %v605_v29 = vrot.slane %v603_v20, 4  ;;  %v611_v33 = vrot.slane %v609_v21, 5  ;;  %v801_v34 = vrot.slane %v3758_v0, 5 }
  0x2b   : > { %v304_v28 = vsel %vm3725_vm4, %v299_v18, %v303_v5  ;;  %v596_v38 = vor.u32 %v595_v24, %v592_v19  ;;  %v306_v39 = vshrl.u32 %v3768_v14, 16  ;;  %v309_v40 = vshll.u32 %v3768_v14, 16  ;;  %v3817_v18 = vld [vmem:[%s3688_s7 + $0x28] sm:$0xf] }
  0x2c   : > { %v2954_v37 = vcombine.low %v294_v23, %v304_v28  ;;  %v606_v41 = vor.u32 %v605_v29, %v601_v25  ;;  %v315_v43 = vshll.u32 %v3773_v22, 16  ;;  %v319_v44 = vshrl.u32 %v3773_v22, 16  ;;  %v3824_v29 = vld [vmem:[%s3688_s7 + $0x2c] sm:$0x1] }
  0x2d   : > { %v325_v45 = vshll.u32 %v3780_v27, 16  ;;  %v597_v47 = vrot.slane %v596_v38, 4  ;;  %v308_v48 = vrot.slane %v306_v39, 4  ;;  %v311_v49 = vrot.slane %v309_v40, 5 }
  0x2e   : > { %3190 = vmatmul.mubr.msk.bf16.vlgmr.msra.gmra.mrb[0].mxu1 %vm1177_vm3, %v2954_v37  ;;  %v614_v52 = vshrl.u32 %v2876_v35, 16  ;;  %v607_v53 = vrot.slane %v606_v41, 4  ;;  %v317_v54 = vrot.slane %v315_v43, 5  ;;  %v321_v55 = vrot.slane %v319_v44, 4 }
  0x2f   : > { %3206 = vmatpush3.bf16.msra.mxu1 %v3712_v17  ;;  %v327_v56 = vrot.slane %v325_v45, 5  ;;  %v602_v58 = vsel %vm3725_vm4, %v597_v47, %v601_v25  ;;  %v312_v59 = vor.u32 %v311_v49, %v308_v48  ;;  %v617_v63 = vshll.u32 %v2876_v35, 16  ;;  %v2878_v35 = vld [vmem:[%s3688_s7 + $0x30] sm:$0xf]  ;;  %v3834_v47 = vld [vmem:[%s3688_s7 + $0x34] sm:$0xf] }
  0x30   : > { %v616_v61 = vrot.slane %v614_v52, 4  ;;  %3481 = vmatprep.subr.msk.bf16.mxu1 %vm1202_vm0, %v3794_v46  ;;  %v612_v17 = vsel %vm3725_vm4, %v607_v53, %v611_v33  ;;  %v322_v4 = vor.u32 %v321_v55, %v317_v54  ;;  %v623_v5 = vshll.u32 %v3798_v51, 16 }
  0x31   : > { %v627_v9 = vshrl.u32 %v3798_v51, 16  ;;  %v3021_v10 = vcombine.low %v602_v58, %v612_v17  ;;  %v313_v11 = vrot.slane %v312_v59, 4  ;;  %v619_v12 = vrot.slane %v617_v63, 5  ;;  %v3846_v59 = vld [vmem:[%s3688_s7 + $0x30] sm:$0xf] }
  0x32   : > { %v633_v13 = vshll.u32 %v3802_v57, 16  ;;  %v323_v19 = vrot.slane %v322_v4, 4  ;;  %v625_v20 = vrot.slane %v623_v5, 5  ;;  %v330_v23 = vshrl.u32 %v3807_v2, 16 }
  0x33   : > { %v629_v21 = vrot.slane %v627_v9, 4  ;;  %3262 = vmatmul.mubr.msk.bf16.vlgmr.msra.gmra.mrb[0].mxu0 %vm1177_vm3, %v3021_v10  ;;  %v318_v24 = vsel %vm3725_vm4, %v313_v11, %v317_v54  ;;  %v620_v25 = vor.u32 %v619_v12, %v616_v61  ;;  %v333_v33 = vshll.u32 %v3807_v2, 16  ;;  %v3852_v11 = vld [vmem:[%s3688_s7 + $0x34] sm:$0xf] }
  0x34   : > { %v635_v28 = vrot.slane %v633_v13, 5  ;;  %3278 = vmatpush3.bf16.msra.mxu0 %v3730_v36  ;;  %v328_v37 = vsel %vm3725_vm4, %v323_v19, %v327_v56  ;;  %v332_v39 = vrot.slane %v330_v23, 4  ;;  %v339_v40 = vshll.u32 %v3817_v18, 16  ;;  %v3843_v56 = vld [vmem:[%s3688_s7 + $0x38] sm:$0x1] }
  0x35   : > { %v630_v38 = vor.u32 %v629_v21, %v625_v20  ;;  %v2955_v41 = vcombine.low %v318_v24, %v328_v37  ;;  %v621_v43 = vrot.slane %v620_v25, 4  ;;  %v335_v44 = vrot.slane %v333_v33, 5  ;;  %3486 = vmatprep.subr.msk.bf16.mxu0 %vm1202_vm0, %v3746_v50  ;;  %v3861_v25 = vld [vmem:[%s3688_s7 + $0x38] sm:$0x1] }
  0x36   : > { %v343_v45 = vshrl.u32 %v3817_v18, 16  ;;  %v341_v48 = vrot.slane %v339_v40, 5  ;;  %v349_v49 = vshll.u32 %v3824_v29, 16  ;;  %v638_v52 = vshrl.u32 %v2878_v35, 16 }
  0x37   : > { %v631_v36 = vrot.slane %v630_v38, 4  ;;  %3193 = vmatprep.mubr.msk.bf16.mxu1 %vm1177_vm3, %v2955_v41  ;;  %v626_v53 = vsel %vm3725_vm4, %v621_v43, %v625_v20  ;;  %v336_v54 = vor.u32 %v335_v44, %v332_v39  ;;  %v641_v58 = vshll.u32 %v2878_v35, 16  ;;  %v2896_v39 = vld [vmem:[%s3688_s7 + $0xc] sm:$0xe] }
  0x38   : > { %v345_v55 = vrot.slane %v343_v45, 4  ;;  %v351_v61 = vrot.slane %v349_v49, 5  ;;  %v640_v63 = vrot.slane %v638_v52, 4  ;;  %v647_v17 = vshll.u32 %v3834_v47, 16  ;;  %v3870_v45 = vld [vmem:[%s3688_s7 + $0x3c] sm:$0xf] }
  0x39   : > { %v636_v50 = vsel %vm3725_vm4, %v631_v36, %v635_v28  ;;  %v337_v5 = vrot.slane %v336_v54, 4  ;;  %v643_v10 = vrot.slane %v641_v58, 5  ;;  %v651_v13 = vshrl.u32 %v3834_v47, 16 }
  0x3a   : > { %v3022_v4 = vcombine.low %v626_v53, %v636_v50  ;;  %v346_v9 = vor.u32 %v345_v55, %v341_v48  ;;  %v649_v12 = vrot.slane %v647_v17, 5  ;;  %v657_v19 = vshll.u32 %v3843_v56, 16  ;;  %v3874_v53 = vld [vmem:[%s3688_s7 + $0x40] sm:$0xf] }
  0x3b   : > { %v354_v20 = vshrl.u32 %v3846_v59, 16  ;;  %v342_v21 = vsel %vm3725_vm4, %v337_v5, %v341_v48  ;;  %v644_v24 = vor.u32 %v643_v10, %v640_v63  ;;  %v357_v28 = vshll.u32 %v3846_v59, 16 }
  0x3c   : > { %3265 = vmatprep.mubr.msk.bf16.mxu0 %vm1177_vm3, %v3022_v4  ;;  %v347_v23 = vrot.slane %v346_v9, 4  ;;  %v653_v33 = vrot.slane %v651_v13, 4  ;;  %v659_v35 = vrot.slane %v657_v19, 5  ;;  %v363_v38 = vshll.u32 %v3852_v11, 16 }
  0x3d   : > { %v356_v37 = vrot.slane %v354_v20, 4  ;;  %v645_v41 = vrot.slane %v644_v24, 4  ;;  %v359_v43 = vrot.slane %v357_v28, 5  ;;  %v367_v44 = vshrl.u32 %v3852_v11, 16 }
  0x3e   : > { %v352_v40 = vsel %vm3725_vm4, %v347_v23, %v351_v61  ;;  %v654_v48 = vor.u32 %v653_v33, %v649_v12  ;;  %v365_v49 = vrot.slane %v363_v38, 5  ;;  %v373_v52 = vshll.u32 %v3861_v25, 16 }
  0x3f   : > { %v2956_v36 = vcombine.low %v342_v21, %v352_v40  ;;  %v650_v54 = vsel %vm3725_vm4, %v645_v41, %v649_v12  ;;  %v360_v55 = vor.u32 %v359_v43, %v356_v37  ;;  %v369_v58 = vrot.slane %v367_v44, 4  ;;  %v3888_v12 = vld [vmem:[%s3688_s7 + $0x44] sm:$0x1]  ;;  %v3906_v43 = vld [vmem:[%s3688_s7 + $0x48] sm:$0xf] }
  0x40   : > { %v2904_v61 = vrot.slane %v2896_v39, 9  ;;  %v655_v63 = vrot.slane %v654_v48, 4  ;;  %v375_v17 = vrot.slane %v373_v52, 5  ;;  %v791_v4 = vrot.slane %v3706_v15, 5  ;;  %v2897_v15 = vld [vmem:[%s3688_s7 + $0x18] sm:$0xe] }
  0x41   : > { %3194 = vmatmul.mubr.msk.bf16.gmra.mrb[4].mxu1 %vm1177_vm3, %v2956_v36  ;;  %v378_v5 = vshrl.u32 %v3870_v45, 16  ;;  %v361_v9 = vrot.slane %v360_v55, 4  ;;  %v370_v10 = vor.u32 %v369_v58, %v365_v49  ;;  %v381_v13 = vshll.u32 %v3870_v45, 16 }
  0x42   : > { %v387_v19 = vshll.u32 %v3874_v53, 16  ;;  %v660_v20 = vsel %vm3725_vm4, %v655_v63, %v659_v35  ;;  %v792_v21 = vsel %vm3880_vm7, %v2904_v61, %v791_v4  ;;  %v793_v23 = vrot.slane %v791_v4, 4  ;;  %v3922_v63 = vld [vmem:[%s3688_s7 + $0x50] sm:$0x1] }
  0x43   : > { %v380_v24 = vrot.slane %v378_v5, 4  ;;  %v3023_v28 = vcombine.low %v650_v54, %v660_v20  ;;  %v366_v33 = vsel %vm3725_vm4, %v361_v9, %v365_v49  ;;  %v371_v37 = vrot.slane %v370_v10, 4 }
  0x44   : > { %v383_v38 = vrot.slane %v381_v13, 5  ;;  %v795_v39 = vsel %vm3880_vm7, %v793_v23, %v794_v62  ;;  %v389_v40 = vrot.slane %v387_v19, 5  ;;  %v391_v35 = vshrl.u32 %v3874_v53, 16  ;;  %v3937_v23 = vld [vmem:[%s3688_s7 + $0x54] sm:$0xf] }
  0x45   : > { %v397_v41 = vshll.u32 %v3888_v12, 16  ;;  %3266 = vmatmul.mubr.msk.bf16.gmra.mrb[4].mxu0 %vm1177_vm3, %v3023_v28  ;;  %v376_v44 = vsel %vm3725_vm4, %v371_v37, %v375_v17  ;;  %v3037_v36 = vcombine.low %v792_v21, %v795_v39  ;;  %v2905_v49 = vrot.slane %v2897_v15, 9  ;;  %v3943_v39 = vld [vmem:[%s3688_s7 + $0x58] sm:$0xf] }
  0x46   : > { %v384_v48 = vor.u32 %v383_v38, %v380_v24  ;;  %v2957_v62 = vcombine.low %v366_v33, %v376_v44  ;;  %v393_v52 = vrot.slane %v391_v35, 4  ;;  %v800_v55 = vrot.slane %v798_v26, 4  ;;  %v3948_v44 = vld [vmem:[%s3688_s7 + $0x5c] sm:$0x1] }
  0x47   : > { %v399_v54 = vrot.slane %v397_v41, 5  ;;  %3279 = vmatprep.mubr.msk.bf16.mxu0 %vm1177_vm3, %v3037_v36  ;;  %v799_v61 = vsel %vm3880_vm7, %v2905_v49, %v798_v26  ;;  %v402_v17 = vshrl.u32 %v3906_v43, 16  ;;  %v405_v4 = vshll.u32 %v3906_v43, 16  ;;  %v2898_v26 = vld [vmem:[%s3688_s7 + $0x24] sm:$0xe] }
  0x48   : > { %v385_v58 = vrot.slane %v384_v48, 4  ;;  %3197 = vmatprep.mubr.msk.bf16.mxu1 %vm1177_vm3, %v2957_v62  ;;  %v394_v5 = vor.u32 %v393_v52, %v389_v40  ;;  %v802_v9 = vsel %vm3880_vm7, %v800_v55, %v801_v34  ;;  %v411_v10 = vshll.u32 %v3912_v16, 16  ;;  %v3954_v48 = vld [vmem:[%s4620_s1 + $0xe] sm:$0x3] }
  0x49   : > { %v415_v60 = vshrl.u32 %v3912_v16, 16  ;;  %v3038_v19 = vcombine.low %v799_v61, %v802_v9  ;;  %v404_v20 = vrot.slane %v402_v17, 4  ;;  %v407_v21 = vrot.slane %v405_v4, 5  ;;  %v2899_v61 = vld [vmem:[%s3688_s7 + $0x30] sm:$0xe] }
  0x4a   : > { %v390_v13 = vsel %vm3725_vm4, %v385_v58, %v389_v40  ;;  %v395_v24 = vrot.slane %v394_v5, 4  ;;  %v413_v0 = vrot.slane %v411_v10, 5  ;;  %v421_v34 = vshll.u32 %v3922_v63, 16  ;;  %v2900_v9 = vld [vmem:[%s3688_s7 + $0x3c] sm:$0xe] }
  0x4b   : > { %v417_v15 = vrot.slane %v415_v60, 4  ;;  %v408_v28 = vor.u32 %v407_v21, %v404_v20  ;;  %v2906_v33 = vrot.slane %v2898_v26, 9  ;;  %v805_v37 = vrot.slane %v3798_v51, 5  ;;  %v3979_v20 = vld [vmem:[%s3688_s7 + $0x44] sm:$0x1] }
  0x4c   : > { %v808_v38 = vrot.slane %v3802_v57, 5  ;;  %v400_v40 = vsel %vm3725_vm4, %v395_v24, %v399_v54  ;;  %v423_v41 = vrot.slane %v421_v34, 5  ;;  %v426_v36 = vshrl.u32 %v3937_v23, 16  ;;  %4634 = vst [vmem:[#allocation2_spill] sm:$0xff] %v3979_v20 }
  0x4d   : > { %v418_v35 = vor.u32 %v417_v15, %v413_v0  ;;  %v2958_v51 = vcombine.low %v390_v13, %v400_v40  ;;  %3280 = vmatmul.mubr.msk.bf16.vlgmr.msra.gmra.mrb[0].mxu0 %vm1177_vm3, %v3038_v19  ;;  %v409_v57 = vrot.slane %v408_v28, 4  ;;  %v806_v49 = vsel %vm3880_vm7, %v2906_v33, %v805_v37  ;;  %v3976_v19 = vld [vmem:[%s3688_s7 + $0x40] sm:$0xf] }
  0x4e   : > { %v807_v62 = vrot.slane %v805_v37, 4  ;;  %3296 = vmatpush3.bf16.msra.mxu0 %v3762_v1  ;;  %v428_v54 = vrot.slane %v426_v36, 4  ;;  %v429_v55 = vshll.u32 %v3937_v23, 16  ;;  %v435_v58 = vshll.u32 %v3943_v39, 16 }
  0x4f   : > { %v419_v52 = vrot.slane %v418_v35, 4  ;;  %3198 = vmatmul.mubr.msk.bf16.gmra.mrb[8].mxu1 %vm1177_vm3, %v2958_v51  ;;  %v414_v17 = vsel %vm3725_vm4, %v409_v57, %v413_v0  ;;  %v439_v5 = vshrl.u32 %v3943_v39, 16  ;;  %v445_v1 = vshll.u32 %v3948_v44, 16  ;;  %3487 = vmatprep.subr.msk.bf16.mxu0 %vm1202_vm0, %v3954_v48 }
  0x50   : > { %v809_v4 = vsel %vm3880_vm7, %v807_v62, %v808_v38  ;;  %v431_v26 = vrot.slane %v429_v55, 5  ;;  %v437_v13 = vrot.slane %v435_v58, 5  ;;  %v2907_v0 = vrot.slane %v2899_v61, 9  ;;  %v4000_v55 = vld [vmem:[%s3688_s7 + $0x50] sm:$0x1] }
  0x51   : > { %v424_v10 = vsel %vm3725_vm4, %v419_v52, %v423_v41  ;;  %v3039_v60 = vcombine.low %v806_v49, %v809_v4  ;;  %v441_v24 = vrot.slane %v439_v5, 4  ;;  %v812_v34 = vrot.slane %v3834_v47, 5  ;;  %v2901_v49 = vld [vmem:[%s3688_s7 + $0x48] sm:$0xe]  ;;  %v2902_v58 = vld [vmem:[%s3688_s7 + $0x54] sm:$0xe] }
  0x52   : > { %v2959_v21 = vcombine.low %v414_v17, %v424_v10  ;;  %v432_v15 = vor.u32 %v431_v26, %v428_v54  ;;  %v815_v28 = vrot.slane %v3843_v56, 5  ;;  %v2908_v33 = vrot.slane %v2900_v9, 9  ;;  %v3997_v54 = vld [vmem:[%s3688_s7 + $0x4c] sm:$0xf]  ;;  %v4013_v9 = vld [vmem:[%s3688_s7 + $0x5c] sm:$0x1] }
  0x53   : > { %3283 = vmatprep.mubr.msk.bf16.mxu0 %vm1177_vm3, %v3039_v60  ;;  %v442_v37 = vor.u32 %v441_v24, %v437_v13  ;;  %v447_v38 = vrot.slane %v445_v1, 5  ;;  %v819_v40 = vrot.slane %v3976_v19, 5  ;;  %v822_v35 = vrot.slane %v3979_v20, 5  ;;  %v4010_v1 = vld [vmem:[%s3688_s7 + $0x58] sm:$0xf]  ;;  %4636 = vst [vmem:[#allocation4_spill] sm:$0xff] %v4013_v9 }
  0x54   : > { %3201 = vmatprep.mubr.msk.bf16.mxu1 %vm1177_vm3, %v2959_v21  ;;  %v433_v41 = vrot.slane %v432_v15, 4  ;;  %v813_v36 = vsel %vm3880_vm7, %v2907_v0, %v812_v34  ;;  %v814_v47 = vrot.slane %v812_v34, 4  ;;  %v2969_v4 = vcombine.low %v3691_v6, %v3694_v7  ;;  %4635 = vst [vmem:[#allocation3_spill] sm:$0xff] %v4010_v1  ;;  %v2903_v34 = vld [vmem:[%s3688_s7 + $0x60] sm:$0xe] }
  0x55   : > { %v443_v56 = vrot.slane %v442_v37, 4  ;;  %v820_v51 = vsel %vm3880_vm7, %v2908_v33, %v819_v40  ;;  %v821_v57 = vrot.slane %v819_v40, 4  ;;  %v2909_v26 = vrot.slane %v2901_v49, 9  ;;  %v4030_v37 = vld [vmem:[%s3688_s7 + $0x68] sm:$0x1] }
  0x56   : > { %v438_v62 = vsel %vm3725_vm4, %v433_v41, %v437_v13  ;;  %v816_v52 = vsel %vm3880_vm7, %v814_v47, %v815_v28  ;;  %v4016_v13 = vld [vmem:[%s3688_s7 + $0x64] sm:$0xf]  ;;  %v826_v21 = vrot.slane %v3997_v54, 5  ;;  %v829_v6 = vrot.slane %v4000_v55, 5  ;;  %4638 = vst [vmem:[#allocation6_spill] sm:$0xff] %v4030_v37 }
  0x57   : > { %v448_v61 = vsel %vm3725_vm4, %v443_v56, %v447_v38  ;;  %v3040_v17 = vcombine.low %v813_v36, %v816_v52  ;;  %v823_v5 = vsel %vm3880_vm7, %v821_v57, %v822_v35  ;;  %4637 = vst [vmem:[#allocation5_spill] sm:$0xff] %v4016_v13  ;;  %v2910_v24 = vrot.slane %v2902_v58, 9  ;;  %v3002_v58 = vld [vmem:[%s4620_s1 + $0x6] sm:$0x3] }
  0x58   : > { %v2960_v10 = vcombine.low %v438_v62, %v448_v61  ;;  %v3041_v60 = vcombine.low %v820_v51, %v823_v5  ;;  %v833_v0 = vrot.slane %v4010_v1, 5  ;;  %v836_v15 = vrot.slane %v4013_v9, 5  ;;  %v450_v5 = vld [vmem:[%s3688_s7 + $0xc] sm:$0xe] }
  0x59   : > { %3284 = vmatmul.mubr.msk.bf16.gmra.mrb[4].mxu0 %vm1177_vm3, %v3040_v17  ;;  %v827_v28 = vsel %vm3880_vm7, %v2909_v26, %v826_v21  ;;  %v828_v33 = vrot.slane %v826_v21, 4  ;;  %v840_v38 = vrot.slane %v4016_v13, 5  ;;  %v2970_v41 = vcombine.low %v3718_v30, %v3721_v31  ;;  %v4059_v17 = vld [vmem:[%s3688_s7 + $0x1c] sm:$0xf]  ;;  %v4067_v26 = vld [vmem:[%s4620_s1 + $0x10] sm:$0x3] }
  0x5a   : > { %3202 = vmatmul.mubr.msk.bf16.gmra.mrb[12].mxu1 %vm1177_vm3, %v2960_v10  ;;  %3287 = vmatprep.mubr.msk.bf16.mxu0 %vm1177_vm3, %v3041_v60  ;;  %v834_v40 = vsel %vm3880_vm7, %v2910_v24, %v833_v0  ;;  %v835_v35 = vrot.slane %v833_v0, 4  ;;  %v2911_v47 = vrot.slane %v2903_v34, 9  ;;  %v843_v49 = vrot.slane %v4030_v37, 5  ;;  %v4275_v13 = vld [vmem:[%s3688_s7 + $0x38] sm:$0x1] }
  0x5b   : > { %3207 = vmatprep.mubr.msk.bf16.mxu1 %vm1177_vm3, %v2969_v4  ;;  %v830_v36 = vsel %vm3880_vm7, %v828_v33, %v829_v6  ;;  %v842_v57 = vrot.slane %v840_v38, 4  ;;  %v2971_v62 = vcombine.low %v3768_v14, %v3773_v22  ;;  %v1510_v30 = vsel %vm1202_vm0, %v3794_v46, 0  ;;  %v2912_v46 = vld [vmem:[%s3688_s7 + $0x18] sm:$0xf] }
  0x5c   : > { %v3042_v56 = vcombine.low %v827_v28, %v830_v36  ;;  %v837_v51 = vsel %vm3880_vm7, %v835_v35, %v836_v15  ;;  %v841_v61 = vsel %vm3880_vm7, %v2911_v47, %v840_v38  ;;  %v493_v4 = vrot.slane %v3721_v31, 5  ;;  %v2914_v15 = vld [vmem:[%s3688_s7 + $0x24] sm:$0xf] }
  0x5d   : > { %v3043_v52 = vcombine.low %v834_v40, %v837_v51  ;;  %v844_v14 = vsel %vm3880_vm7, %v842_v57, %v843_v49  ;;  %v871_v60 = vshrl.u32 %v2912_v46, 16  ;;  %v496_v21 = vrot.slane %v3733_v42, 5  ;;  %v4082_v42 = vld [vmem:[%s3688_s7 + $0x28] sm:$0xf]  ;;  %v452_v57 = vld [vmem:[%s3688_s7 + $0x24] sm:$0xe] }
  0x5e   : > { %v3044_v10 = vcombine.low %v841_v61, %v844_v14  ;;  %v2972_v6 = vcombine.low %v3807_v2, %v3817_v18  ;;  %v874_v24 = vshll.u32 %v2912_v46, 16  ;;  %v3054_v31 = vcombine.low %v2912_v46, %v4059_v17  ;;  %v451_v2 = vld [vmem:[%s3688_s7 + $0x18] sm:$0xe]  ;;  %v449_v49 = vld [vmem:[%s3688_s7] sm:$0xe] }
  0x5f   : > { %v2973_v0 = vcombine.low %v3846_v59, %v3852_v11  ;;  %v2356_v34 = vsel %vm1202_vm0, %v3954_v48, 0  ;;  %v2865_v28 = vrot.slane %v450_v5, 9  ;;  %v4079_v33 = vsel %vm1202_vm0, %v3002_v58, 0  ;;  %v4094_v48 = vld [vmem:[%s3688_s7 + $0x30] sm:$0xf] }
  0x60   : > { %v495_v38 = vrot.slane %v493_v4, 4  ;;  %v4087_v40 = vsel %vm1202_vm0, %v4067_v26, 0  ;;  %v489_v59 = vrot.slane %v3697_v8, 5  ;;  %v4091_v35 = vrot.slane %v871_v60, 4 }
  0x61   : > { %3288 = vmatmul.mubr.msk.bf16.gmra.mrb[8].mxu0 %vm1177_vm3, %v3042_v56  ;;  %v4101_v36 = vsel %vm3880_vm7, %v2865_v28, %v493_v4  ;;  %v4104_v47 = vrot.slane %v874_v24, 5  ;;  %v884_v56 = vshrl.u32 %v4059_v17, 16  ;;  %v486_v8 = vrot.slane %v3694_v7, 5 }
  0x62   : > { %3208 = vmatmul.mubr.msk.bf16.vlgmr.msra.gmra.mrb[0].mxu1 %vm1177_vm3, %v2970_v41  ;;  %3291 = vmatprep.mubr.msk.bf16.mxu0 %vm1177_vm3, %v3043_v52  ;;  %v4097_v41 = vld [vmem:[%s3688_s7 + $0x34] sm:$0xf]  ;;  %v4111_v51 = vsel %vm3880_vm7, %v495_v38, %v496_v21  ;;  %v2866_v52 = vrot.slane %v451_v2, 9  ;;  %v2974_v7 = vcombine.low %v3870_v45, %v3874_v53  ;;  %v895_v61 = vshrl.u32 %v2914_v15, 16 }
  0x63   : > { %3224 = vmatpush3.bf16.msra.mxu1 %v1510_v30  ;;  %3211 = vmatprep.mubr.msk.bf16.mxu1 %vm1177_vm3, %v2971_v62  ;;  %v500_v30 = vrot.slane %v3773_v22, 5  ;;  %v898_v14 = vshll.u32 %v2914_v15, 16  ;;  %v3055_v46 = vcombine.low %v2914_v15, %v4082_v42  ;;  %v507_v60 = vrot.slane %v3817_v18, 5  ;;  %v4258_v62 = vld [vmem:[%s3688_s7 + $0x2c] sm:$0x1] }
  0x64   : > { %3482 = vmatprep.subr.msk.bf16.mxu1 %vm1202_vm0, %v3002_v58  ;;  %v503_v58 = vrot.slane %v3780_v27, 5  ;;  %v2975_v22 = vcombine.low %v3906_v43, %v3912_v16  ;;  %v3056_v27 = vcombine.low %v4094_v48, %v4097_v41  ;;  %v2864_v45 = vrot.slane %v449_v49, 9 }
  0x65   : > { %v4125_v4 = vsel %vm3880_vm7, %v2866_v52, %v500_v30  ;;  %v502_v5 = vrot.slane %v500_v30, 4  ;;  %v510_v21 = vrot.slane %v3824_v29, 5  ;;  %v488_v24 = vrot.slane %v486_v8, 4  ;;  %v4147_v29 = vld [vmem:[%s3688_s7 + $0x3c] sm:$0xf] }
  0x66   : > { %v509_v18 = vrot.slane %v507_v60, 4  ;;  %v4142_v43 = vrot.slane %v895_v61, 4  ;;  %v908_v15 = vshrl.u32 %v4082_v42, 16  ;;  %v919_v28 = vshrl.u32 %v4094_v48, 16  ;;  %v454_v30 = vld [vmem:[%s3688_s7 + $0x3c] sm:$0xe] }
  0x67   : > { %v4151_v2 = vrot.slane %v898_v14, 5  ;;  %v514_v52 = vrot.slane %v3852_v11, 5  ;;  %v4163_v61 = vld [vmem:[%s3688_s7 + $0x40] sm:$0xf]  ;;  %v487_v11 = vsel %vm3880_vm7, %v2864_v45, %v486_v8  ;;  %v2869_v8 = vrot.slane %v454_v30, 9 }
  0x68   : > { %v3057_v45 = vcombine.low %v4147_v29, %v4163_v61  ;;  %v943_v38 = vshrl.u32 %v4147_v29, 16 }
  0x69   : > { %3292 = vmatmul.mubr.msk.bf16.gmra.mrb[12].mxu0 %vm1177_vm3, %v3044_v10  ;;  %v2867_v10 = vrot.slane %v452_v57, 9  ;;  %v4156_v57 = vsel %vm3880_vm7, %v509_v18, %v510_v21 }
  0x6a   : > { %3212 = vmatmul.mubr.msk.bf16.gmra.mrb[4].mxu1 %vm1177_vm3, %v2972_v6  ;;  %3297 = vmatprep.mubr.msk.bf16.mxu0 %vm1177_vm3, %v3054_v31  ;;  %v453_v6 = vld [vmem:[%s3688_s7 + $0x30] sm:$0xe]  ;;  %v4136_v31 = vsel %vm3880_vm7, %v502_v5, %v503_v58  ;;  %v922_v58 = vshll.u32 %v4094_v48, 16  ;;  %v880_v5 = vshll.u32 %v4059_v17, 16  ;;  %v4176_v48 = vld [vmem:[%s3688_s7 + $0x48] sm:$0xf] }
  0x6b   : > { %3215 = vmatprep.mubr.msk.bf16.mxu1 %vm1177_vm3, %v2973_v0  ;;  %v4140_v0 = vsel %vm3880_vm7, %v2867_v10, %v507_v60  ;;  %v2868_v49 = vrot.slane %v453_v6, 9  ;;  %v516_v10 = vrot.slane %v514_v52, 4  ;;  %v4198_v6 = vld [vmem:[%s3688_s7 + $0x20] sm:$0x1]  ;;  %v967_v9 = vshrl.u32 %v4176_v48, 16 }
  0x6c   : > { %v4185_v60 = vrot.slane %v880_v5, 5  ;;  %v4217_v5 = vld [vmem:[%s3688_s7 + $0x60] sm:$0xf] }
  0x71   : > { %3298 = vmatmul.mubr.msk.bf16.vlgmr.msra.gmra.mrb[0].mxu0 %vm1177_vm3, %v3055_v46  ;;  %v517_v46 = vrot.slane %v3861_v25, 5  ;;  %v4183_v25 = vsel %vm3880_vm7, %v2868_v49, %v514_v52  ;;  %v4209_v49 = vld [vmem:[%s3688_s7 + $0x54] sm:$0xf]  ;;  %v890_v52 = vshll.u32 %v4198_v6, 16 }
  0x72   : > { %3216 = vmatmul.mubr.msk.bf16.gmra.mrb[8].mxu1 %vm1177_vm3, %v2974_v7  ;;  %3314 = vmatpush3.bf16.msra.mxu0 %v2356_v34  ;;  %v490_v34 = vsel %vm3880_vm7, %v488_v24, %v489_v59  ;;  %v4179_v7 = vld [vmem:[%s3688_s7 + $0x4c] sm:$0xf]  ;;  %v521_v59 = vrot.slane %v3874_v53, 5  ;;  %v455_v24 = vld [vmem:[%s3688_s7 + $0x48] sm:$0xe]  ;;  %v2976_v53 = vcombine.low %v3937_v23, %v3943_v39 }
  0x73   : > { %3219 = vmatprep.mubr.msk.bf16.mxu1 %vm1177_vm3, %v2975_v22  ;;  %3301 = vmatprep.mubr.msk.bf16.mxu0 %vm1177_vm3, %v3056_v27  ;;  %v886_v22 = vrot.slane %v884_v56, 4  ;;  %v932_v27 = vshrl.u32 %v4097_v41, 16  ;;  %v4195_v21 = vsel %vm3880_vm7, %v516_v10, %v517_v46  ;;  %v524_v56 = vrot.slane %v3888_v12, 5  ;;  %v4214_v46 = vld [vmem:[%s3688_s7 + $0x58] sm:$0xf] }
  0x74   : > { %3488 = vmatprep.subr.msk.bf16.mxu0 %vm1202_vm0, %v4067_v26  ;;  %v4202_v26 = vrot.slane %v919_v28, 4  ;;  %v3058_v18 = vcombine.low %v4176_v48, %v4179_v7  ;;  %v2986_v30 = vcombine.low %v487_v11, %v490_v34  ;;  %v877_v12 = vor.u32 %v4104_v47, %v4091_v35  ;;  %v4226_v10 = vld [vmem:[%s3688_s7 + $0x64] sm:$0xf] }
  0x75   : > { %v4223_v28 = vsel %vm3880_vm7, %v2869_v8, %v521_v59  ;;  %v523_v23 = vrot.slane %v521_v59, 4  ;;  %v887_v14 = vor.u32 %v886_v22, %v4185_v60  ;;  %v2870_v11 = vrot.slane %v455_v24, 9 }
  0x76   : > { %v528_v34 = vrot.slane %v3912_v16, 5  ;;  %v904_v47 = vshll.u32 %v4082_v42, 16  ;;  %v531_v8 = vrot.slane %v3922_v63, 5  ;;  %v924_v59 = vrot.slane %v922_v58, 5 }
  0x77   : > { %v4235_v35 = vsel %vm3880_vm7, %v523_v23, %v524_v56  ;;  %v946_v22 = vshll.u32 %v4147_v29, 16  ;;  %v3059_v16 = vcombine.low %v4209_v49, %v4214_v46  ;;  %v456_v56 = vld [vmem:[%s3688_s7 + $0x54] sm:$0xe]  ;;  %v3060_v63 = vcombine.low %v4217_v5, %v4226_v10 }
  0x78   : > { %v878_v58 = vrot.slane %v877_v12, 4  ;;  %v4252_v24 = vsel %vm3880_vm7, %v2870_v11, %v528_v34  ;;  %v530_v29 = vrot.slane %v528_v34, 4  ;;  %v910_v23 = vrot.slane %v908_v15, 4 }
  0x79   : > { %3302 = vmatmul.mubr.msk.bf16.gmra.mrb[4].mxu0 %vm1177_vm3, %v3057_v45  ;;  %v928_v45 = vshll.u32 %v4097_v41, 16  ;;  %v2871_v37 = vrot.slane %v456_v56, 9  ;;  %v535_v11 = vrot.slane %v3943_v39, 5  ;;  %v934_v15 = vrot.slane %v932_v27, 4 }
  0x7a   : > { %3220 = vmatmul.mubr.msk.bf16.gmra.mrb[12].mxu1 %vm1177_vm3, %v2976_v53  ;;  %3305 = vmatprep.mubr.msk.bf16.mxu0 %vm1177_vm3, %v3058_v18  ;;  %v888_v53 = vrot.slane %v887_v14, 4  ;;  %v892_v18 = vrot.slane %v890_v52, 5  ;;  %v4264_v12 = vsel %vm3880_vm7, %v530_v29, %v531_v8  ;;  %v538_v34 = vrot.slane %v3948_v44, 5  ;;  %v4290_v29 = vld [vmem:[%s3688_s7 + $0x6c] sm:$0xf] }
  0x7b   : > { %3225 = vmatprep.mubr.msk.bf16.mxu1 %vm1177_vm3, %v2986_v30  ;;  %v4260_v30 = vrot.slane %v904_v47, 5  ;;  %v4269_v52 = vrot.slane %v928_v45, 5  ;;  %v956_v47 = vshrl.u32 %v4163_v61, 16  ;;  %v4279_v8 = vsel %vm3880_vm7, %v2871_v37, %v535_v11  ;;  %v4293_v14 = vld [vmem:[%s3688_s7 + $0x70] sm:$0xf] }
  0x7c   : > { %v537_v39 = vrot.slane %v535_v11, 4  ;;  %v970_v56 = vshll.u32 %v4176_v48, 16  ;;  %v883_v45 = vsel %vm3725_vm4, %v878_v58, %v4185_v60  ;;  %v901_v44 = vor.u32 %v4151_v2, %v4142_v43 }
  0x7d   : > { %v914_v27 = vshll.u32 %v4258_v62, 16  ;;  %v893_v37 = vsel %vm3725_vm4, %v888_v53, %v892_v18  ;;  %v911_v48 = vor.u32 %v910_v23, %v4260_v30  ;;  %v925_v11 = vor.u32 %v924_v59, %v4202_v26 }
  0x7e   : > { %v4301_v60 = vsel %vm3880_vm7, %v537_v39, %v538_v34  ;;  %v4639_v43 = vcombine.low %v4101_v36, %v4111_v51  ;;  %v935_v2 = vor.u32 %v934_v15, %v4269_v52  ;;  %v952_v26 = vshll.u32 %v4163_v61, 16 }
  0x7f   : > { %v945_v59 = vrot.slane %v943_v38, 4  ;;  %v948_v53 = vrot.slane %v946_v22, 5  ;;  %v980_v18 = vshrl.u32 %v4179_v7, 16  ;;  %v4640_v36 = vcombine.low %v4125_v4, %v4136_v31  ;;  %v3555_v38 = vld [vmem:[%s4620_s1 + $0x8] sm:$0x3] }
  0x80   : > { %v976_v51 = vshll.u32 %v4179_v7, 16  ;;  %v972_v23 = vrot.slane %v970_v56, 5  ;;  %v3061_v15 = vcombine.low %v4290_v29, %v4293_v14  ;;  %v902_v34 = vrot.slane %v901_v44, 4 }
  0x81   : > { %3306 = vmatmul.mubr.msk.bf16.gmra.mrb[8].mxu0 %vm1177_vm3, %v3059_v16  ;;  %v938_v16 = vshll.u32 %v4275_v13, 16  ;;  %v912_v22 = vrot.slane %v911_v48, 4  ;;  %v916_v4 = vrot.slane %v914_v27, 5  ;;  %v926_v31 = vrot.slane %v925_v11, 4  ;;  %v4342_v11 = vld [vmem:[%s3688_s7 + $0x50] sm:$0x1] }
  0x82   : > { %3226 = vmatmul.mubr.msk.bf16.vlgmr.msra.gmra.mrb[0].mxu1 %vm1177_vm3, %v4639_v43  ;;  %3309 = vmatprep.mubr.msk.bf16.mxu0 %vm1177_vm3, %v3060_v63  ;;  %v969_v63 = vrot.slane %v967_v9, 4  ;;  %v936_v39 = vrot.slane %v935_v2, 4  ;;  %v4329_v9 = vrot.slane %v952_v26, 5  ;;  %v958_v56 = vrot.slane %v956_v47, 4 }
  0x83   : > { %3242 = vmatpush3.bf16.msra.mxu1 %v4079_v33  ;;  %3229 = vmatprep.mubr.msk.bf16.mxu1 %vm1177_vm3, %v4640_v36  ;;  %v3071_v33 = vcombine.low %v883_v45, %v893_v37  ;;  %v940_v43 = vrot.slane %v938_v16, 5  ;;  %v4327_v36 = vld [vmem:[%s3688_s7 + $0x44] sm:$0x1]  ;;  %v991_v44 = vshrl.u32 %v4209_v49, 16  ;;  %v994_v58 = vshll.u32 %v4209_v49, 16 }
  0x84   : > { %3484 = vmatprep.subr.msk.bf16.mxu1 %vm1202_vm0, %v3555_v38  ;;  %v4333_v1 = vrot.slane %v976_v51, 5  ;;  %v982_v20 = vrot.slane %v980_v18, 4  ;;  %v1004_v45 = vshrl.u32 %v4214_v46, 16  ;;  %v1015_v37 = vshrl.u32 %v4217_v5, 16 }
  0x85   : > { %v1018_v27 = vshll.u32 %v4217_v5, 16  ;;  %v907_v48 = vsel %vm3725_vm4, %v902_v34, %v4260_v30  ;;  %v917_v49 = vsel %vm3725_vm4, %v912_v22, %v916_v4  ;;  %v931_v47 = vsel %vm3725_vm4, %v926_v31, %v4269_v52 }
  0x86   : > { %v949_v2 = vor.u32 %v948_v53, %v945_v59  ;;  %v962_v16 = vshll.u32 %v4327_v36, 16  ;;  %v4641_v5 = vcombine.low %v4140_v0, %v4156_v57  ;;  %v941_v30 = vsel %vm3725_vm4, %v936_v39, %v940_v43 }
  0x87   : > { %v959_v26 = vor.u32 %v958_v56, %v4329_v9  ;;  %v973_v18 = vor.u32 %v972_v23, %v969_v63  ;;  %v1000_v51 = vshll.u32 %v4214_v46, 16  ;;  %v1028_v52 = vshrl.u32 %v4226_v10, 16 }
  0x88   : > { %v4642_v59 = vcombine.low %v4183_v25, %v4195_v21  ;;  %v983_v0 = vor.u32 %v982_v20, %v4333_v1  ;;  %v986_v57 = vshll.u32 %v4342_v11, 16  ;;  %v1024_v53 = vshll.u32 %v4226_v10, 16  ;;  %v4369_v25 = vld [vmem:[%s3688_s7 + $0x5c] sm:$0x1] }
  0x89   : > { %3310 = vmatmul.mubr.msk.bf16.gmra.mrb[12].mxu0 %vm1177_vm3, %v3061_v15  ;;  %v993_v15 = vrot.slane %v991_v44, 4  ;;  %v996_v34 = vrot.slane %v994_v58, 5  ;;  %v1017_v38 = vrot.slane %v1015_v37, 4  ;;  %v1020_v63 = vrot.slane %v1018_v27, 5  ;;  %v4378_v27 = vld [vmem:[%s3688_s7 + $0x68] sm:$0x1] }
  0x8a   : > { %3230 = vmatmul.mubr.msk.bf16.gmra.mrb[4].mxu1 %vm1177_vm3, %v4641_v5  ;;  %3315 = vmatprep.mubr.msk.bf16.mxu0 %vm1177_vm3, %v3071_v33  ;;  %v3072_v23 = vcombine.low %v907_v48, %v917_v49  ;;  %v3073_v33 = vcombine.low %v931_v47, %v941_v30  ;;  %v950_v22 = vrot.slane %v949_v2, 4  ;;  %v964_v4 = vrot.slane %v962_v16, 5 }
  0x8b   : > { %3233 = vmatprep.mubr.msk.bf16.mxu1 %vm1177_vm3, %v4642_v59  ;;  %v960_v31 = vrot.slane %v959_v26, 4  ;;  %v974_v39 = vrot.slane %v973_v18, 4  ;;  %v4371_v21 = vrot.slane %v1000_v51, 5  ;;  %v1006_v20 = vrot.slane %v1004_v45, 4  ;;  %v4408_v18 = vld [vmem:[%s3688_s7 + $0x48] sm:$0xf] }
  0x8c   : > { %v984_v43 = vrot.slane %v983_v0, 4  ;;  %v988_v56 = vrot.slane %v986_v57, 5  ;;  %v4373_v5 = vrot.slane %v1024_v53, 5  ;;  %v1030_v44 = vrot.slane %v1028_v52, 4 }
  0x8d   : > { %v1039_v58 = vshrl.u32 %v4290_v29, 16  ;;  %v1042_v37 = vshll.u32 %v4290_v29, 16  ;;  %v1052_v48 = vshrl.u32 %v4293_v14, 16  ;;  %v955_v45 = vsel %vm3725_vm4, %v950_v22, %v4329_v9  ;;  %v3557_v22 = vld [vmem:[%s3688_s7 + $0x10] sm:$0xf] }
  0x8e   : > { %v997_v49 = vor.u32 %v996_v34, %v993_v15  ;;  %v1010_v47 = vshll.u32 %v4369_v25, 16  ;;  %v4643_v2 = vcombine.low %v4223_v28, %v4235_v35  ;;  %v965_v29 = vsel %vm3725_vm4, %v960_v31, %v964_v4 }
  0x8f   : > { %v979_v16 = vsel %vm3725_vm4, %v974_v39, %v4333_v1  ;;  %v1007_v30 = vor.u32 %v1006_v20, %v4371_v21  ;;  %v1048_v9 = vshll.u32 %v4293_v14, 16  ;;  %v4644_v26 = vcombine.low %v4252_v24, %v4264_v12 }
  0x90   : > { %v1021_v28 = vor.u32 %v1020_v63, %v1017_v38  ;;  %v1031_v35 = vor.u32 %v1030_v44, %v4373_v5  ;;  %v1034_v1 = vshll.u32 %v4378_v27, 16  ;;  %v695_v51 = vshll.u32 %v3997_v54, 16  ;;  %v4414_v38 = vld [vmem:[%s3688_s7 + $0x74] sm:$0x1] }
  0x91   : > { %3316 = vmatmul.mubr.msk.bf16.vlgmr.msra.gmra.mrb[0].mxu0 %vm1177_vm3, %v3072_v23  ;;  %v1041_v24 = vrot.slane %v1039_v58, 4  ;;  %v686_v12 = vshrl.u32 %v4408_v18, 16  ;;  %v689_v52 = vshll.u32 %v4408_v18, 16  ;;  %v1044_v59 = vrot.slane %v1042_v37, 5 }
  0x92   : > { %3234 = vmatmul.mubr.msk.bf16.gmra.mrb[8].mxu1 %vm1177_vm3, %v4643_v2  ;;  %3332 = vmatpush3.bf16.msra.mxu0 %v4087_v40  ;;  %v989_v40 = vsel %vm3725_vm4, %v984_v43, %v988_v56  ;;  %v3074_v0 = vcombine.low %v955_v45, %v965_v29  ;;  %v998_v57 = vrot.slane %v997_v49, 4  ;;  %v1012_v53 = vrot.slane %v1010_v47, 5  ;;  %v2936_v2 = vld [vmem:[%s3688_s7 + $0x18] sm:$0xe] }
  0x93   : > { %3237 = vmatprep.mubr.msk.bf16.mxu1 %vm1177_vm3, %v4644_v26  ;;  %3319 = vmatprep.mubr.msk.bf16.mxu0 %vm1177_vm3, %v3073_v33  ;;  %v3075_v15 = vcombine.low %v979_v16, %v989_v40  ;;  %v1008_v34 = vrot.slane %v1007_v30, 4  ;;  %v4416_v63 = vrot.slane %v1048_v9, 5  ;;  %v1054_v23 = vrot.slane %v1052_v48, 4  ;;  %v3556_v33 = vld [vmem:[%s3688_s7 + $0xc] sm:$0xf] }
  0x94   : > { %v3003_v4 = vcombine.low %v3556_v33, %v3557_v22  ;;  %v1022_v31 = vrot.slane %v1021_v28, 4  ;;  %v1032_v39 = vrot.slane %v1031_v35, 4  ;;  %v1036_v20 = vrot.slane %v1034_v1, 5  ;;  %v3558_v9 = vld [vmem:[%s3688_s7 + $0x18] sm:$0xf] }
  0x95   : > { %v699_v43 = vshrl.u32 %v3997_v54, 16  ;;  %v688_v56 = vrot.slane %v686_v12, 4  ;;  %v691_v44 = vrot.slane %v689_v52, 5  ;;  %v1045_v58 = vor.u32 %v1044_v59, %v1041_v24  ;;  %v3559_v26 = vld [vmem:[%s3688_s7 + $0x1c] sm:$0xf] }
  0x96   : > { %v1058_v37 = vshll.u32 %v4414_v38, 16  ;;  %v4645_v48 = vcombine.low %v4279_v8, %v4301_v60  ;;  %v1003_v45 = vsel %vm3725_vm4, %v998_v57, %v4371_v21  ;;  %v1013_v49 = vsel %vm3725_vm4, %v1008_v34, %v1012_v53  ;;  %v3561_v57 = vld [vmem:[%s3688_s7 + $0x28] sm:$0xf] }
  0x97   : > { %v1055_v47 = vor.u32 %v1054_v23, %v4416_v63  ;;  %v1096_v29 = vrot.slane %v4059_v17, 5  ;;  %v697_v16 = vrot.slane %v695_v51, 5  ;;  %v1027_v8 = vsel %vm3725_vm4, %v1022_v31, %v4373_v5  ;;  %v2880_v5 = vld [vmem:[%s3688_s7 + $0x3c] sm:$0xf] }
  0x98   : > { %v1037_v60 = vsel %vm3725_vm4, %v1032_v39, %v1036_v20  ;;  %v701_v21 = vrot.slane %v699_v43, 4  ;;  %v705_v30 = vshll.u32 %v4000_v55, 16  ;;  %v3004_v40 = vcombine.low %v3558_v9, %v3559_v26  ;;  %v3562_v43 = vld [vmem:[%s3688_s7 + $0x30] sm:$0xf] }
  0x99   : > { %3320 = vmatmul.mubr.msk.bf16.gmra.mrb[4].mxu0 %vm1177_vm3, %v3074_v0  ;;  %v692_v17 = vor.u32 %v691_v44, %v688_v56  ;;  %v3076_v28 = vcombine.low %v1003_v45, %v1013_v49  ;;  %v1046_v35 = vrot.slane %v1045_v58, 4  ;;  %v1060_v1 = vrot.slane %v1058_v37, 5  ;;  %v3560_v0 = vld [vmem:[%s3688_s7 + $0x24] sm:$0xf]  ;;  %v3563_v56 = vld [vmem:[%s3688_s7 + $0x34] sm:$0xf] }
  0x9a   : > { %3238 = vmatmul.mubr.msk.bf16.gmra.mrb[12].mxu1 %vm1177_vm3, %v4645_v48  ;;  %3323 = vmatprep.mubr.msk.bf16.mxu0 %vm1177_vm3, %v3075_v15  ;;  %v2944_v51 = vrot.slane %v2936_v2, 9  ;;  %v3077_v24 = vcombine.low %v1027_v8, %v1037_v60  ;;  %v1056_v12 = vrot.slane %v1055_v47, 4  ;;  %v1098_v52 = vrot.slane %v1096_v29, 4  ;;  %v2938_v58 = vld [vmem:[%s3688_s7 + $0x30] sm:$0xe] }
  0x9b   : > { %3243 = vmatprep.mubr.msk.bf16.mxu1 %vm1177_vm3, %v3003_v4  ;;  %v1099_v59 = vrot.slane %v4198_v6, 5  ;;  %v3005_v53 = vcombine.low %v3560_v0, %v3561_v57  ;;  %v662_v15 = vshrl.u32 %v2880_v5, 16  ;;  %v665_v55 = vshll.u32 %v2880_v5, 16  ;;  %v2937_v6 = vld [vmem:[%s3688_s7 + $0x24] sm:$0xe] }
  0x9c   : > { %v693_v34 = vrot.slane %v692_v17, 4  ;;  %v707_v23 = vrot.slane %v705_v30, 5  ;;  %v1051_v33 = vsel %vm3725_vm4, %v1046_v35, %v4416_v63  ;;  %v1097_v22 = vsel %vm3880_vm7, %v2944_v51, %v1096_v29  ;;  %v2884_v35 = vld [vmem:[%s3688_s7 + $0x54] sm:$0xf]  ;;  %v2939_v51 = vld [vmem:[%s3688_s7 + $0x3c] sm:$0xe] }
  0x9d   : > { %v1103_v4 = vrot.slane %v4082_v42, 5  ;;  %v1061_v31 = vsel %vm3725_vm4, %v1056_v12, %v1060_v1  ;;  %v1100_v39 = vsel %vm3880_vm7, %v1098_v52, %v1099_v59  ;;  %v1110_v20 = vrot.slane %v4097_v41, 5  ;;  %v4646_v59 = vld [vmem:[#allocation2_spill] sm:$0xff]  ;;  %v2940_v57 = vld [vmem:[%s3688_s7 + $0x48] sm:$0xe] }
  0x9e   : > { %v702_v63 = vor.u32 %v701_v21, %v697_v16  ;;  %v3006_v42 = vcombine.low %v3562_v43, %v3563_v56  ;;  %v664_v44 = vrot.slane %v662_v15, 4  ;;  %v671_v37 = vshll.u32 %v3976_v19, 16 }
  0x9f   : > { %v675_v48 = vshrl.u32 %v3976_v19, 16  ;;  %v667_v45 = vrot.slane %v665_v55, 5  ;;  %v2945_v49 = vrot.slane %v2937_v6, 9  ;;  %v698_v47 = vsel %vm3725_vm4, %v693_v34, %v697_v16  ;;  %v4647_v55 = vld [vmem:[#allocation3_spill] sm:$0xff] }
  0xa0   : > { %v703_v41 = vrot.slane %v702_v63, 4  ;;  %v3078_v2 = vcombine.low %v1051_v33, %v1061_v31  ;;  %v1105_v29 = vrot.slane %v1103_v4, 4  ;;  %v1106_v8 = vrot.slane %v4258_v62, 5 }
  0xa1   : > { %3324 = vmatmul.mubr.msk.bf16.gmra.mrb[8].mxu0 %vm1177_vm3, %v3076_v28  ;;  %v2946_v60 = vrot.slane %v2938_v58, 9  ;;  %v1112_v21 = vrot.slane %v1110_v20, 4  ;;  %v1113_v30 = vrot.slane %v4275_v13, 5  ;;  %v3007_v26 = vcombine.low %v2880_v5, %v3976_v19 }
  0xa2   : > { %3244 = vmatmul.mubr.msk.bf16.vlgmr.msra.gmra.mrb[0].mxu1 %vm1177_vm3, %v3004_v40  ;;  %3327 = vmatprep.mubr.msk.bf16.mxu0 %vm1177_vm3, %v3077_v24  ;;  %v708_v9 = vsel %vm3725_vm4, %v703_v41, %v707_v23  ;;  %v4478_v40 = vrot.slane %v671_v37, 5  ;;  %v677_v16 = vrot.slane %v675_v48, 4  ;;  %v3008_v62 = vcombine.low %v4408_v18, %v3997_v54  ;;  %v4498_v18 = vld [vmem:[%s3688_s7 + $0x60] sm:$0xf] }
  0xa3   : > { %3350 = vmatpush3.bf16.msra.mxu1 %v3666_v3  ;;  %3247 = vmatprep.mubr.msk.bf16.mxu1 %vm1177_vm3, %v3005_v53  ;;  %v3088_v3 = vcombine.low %v1097_v22, %v1100_v39  ;;  %v4480_v17 = vcombine.low %v698_v47, %v708_v9  ;;  %v1104_v13 = vsel %vm3880_vm7, %v2945_v49, %v1103_v4  ;;  %v1117_v19 = vrot.slane %v4163_v61, 5 }
  0xa4   : > { %v1107_v28 = vsel %vm3880_vm7, %v1105_v29, %v1106_v8  ;;  %v1111_v1 = vsel %vm3880_vm7, %v2946_v60, %v1110_v20  ;;  %v1114_v54 = vsel %vm3880_vm7, %v1112_v21, %v1113_v30  ;;  %v668_v24 = vor.u32 %v667_v45, %v664_v44  ;;  %v2942_v8 = vld [vmem:[%s3688_s7 + $0x60] sm:$0xe]  ;;  %v4648_v21 = vld [vmem:[#allocation5_spill] sm:$0xff] }
  0xa5   : > { %v1124_v12 = vrot.slane %v4179_v7, 5  ;;  %v710_v5 = vshrl.u32 %v2884_v35, 16  ;;  %v713_v61 = vshll.u32 %v2884_v35, 16  ;;  %v678_v52 = vor.u32 %v677_v16, %v4478_v40 }
  0xa6   : > { %v681_v0 = vshll.u32 %v4646_v59, 16  ;;  %v3089_v53 = vcombine.low %v1104_v13, %v1107_v28  ;;  %v734_v15 = vshrl.u32 %v4498_v18, 16  ;;  %v719_v34 = vshll.u32 %v4647_v55, 16 }
  0xa7   : > { %v723_v23 = vshrl.u32 %v4647_v55, 16  ;;  %v3090_v33 = vcombine.low %v1111_v1, %v1114_v54  ;;  %v2947_v22 = vrot.slane %v2939_v51, 9  ;;  %v1119_v6 = vrot.slane %v1117_v19, 4 }
  0xa8   : > { %v1120_v7 = vrot.slane %v4327_v36, 5  ;;  %v669_v4 = vrot.slane %v668_v24, 4  ;;  %v2948_v31 = vrot.slane %v2940_v57, 9  ;;  %v1126_v39 = vrot.slane %v1124_v12, 4 }
  0xa9   : > { %3328 = vmatmul.mubr.msk.bf16.gmra.mrb[12].mxu0 %vm1177_vm3, %v3078_v2  ;;  %v1127_v20 = vrot.slane %v4342_v11, 5  ;;  %v3009_v63 = vcombine.low %v2884_v35, %v4647_v55  ;;  %v679_v43 = vrot.slane %v678_v52, 4  ;;  %v683_v56 = vrot.slane %v681_v0, 5  ;;  %v2941_v2 = vld [vmem:[%s3688_s7 + $0x54] sm:$0xe] }
  0xaa   : > { %3248 = vmatmul.mubr.msk.bf16.gmra.mrb[4].mxu1 %vm1177_vm3, %v3006_v42  ;;  %3333 = vmatprep.mubr.msk.bf16.mxu0 %vm1177_vm3, %v3088_v3  ;;  %v712_v42 = vrot.slane %v710_v5, 4  ;;  %v715_v44 = vrot.slane %v713_v61, 5  ;;  %v721_v58 = vrot.slane %v719_v34, 5  ;;  %v725_v37 = vrot.slane %v723_v23, 4  ;;  %v4650_v34 = vld [vmem:[#allocation6_spill] sm:$0xff] }
  0xab   : > { %3251 = vmatprep.mubr.msk.bf16.mxu1 %vm1177_vm3, %v3007_v26  ;;  %v736_v48 = vrot.slane %v734_v15, 4  ;;  %v737_v36 = vshll.u32 %v4498_v18, 16  ;;  %v1118_v45 = vsel %vm3880_vm7, %v2947_v22, %v1117_v19  ;;  %v1121_v11 = vsel %vm3880_vm7, %v1119_v6, %v1120_v7 }
  0xac   : > { %v674_v49 = vsel %vm3725_vm4, %v669_v4, %v4478_v40  ;;  %v1125_v47 = vsel %vm3880_vm7, %v2948_v31, %v1124_v12  ;;  %v1128_v41 = vsel %vm3880_vm7, %v1126_v39, %v1127_v20  ;;  %v1131_v3 = vrot.slane %v4214_v46, 5 }
  0xad   : > { %v684_v29 = vsel %vm3725_vm4, %v679_v43, %v683_v56  ;;  %v1138_v60 = vrot.slane %v4226_v10, 5  ;;  %v743_v30 = vshll.u32 %v4648_v21, 16  ;;  %v747_v9 = vshrl.u32 %v4648_v21, 16 }
  0xae   : > { %v3010_v26 = vcombine.low %v4498_v18, %v4648_v21  ;;  %v716_v40 = vor.u32 %v715_v44, %v712_v42  ;;  %v726_v16 = vor.u32 %v725_v37, %v721_v58  ;;  %v739_v46 = vrot.slane %v737_v36, 5 }
  0xaf   : > { %v3091_v28 = vcombine.low %v1118_v45, %v1121_v11  ;;  %v2949_v35 = vrot.slane %v2941_v2, 9  ;;  %v1134_v19 = vrot.slane %v4369_v25, 5  ;;  %v3024_v1 = vcombine.low %v674_v49, %v684_v29 }
  0xb0   : > { %v3092_v54 = vcombine.low %v1125_v47, %v1128_v41  ;;  %v1133_v51 = vrot.slane %v1131_v3, 4  ;;  %v2950_v10 = vrot.slane %v2942_v8, 9  ;;  %v1140_v24 = vrot.slane %v1138_v60, 4 }
  0xb1   : > { %3334 = vmatmul.mubr.msk.bf16.vlgmr.msra.gmra.mrb[0].mxu0 %vm1177_vm3, %v3089_v53  ;;  %v1141_v12 = vrot.slane %v4378_v27, 5  ;;  %v745_v5 = vrot.slane %v743_v30, 5  ;;  %v749_v61 = vrot.slane %v747_v9, 4  ;;  %v717_v18 = vrot.slane %v716_v40, 4 }
  0xb2   : > { %3252 = vmatmul.mubr.msk.bf16.gmra.mrb[8].mxu1 %vm1177_vm3, %v3008_v62  ;;  %3337 = vmatprep.mubr.msk.bf16.mxu0 %vm1177_vm3, %v3090_v33  ;;  %v4649_v62 = vld [vmem:[#allocation4_spill] sm:$0xff]  ;;  %v727_v52 = vrot.slane %v726_v16, 4  ;;  %v1132_v25 = vsel %vm3880_vm7, %v2949_v35, %v1131_v3  ;;  %v1135_v0 = vsel %vm3880_vm7, %v1133_v51, %v1134_v19  ;;  %v740_v57 = vor.u32 %v739_v46, %v736_v48  ;;  %v2943_v33 = vld [vmem:[%s3688_s7 + $0x6c] sm:$0xe]  ;;  %s4581_s7 = scalar_lea.vmem %s4621_s2, %s2861_s4 }
  0xb3   : > { %3255 = vmatprep.mubr.msk.bf16.mxu1 %vm1177_vm3, %v3009_v63  ;;  %v729_v13 = vshll.u32 %v4649_v62, 16  ;;  %v1145_v27 = vrot.slane %v4293_v14, 5  ;;  %v1139_v53 = vsel %vm3880_vm7, %v2950_v10, %v1138_v60  ;;  %v1142_v15 = vsel %vm3880_vm7, %v1140_v24, %v1141_v12 }
  0xb4   : > { %v750_v55 = vor.u32 %v749_v61, %v745_v5  ;;  %v753_v23 = vshll.u32 %v4650_v34, 16  ;;  %v722_v22 = vsel %vm3725_vm4, %v717_v18, %v721_v58  ;;  %v3093_v7 = vcombine.low %v1132_v25, %v1135_v0 }
  0xb5   : > { %v731_v59 = vrot.slane %v729_v13, 5  ;;  %v3094_v14 = vcombine.low %v1139_v53, %v1142_v15  ;;  %v2951_v4 = vrot.slane %v2943_v33, 9  ;;  %v1147_v31 = vrot.slane %v1145_v27, 4 }
  0xb6   : > { %v1148_v39 = vrot.slane %v4414_v38, 5  ;;  %v741_v63 = vrot.slane %v740_v57, 4  ;;  %v751_v43 = vrot.slane %v750_v55, 4  ;;  %v755_v56 = vrot.slane %v753_v23, 5 }
  0xb7   : > { %v732_v6 = vsel %vm3725_vm4, %v727_v52, %v731_v59  ;;  %v1146_v42 = vsel %vm3880_vm7, %v2951_v4, %v1145_v27 }
  0xb8   : > { %v3026_v20 = vcombine.low %v722_v22, %v732_v6  ;;  %v1149_v44 = vsel %vm3880_vm7, %v1147_v31, %v1148_v39  ;;  %v746_v38 = vsel %vm3725_vm4, %v741_v63, %v745_v5  ;;  %v756_v58 = vsel %vm3725_vm4, %v751_v43, %v755_v56 }
  0xb9   : > { %3338 = vmatmul.mubr.msk.bf16.gmra.mrb[4].mxu0 %vm1177_vm3, %v3091_v28  ;;  %v3095_v37 = vcombine.low %v1146_v42, %v1149_v44  ;;  %v3027_v48 = vcombine.low %v746_v38, %v756_v58 }
  0xba   : > { %3256 = vmatmul.mubr.msk.bf16.gmra.mrb[12].mxu1 %vm1177_vm3, %v3010_v26  ;;  %3341 = vmatprep.mubr.msk.bf16.mxu0 %vm1177_vm3, %v3092_v54 }
  0xbb   : > { %3269 = vmatprep.mubr.msk.bf16.mxu1 %vm1177_vm3, %v3024_v1 }
  0xc1   : > { %3342 = vmatmul.mubr.msk.bf16.gmra.mrb[8].mxu0 %vm1177_vm3, %v3093_v7 }
  0xc2   : > { %3270 = vmatmul.mubr.msk.bf16.vlgmr.msra.gmra.mrb[8].mxu1 %vm1177_vm3, %v4480_v17  ;;  %3345 = vmatprep.mubr.msk.bf16.mxu0 %vm1177_vm3, %v3094_v14 }
  0xc3   : > { %3273 = vmatprep.mubr.msk.bf16.mxu1 %vm1177_vm3, %v3026_v20 }
  0xc9   : > { %3346 = vmatmul.mubr.msk.bf16.gmra.mrb[12].mxu0 %vm1177_vm3, %v3095_v37 }
  0xca   : > { %3274 = vmatmul.mubr.msk.bf16.gmra.mrb[12].mxu1 %vm1177_vm3, %v3027_v48 }
 0x175   : > { %v3245_v17 = vpop.f32.mrb[0].mxu1 }
 0x176   : > { %v1720_v36 = vpop.f32.mrb[1].mxu1 }
 0x177   : > { %v3246_v50 = vpop.f32.mrb[2].mxu1 }
 0x178   : > { %v1723_v45 = vpop.f32.mrb[3].mxu1 }
 0x17d   : > { %v3249_v11 = vpop.f32.mrb[4].mxu1 }
 0x17e   : > { %v1736_v49 = vpop.f32.mrb[5].mxu1 }
 0x17f   : > { %v3250_v47 = vpop.f32.mrb[6].mxu1 }
 0x180   : > { %v1739_v32 = vpop.f32.mrb[7].mxu1 }
 0x184   : > { %v3335_v41 = vpop.f32.mrb[0].mxu0 }
 0x185   : > { %v3351_v2 = vadd.f32 %v3335_v41, %v3245_v17  ;;  %v2558_v3 = vpop.f32.mrb[1].mxu0 }
 0x186   : > { %v3352_v29 = vadd.f32 %v2558_v3, %v1720_v36  ;;  %v3336_v8 = vpop.f32.mrb[2].mxu0 }
 0x187   : > { %2639 = vst [vmem:[%s4581_s7 + $0x10] sm:$0xff] %v3351_v2  ;;  %v3353_v60 = vadd.f32 %v3336_v8, %v3246_v50  ;;  %v2561_v21 = vpop.f32.mrb[3].mxu0  ;;  %v2677_v16 = vmul.f32 %v3351_v2, %v3351_v2 }
 0x188   : > { %2637 = vst [vmem:[%s4581_s7] sm:$0xff] %v3352_v29  ;;  %v3354_v30 = vadd.f32 %v2561_v21, %v1723_v45  ;;  %v2675_v9 = vmul.f32 %v3352_v29, %v3352_v29 }
 0x189   : > { %2640 = vst [vmem:[%s4581_s7 + $0x18] sm:$0xff] %v3353_v60  ;;  %v2678_v19 = vmul.f32 %v3353_v60, %v3353_v60 }
 0x18a   : > { %2638 = vst [vmem:[%s4581_s7 + $0x8] sm:$0xff] %v3354_v30  ;;  %v2653_v26 = vadd.f32 %v3354_v30, %v3352_v29  ;;  %v2676_v40 = vmul.f32 %v3354_v30, %v3354_v30 }
 0x18c   : > { %v2654_v62 = vadd.f32 %v3351_v2, %v2653_v26  ;;  %v2691_v13 = vadd.f32 %v2676_v40, %v2675_v9  ;;  %v3339_v46 = vpop.f32.mrb[4].mxu0 }
 0x18d   : > { %v3355_v28 = vadd.f32 %v3339_v46, %v3249_v11  ;;  %v2574_v35 = vpop.f32.mrb[5].mxu0 }
 0x18e   : > { %v2692_v1 = vadd.f32 %v2691_v13, %v2677_v16  ;;  %v3356_v54 = vadd.f32 %v2574_v35, %v1736_v49  ;;  %v2655_v51 = vadd.f32 %v3353_v60, %v2654_v62  ;;  %v3340_v10 = vpop.f32.mrb[6].mxu0 }
 0x18f   : > { %2643 = vst [vmem:[%s4581_s7 + $0x30] sm:$0xff] %v3355_v28  ;;  %v3357_v24 = vadd.f32 %v3340_v10, %v3250_v47  ;;  %v2577_v12 = vpop.f32.mrb[7].mxu0  ;;  %v2681_v57 = vmul.f32 %v3355_v28, %v3355_v28 }
 0x190   : > { %2641 = vst [vmem:[%s4581_s7 + $0x20] sm:$0xff] %v3356_v54  ;;  %v2656_v5 = vadd.f32 %v3356_v54, %v2655_v51  ;;  %v2679_v61 = vmul.f32 %v3356_v54, %v3356_v54  ;;  %v2693_v18 = vadd.f32 %v2692_v1, %v2678_v19  ;;  %v3358_v52 = vadd.f32 %v2577_v12, %v1739_v32 }
 0x191   : > { %2644 = vst [vmem:[%s4581_s7 + $0x38] sm:$0xff] %v3357_v24  ;;  %v2682_v23 = vmul.f32 %v3357_v24, %v3357_v24 }
 0x192   : > { %v2694_v59 = vadd.f32 %v2693_v18, %v2679_v61  ;;  %2642 = vst [vmem:[%s4581_s7 + $0x28] sm:$0xff] %v3358_v52  ;;  %v2657_v25 = vadd.f32 %v3358_v52, %v2656_v5  ;;  %v2680_v0 = vmul.f32 %v3358_v52, %v3358_v52 }
 0x194   : > { %v2658_v27 = vadd.f32 %v3355_v28, %v2657_v25  ;;  %v2695_v53 = vadd.f32 %v2694_v59, %v2680_v0  ;;  %v3343_v15 = vpop.f32.mrb[8].mxu0 }
 0x195   : > { %v3271_v55 = vpop.f32.mrb[8].mxu1  ;;  %v2590_v34 = vpop.f32.mrb[9].mxu0 }
 0x196   : > { %v2696_v33 = vadd.f32 %v2695_v53, %v2681_v57  ;;  %v3359_v22 = vadd.f32 %v3343_v15, %v3271_v55  ;;  %v1918_v6 = vpop.f32.mrb[9].mxu1  ;;  %v2659_v7 = vadd.f32 %v3357_v24, %v2658_v27  ;;  %v3344_v14 = vpop.f32.mrb[10].mxu0 }
 0x197   : > { %v3360_v4 = vadd.f32 %v2590_v34, %v1918_v6  ;;  %v3272_v31 = vpop.f32.mrb[10].mxu1  ;;  %v2593_v39 = vpop.f32.mrb[11].mxu0 }
 0x198   : > { %2647 = vst [vmem:[%s4581_s7 + $0x50] sm:$0xff] %v3359_v22  ;;  %v2697_v20 = vadd.f32 %v2696_v33, %v2682_v23  ;;  %v3361_v63 = vadd.f32 %v3344_v14, %v3272_v31  ;;  %v1921_v43 = vpop.f32.mrb[11].mxu1  ;;  %v2685_v17 = vmul.f32 %v3359_v22, %v3359_v22 }
 0x199   : > { %2645 = vst [vmem:[%s4581_s7 + $0x40] sm:$0xff] %v3360_v4  ;;  %v2660_v56 = vadd.f32 %v3360_v4, %v2659_v7  ;;  %v2683_v42 = vmul.f32 %v3360_v4, %v3360_v4  ;;  %v3362_v44 = vadd.f32 %v2593_v39, %v1921_v43 }
 0x19a   : > { %2648 = vst [vmem:[%s4581_s7 + $0x58] sm:$0xff] %v3361_v63  ;;  %v2686_v41 = vmul.f32 %v3361_v63, %v3361_v63 }
 0x19b   : > { %v2698_v38 = vadd.f32 %v2697_v20, %v2683_v42  ;;  %2646 = vst [vmem:[%s4581_s7 + $0x48] sm:$0xff] %v3362_v44  ;;  %v2661_v58 = vadd.f32 %v3362_v44, %v2660_v56  ;;  %v2684_v37 = vmul.f32 %v3362_v44, %v3362_v44 }
 0x19c   : > { %v3347_v48 = vpop.f32.mrb[12].mxu0 }
 0x19d   : > { %v2662_v36 = vadd.f32 %v3359_v22, %v2661_v58  ;;  %v2699_v50 = vadd.f32 %v2698_v38, %v2684_v37  ;;  %v3275_v45 = vpop.f32.mrb[12].mxu1  ;;  %v2606_v11 = vpop.f32.mrb[13].mxu0 }
 0x19e   : > { %v3363_v49 = vadd.f32 %v3347_v48, %v3275_v45  ;;  %v1934_v47 = vpop.f32.mrb[13].mxu1  ;;  %v3348_v32 = vpop.f32.mrb[14].mxu0 }
 0x19f   : > { %v2700_v2 = vadd.f32 %v2699_v50, %v2685_v17  ;;  %v3364_v3 = vadd.f32 %v2606_v11, %v1934_v47  ;;  %v2663_v29 = vadd.f32 %v3361_v63, %v2662_v36  ;;  %v3276_v8 = vpop.f32.mrb[14].mxu1  ;;  %v2609_v60 = vpop.f32.mrb[15].mxu0 }
 0x1a0   : > { %2651 = vst [vmem:[%s4581_s7 + $0x70] sm:$0xff] %v3363_v49  ;;  %v3365_v21 = vadd.f32 %v3348_v32, %v3276_v8  ;;  %v1937_v30 = vpop.f32.mrb[15].mxu1  ;;  %v2689_v28 = vmul.f32 %v3363_v49, %v3363_v49 }
 0x1a1   : > { %2649 = vst [vmem:[%s4581_s7 + $0x60] sm:$0xff] %v3364_v3  ;;  %v2664_v9 = vadd.f32 %v3364_v3, %v2663_v29  ;;  %v2687_v26 = vmul.f32 %v3364_v3, %v3364_v3  ;;  %v2701_v40 = vadd.f32 %v2700_v2, %v2686_v41  ;;  %v3366_v16 = vadd.f32 %v2609_v60, %v1937_v30 }
 0x1a2   : > { %2652 = vst [vmem:[%s4581_s7 + $0x78] sm:$0xff] %v3365_v21  ;;  %v2690_v1 = vmul.f32 %v3365_v21, %v3365_v21 }
 0x1a3   : > { %v2702_v62 = vadd.f32 %v2701_v40, %v2687_v26  ;;  %2650 = vst [vmem:[%s4581_s7 + $0x68] sm:$0xff] %v3366_v16  ;;  %v2665_v13 = vadd.f32 %v3366_v16, %v2664_v9  ;;  %v2688_v46 = vmul.f32 %v3366_v16, %v3366_v16 }
 0x1a5   : > { %v2666_v35 = vadd.f32 %v3363_v49, %v2665_v13  ;;  %v2703_v19 = vadd.f32 %v2702_v62, %v2688_v46 }
 0x1a7   : > { %v2667_v54 = vadd.f32 %v3365_v21, %v2666_v35  ;;  %v2704_v51 = vadd.f32 %v2703_v19, %v2689_v28 }
 0x1a9   : > { %v2668_v10 = vrot.slane %v2667_v54, 4  ;;  %v2705_v24 = vadd.f32 %v2704_v51, %v2690_v1 }
 0x1ab   : > { %v2669_v12 = vadd.f32 %v2668_v10, %v2667_v54  ;;  %v2706_v5 = vrot.slane %v2705_v24, 4 }
 0x1ad   : > { %v2670_v61 = vrot.slane %v2669_v12, 2  ;;  %v2707_v18 = vadd.f32 %v2706_v5, %v2705_v24 }
 0x1af   : > { %v2671_v52 = vadd.f32 %v2670_v61, %v2669_v12  ;;  %v2708_v59 = vrot.slane %v2707_v18, 2 }
 0x1b1   : > { %v2672_v25 = vrot.slane %v2671_v52, 1  ;;  %v2709_v0 = vadd.f32 %v2708_v59, %v2707_v18 }
 0x1b3   : > { %v2673_v57 = vadd.f32 %v2672_v25, %v2671_v52  ;;  %v2710_v27 = vrot.slane %v2709_v0, 1 }
 0x1b5   : > { %2674 = vst [vmem:[%s228_s19] sm:$0x1] %v2673_v57  ;;  %v2711_v53 = vadd.f32 %v2710_v27, %v2709_v0 }
 0x1b7   : > { %2712 = vst [vmem:[%s228_s19 + $0x1] sm:$0x1] %v2711_v53 }
 0x1b8 PF: > { %s14_s16 = sadd.s32 1, %s3602_s16   ;;  %s4651_s12 = smov %s3594_s14 }
 0x1b9   : > { %p11_p8 = scmp.ge.s32.totalorder %s14_s16, 6   ;;  %s4652_s13 = smov %s3598_s15 }
 0x1ba   : > { %s4653_s14 = smov %s4656_s17  ;;  %s4654_s15 = smov %s4660_s18 }
 0x1bb   :  { %13 = sbr.rel (!%p11_p8) target bundleno = 3 (0x3), region = 80 }

// kernel: double_conv.6
= control target key start
LH: loop header
LB: loop body
LE: loop exit
PB: predicated region body
PF: predicated region fallthrough
CT: control target
= control target key end

     0   :  { %s3502_s12 = smov 0   ;;  %s3504_s13 = smov 0   ;;  %s4622_s0 = inlined_call_operand.vmem [shape: bf16[2,2,10,18,128], index: 0, kind: input, shape index: {}]   ;;  %s4623_s1 = inlined_call_operand.vmem [shape: bf16[9,128,128], index: 1, kind: input, shape index: {}]   ;;  %s4624_s2 = inlined_call_operand.vmem [shape: f32[2,256,128], index: 2, kind: output, shape index: {0}]   ;;  %s4625_s3 = inlined_call_operand.vmem [shape: f32[2,2,2,128], index: 3, kind: output, shape index: {1}]  }
   0x1   :  { %s3506_s14 = smov 0   ;;  %s3508_s15 = smov 0  }
   0x2   :  { %s3510_s16 = smov 0  }
   0x3 LB: > { %s23_s17 = sadd.s32 1, %s3472_s14  ;;  %s26_s18 = sadd.s32 1, %s3476_s15  ;;  %s3480_s16 = sphi %s3510_s16, %s14_s16   ;;  %s3476_s15 = sphi %s3508_s15, %s4636_s15   ;;  %s3472_s14 = sphi %s3506_s14, %s4635_s14   ;;  %s3468_s13 = sphi %s3504_s13, %s4634_s13   ;;  %s3464_s12 = sphi %s3502_s12, %s4633_s12  }
   0x4   : > { %p24_p0 = scmp.ge.s32.totalorder %s23_s17, 2  ;;  %p2743_p1 = scmp.ge.s32.totalorder %s3480_s16, 1 }
   0x5   : > { %p162_p2 = scmp.lt.s32.totalorder %s3480_s16, 5 }
   0x6   : > { %s4638_s17 = smov (%p24_p0, %s23_s17), 0  ;;  %s4640_s18 = smov (!%p24_p0, %s26_s18), %s3476_s15 }
   0x7   : > { %p163_p3 = pnand %p2743_p1, %p162_p2  ;;  %p28_p4 = scmp.ge.s32.totalorder %s4640_s18, 2 }
   0x8   : > { %v3346_v0 = vld [vmem:[%s4623_s1 + $0x40] sm:$0xff] (!%p163_p3)   ;;  %v3350_v4 = vld [vmem:[%s4623_s1 + $0x48] sm:$0xff] (!%p163_p3)   ;;  %v3354_v8 = vld [vmem:[%s4623_s1 + $0x50] sm:$0xff] (!%p163_p3)   ;;  %p202_p5 = scmp.lt.s32.totalorder (!%p163_p3), %s3468_s13, 1  ;;  %p204_p6 = scmp.lt.s32.totalorder (!%p163_p3), %s3464_s12, 1  ;;  %vm481_vm0 = vcmask (!%p163_p3), 1042432  }
   0x9   : > { %s4642_s18 = smov (%p28_p4, %s4640_s18), 0  ;;  %166 = sbr.rel (%p163_p3) target bundleno = 440 (0x1b8), region = 28 }
   0xa   : > { %v3347_v1 = vld [vmem:[%s4623_s1 + $0xc0] sm:$0xff] (!%p163_p3)   ;;  %2984 = vmatprep.subr.bf16.mxu0 (!%p163_p3), %v3346_v0  ;;  %v3351_v5 = vld [vmem:[%s4623_s1 + $0xc8] sm:$0xff] (!%p163_p3)   ;;  %v3355_v9 = vld [vmem:[%s4623_s1 + $0xd0] sm:$0xff] (!%p163_p3)   ;;  %vm254_vm1 = vsmask.f32 (!%p163_p3), 3328  ;;  %vm482_vm3 = vcmask (!%p163_p3), 1046532  }
   0xb   : > { %v3348_v2 = vld [vmem:[%s4623_s1] sm:$0xff] (!%p163_p3)   ;;  %3048 = vmatprep.subr.bf16.mxu1 (!%p163_p3), %v3347_v1  ;;  %v3352_v6 = vld [vmem:[%s4623_s1 + $0x8] sm:$0xff] (!%p163_p3)   ;;  %v3356_v10 = vld [vmem:[%s4623_s1 + $0x10] sm:$0xff] (!%p163_p3)   ;;  %vm255_vm2 = vsmask.f32 (!%p163_p3), 7440 }
   0xc   : > { %v3349_v3 = vld [vmem:[%s4623_s1 + $0x80] sm:$0xff] (!%p163_p3)   ;;  %2985 = vmatpush3.bf16.msra.mxu0 (!%p163_p3), %v3348_v2  ;;  %v3353_v7 = vld [vmem:[%s4623_s1 + $0x88] sm:$0xff] (!%p163_p3)   ;;  %v3357_v11 = vld [vmem:[%s4623_s1 + $0x90] sm:$0xff] (!%p163_p3)  }
   0xd   : > { %3049 = vmatpush3.bf16.msra.mxu1 (!%p163_p3), %v3349_v3  ;;  %2986 = vmatprep.subr.bf16.mxu0 (!%p163_p3), %v3350_v4  ;;  %v3358_v12 = vld [vmem:[%s4623_s1 + $0x58] sm:$0xff] (!%p163_p3)   ;;  %v3362_v16 = vld [vmem:[%s4623_s1 + $0x60] sm:$0xff] (!%p163_p3)   ;;  %v3366_v20 = vld [vmem:[%s4623_s1 + $0x68] sm:$0xff] (!%p163_p3)  }
   0xe   : > { %3050 = vmatprep.subr.bf16.mxu1 (!%p163_p3), %v3351_v5  ;;  %v3359_v13 = vld [vmem:[%s4623_s1 + $0xd8] sm:$0xff] (!%p163_p3)   ;;  %v3363_v17 = vld [vmem:[%s4623_s1 + $0xe0] sm:$0xff] (!%p163_p3)   ;;  %v3367_v21 = vld [vmem:[%s4623_s1 + $0xe8] sm:$0xff] (!%p163_p3)  }
   0xf   : > { %v3360_v14 = vld [vmem:[%s4623_s1 + $0x18] sm:$0xff] (!%p163_p3)   ;;  %v3364_v18 = vld [vmem:[%s4623_s1 + $0x20] sm:$0xff] (!%p163_p3)   ;;  %v3368_v22 = vld [vmem:[%s4623_s1 + $0x28] sm:$0xff] (!%p163_p3)  }
  0x10   : > { %2987 = vmatpush3.bf16.msra.mxu0 %v3352_v6  ;;  %s4644_s13 = smov (!%p202_p5, %s3468_s13), 1  ;;  %v3361_v15 = vld [vmem:[%s4623_s1 + $0x98] sm:$0xff]   ;;  %v3365_v19 = vld [vmem:[%s4623_s1 + $0xa0] sm:$0xff]   ;;  %v3369_v23 = vld [vmem:[%s4623_s1 + $0xa8] sm:$0xff]  }
  0x11   : > { %3051 = vmatpush3.bf16.msra.mxu1 %v3353_v7  ;;  %2988 = vmatprep.subr.bf16.mxu0 %v3354_v8  ;;  %s3590_s4 = scalar_select %p204_p6, %s3464_s12, 1  ;;  %v3370_v24 = vld [vmem:[%s4623_s1 + $0x70] sm:$0xff]   ;;  %v3374_v28 = vld [vmem:[%s4623_s1 + $0x78] sm:$0xff]   ;;  %v3380_v55 = vld [vmem:[%s4623_s1 + $0x140] sm:$0xff]  }
  0x12   : > { %3052 = vmatprep.subr.bf16.mxu1 %v3355_v9  ;;  %s3305_s11 = smul.u32 60, %s4644_s13  ;;  %v3371_v25 = vld [vmem:[%s4623_s1 + $0xf0] sm:$0xff]   ;;  %v3375_v29 = vld [vmem:[%s4623_s1 + $0xf8] sm:$0xff]   ;;  %vm3674_vm4 = vmor %vm254_vm1, %vm255_vm2  ;;  %s2748_s26 = sshll.u32 %s4644_s13, 1 }
  0x13   : > { %s3304_s21 = smul.u32 30, %s3590_s4  ;;  %v3372_v26 = vld [vmem:[%s4623_s1 + $0x30] sm:$0xff]   ;;  %v3376_v30 = vld [vmem:[%s4623_s1 + $0x38] sm:$0xff]   ;;  %vm3684_vm5 = vmor %vm481_vm0, %vm482_vm3  ;;  %s226_s28 = sadd.s32 %s2748_s26, %s3590_s4 }
  0x14   : > { %2989 = vmatpush3.bf16.msra.mxu0 %v3356_v10  ;;  %v3373_v27 = vld [vmem:[%s4623_s1 + $0xb0] sm:$0xff]   ;;  %v3377_v31 = vld [vmem:[%s4623_s1 + $0xb8] sm:$0xff]   ;;  %v3381_v10 = vld [vmem:[%s4623_s1 + $0x100] sm:$0xff]   ;;  %s2749_s29 = sshll.u32 %s226_s28, 1 }
  0x15   : > { %3053 = vmatpush3.bf16.msra.mxu1 %v3357_v11  ;;  %2990 = vmatprep.subr.bf16.mxu0 %v3358_v12  ;;  %s208_s30 = sadd.s32 %s3305_s11, %s3304_s21  ;;  %s2746_s11 = sshll.u32 %s4644_s13, 5 }
  0x16   : > { %3054 = vmatprep.subr.bf16.mxu1 %v3359_v13  ;;  %s2744_s19 = sshll.u32 %s208_s30, 2  ;;  %s228_s6 = scalar_lea.vmem %s4625_s3, %s2749_s29 }
  0x17   : > { %s3639_s27 = scalar_lea.vmem %s4622_s0, %s2744_s19 }
  0x18   : > { %2991 = vmatpush3.bf16.msra.mxu0 %v3360_v14  ;;  %v3648_v32 = vld [vmem:[%s3639_s27] sm:$0xf]  ;;  %v3651_v33 = vld [vmem:[%s3639_s27 + $0x4] sm:$0xf]  ;;  %v3654_v34 = vld [vmem:[%s3639_s27 + $0x8] sm:$0x1] }
  0x19   : > { %3055 = vmatpush3.bf16.msra.mxu1 %v3361_v15  ;;  %2992 = vmatprep.subr.bf16.mxu0 %v3362_v16  ;;  %v258_v35 = vshrl.u32 %v3648_v32, 16  ;;  %v261_v36 = vshll.u32 %v3648_v32, 16  ;;  %v267_v37 = vshll.u32 %v3651_v33, 16  ;;  %v271_v38 = vshrl.u32 %v3651_v33, 16  ;;  %v2758_v40 = vld [vmem:[%s3639_s27 + $0xc] sm:$0xf] }
  0x1a   : > { %3056 = vmatprep.subr.bf16.mxu1 %v3363_v17  ;;  %v277_v39 = vshll.u32 %v3654_v34, 16  ;;  %v3663_v43 = vld [vmem:[%s3639_s27 + $0x10] sm:$0xf]  ;;  %v566_v44 = vshrl.u32 %v2758_v40, 16  ;;  %v569_v45 = vshll.u32 %v2758_v40, 16  ;;  %v489_v48 = vrot.slane %v3654_v34, 5 }
  0x1b   : > { %v260_v41 = vrot.slane %v258_v35, 4  ;;  %v263_v42 = vrot.slane %v261_v36, 5  ;;  %v269_v46 = vrot.slane %v267_v37, 5  ;;  %v273_v47 = vrot.slane %v271_v38, 4  ;;  %v449_v50 = vld [vmem:[%s3639_s27] sm:$0xe] }
  0x1c   : > { %2993 = vmatpush3.bf16.msra.mxu0 %v3364_v18  ;;  %v575_v49 = vshll.u32 %v3663_v43, 16  ;;  %v568_v52 = vrot.slane %v566_v44, 4  ;;  %v571_v53 = vrot.slane %v569_v45, 5  ;;  %v579_v54 = vshrl.u32 %v3663_v43, 16  ;;  %v3692_v6 = vld [vmem:[%s3639_s27 + $0xc] sm:$0xf] }
  0x1d   : > { %3057 = vmatpush3.bf16.msra.mxu1 %v3365_v19  ;;  %2994 = vmatprep.subr.bf16.mxu0 %v3366_v20  ;;  %v264_v51 = vor.u32 %v263_v42, %v260_v41  ;;  %v274_v57 = vor.u32 %v273_v47, %v269_v46  ;;  %v279_v58 = vrot.slane %v277_v39, 5  ;;  %v2862_v60 = vcombine.low %v2758_v40, %v3663_v43  ;;  %v3703_v11 = vld [vmem:[%s3639_s27 + $0x10] sm:$0xf]  ;;  %v3706_v12 = vld [vmem:[%s3639_s27 + $0x14] sm:$0x1]  ;;  %v3389_v34 = vld [vmem:[%s4623_s1 + $0x1c0] sm:$0xff]  }
  0x1e   : > { %3058 = vmatprep.subr.bf16.mxu1 %v3367_v21  ;;  %v3678_v59 = vrot.slane %v575_v49, 5  ;;  %v572_v62 = vor.u32 %v571_v53, %v568_v52  ;;  %v581_v63 = vrot.slane %v579_v54, 4  ;;  %v791_v0 = vrot.slane %v3663_v43, 5  ;;  %v2760_v18 = vld [vmem:[%s3639_s27 + $0x18] sm:$0xf]  ;;  %v3385_v39 = vld [vmem:[%s4623_s1 + $0x108] sm:$0xff]  }
  0x1f   : > { %v265_v61 = vrot.slane %v264_v51, 4  ;;  %v275_v2 = vrot.slane %v274_v57, 4  ;;  %2167 = vmatprep.mubr.bf16.mxu1 %v2862_v60  ;;  %v2838_v3 = vcombine.low %v3648_v32, %v3651_v33  ;;  %v2750_v4 = vrot.slane %v449_v50, 9  ;;  %v3716_v19 = vld [vmem:[%s3639_s27 + $0x1c] sm:$0xf]  ;;  %v3388_v52 = vld [vmem:[%s4623_s1 + $0x150] sm:$0xff]  }
  0x20   : > { %2995 = vmatpush3.bf16.msra.mxu0 %v3368_v22  ;;  %v486_v5 = vrot.slane %v3651_v33, 5  ;;  %v3696_v8 = vrot.slane %v572_v62, 4  ;;  %v582_v9 = vor.u32 %v581_v63, %v3678_v59  ;;  %v282_v13 = vshrl.u32 %v3692_v6, 16  ;;  %v3746_v45 = vld [vmem:[%s3639_s27 + $0x18] sm:$0xf] }
  0x21   : > { %3059 = vmatpush3.bf16.msra.mxu1 %v3369_v23  ;;  %2996 = vmatprep.subr.bf16.mxu0 %v3370_v24  ;;  %v270_v7 = vsel %vm3674_vm4, %v265_v61, %v269_v46  ;;  %v280_v14 = vsel %vm3674_vm4, %v275_v2, %v279_v58  ;;  %v285_v17 = vshll.u32 %v3692_v6, 16  ;;  %v450_v24 = vld [vmem:[%s3639_s27 + $0xc] sm:$0xe]  ;;  %v590_v32 = vshrl.u32 %v2760_v18, 16  ;;  %v3391_v46 = vld [vmem:[%s4623_s1 + $0x180] sm:$0xff]  }
  0x22   : > { %3060 = vmatprep.subr.bf16.mxu1 %v3371_v25  ;;  %v487_v15 = vsel %vm3684_vm5, %v2750_v4, %v486_v5  ;;  %v488_v16 = vrot.slane %v486_v5, 4  ;;  %v2846_v20 = vcombine.low %v270_v7, %v280_v14  ;;  %v578_v21 = vsel %vm3674_vm4, %v3696_v8, %v3678_v59  ;;  %v3754_v51 = vld [vmem:[%s3639_s27 + $0x1c] sm:$0xf]  ;;  %v3771_v2 = vld [vmem:[%s3639_s27 + $0x24] sm:$0xf]  ;;  %v3390_v4 = vld [vmem:[%s4623_s1 + $0x110] sm:$0xff]  }
  0x23   : > { %v3722_v22 = vrot.slane %v582_v9, 4  ;;  %v284_v23 = vrot.slane %v282_v13, 4  ;;  %v593_v33 = vshll.u32 %v2760_v18, 16  ;;  %v603_v38 = vshrl.u32 %v3716_v19, 16 }
  0x24   : > { %2997 = vmatpush3.bf16.msra.mxu0 %v3372_v26  ;;  %v490_v25 = vsel %vm3684_vm5, %v488_v16, %v489_v48  ;;  %v287_v26 = vrot.slane %v285_v17, 5  ;;  %2070 = vmatprep.mubr.bf16.mxu0 %v2846_v20  ;;  %v3740_v41 = vrot.slane %v590_v32, 4  ;;  %v2863_v44 = vcombine.low %v2760_v18, %v3716_v19  ;;  %v3394_v16 = vld [vmem:[%s4623_s1 + $0x158] sm:$0xff]  }
  0x25   : > { %3061 = vmatpush3.bf16.msra.mxu1 %v3373_v27  ;;  %2998 = vmatprep.subr.bf16.mxu0 %v3374_v28  ;;  %v291_v27 = vshll.u32 %v3703_v11, 16  ;;  %v295_v28 = vshrl.u32 %v3703_v11, 16  ;;  %v3742_v42 = vrot.slane %v593_v33, 5  ;;  %v2839_v49 = vcombine.low %v3692_v6, %v3703_v11  ;;  %v3396_v33 = vld [vmem:[%s4623_s1 + $0x118] sm:$0xff]  }
  0x26   : > { %3062 = vmatprep.subr.bf16.mxu1 %v3375_v29  ;;  %v3384_v29 = vld [vmem:[%s4623_s1 + $0x148] sm:$0xff]   ;;  %v288_v35 = vor.u32 %v287_v26, %v284_v23  ;;  %v2751_v50 = vrot.slane %v450_v24, 9  ;;  %v493_v53 = vrot.slane %v3703_v11, 5  ;;  %v496_v54 = vrot.slane %v3706_v12, 5 }
  0x27   : > { %v293_v36 = vrot.slane %v291_v27, 5  ;;  %v297_v37 = vrot.slane %v295_v28, 4  ;;  %v306_v57 = vshrl.u32 %v3746_v45, 16  ;;  %v309_v58 = vshll.u32 %v3746_v45, 16  ;;  %v3395_v11 = vld [vmem:[%s4623_s1 + $0x1c8] sm:$0xff]  }
  0x28   : > { %2999 = vmatpush3.bf16.msra.mxu0 %v3376_v30  ;;  %v2854_v30 = vcombine.low %v487_v15, %v490_v25  ;;  %v289_v47 = vrot.slane %v288_v35, 4  ;;  %v315_v62 = vshll.u32 %v3754_v51, 16  ;;  %v319_v63 = vshrl.u32 %v3754_v51, 16  ;;  %v3397_v24 = vld [vmem:[%s4623_s1 + $0x188] sm:$0xff]  }
  0x29   : > { %3063 = vmatpush3.bf16.msra.mxu1 %v3377_v31  ;;  %3112 = vmatprep.subr.bf16.mxu0 %v3380_v55  ;;  %v301_v31 = vshll.u32 %v3706_v12, 16  ;;  %v298_v48 = vor.u32 %v297_v37, %v293_v36  ;;  %v3762_v55 = vld [vmem:[%s3639_s27 + $0x20] sm:$0x1]  ;;  %v494_v5 = vsel %vm3684_vm5, %v2751_v50, %v493_v53  ;;  %v495_v6 = vrot.slane %v493_v53, 4  ;;  %v3401_v37 = vld [vmem:[%s4623_s1 + $0x1d0] sm:$0xff]  }
  0x2a   : > { %3176 = vmatprep.subr.bf16.mxu1 %v3389_v34  ;;  %v294_v60 = vsel %vm3674_vm4, %v289_v47, %v293_v36  ;;  %v308_v7 = vrot.slane %v306_v57, 4  ;;  %v311_v9 = vrot.slane %v309_v58, 5  ;;  %v317_v13 = vrot.slane %v315_v62, 5  ;;  %v3400_v36 = vld [vmem:[%s4623_s1 + $0x160] sm:$0xff]   ;;  %v3827_v50 = vld [vmem:[%s3639_s27 + $0x2c] sm:$0x1] }
  0x2b   : > { %2071 = vmatmul.mubr.bf16.vlgmr.msra.gmra.mrb[0].mxu0 %v2838_v3  ;;  %v303_v40 = vrot.slane %v301_v31, 5  ;;  %v299_v61 = vrot.slane %v298_v48, 4  ;;  %v3774_v3 = vld [vmem:[%s3639_s27 + $0x28] sm:$0xf]  ;;  %v321_v14 = vrot.slane %v319_v63, 4  ;;  %v325_v15 = vshll.u32 %v3762_v55, 16 }
  0x2c   : > { %2168 = vmatmul.mubr.bf16.vlgmr.msra.gmra.mrb[0].mxu1 %v2854_v30  ;;  %3113 = vmatpush3.bf16.msra.mxu0 %v3381_v10  ;;  %v451_v10 = vld [vmem:[%s3639_s27 + $0x18] sm:$0xe]  ;;  %v497_v18 = vsel %vm3684_vm5, %v495_v6, %v496_v54  ;;  %v312_v20 = vor.u32 %v311_v9, %v308_v7  ;;  %v614_v23 = vshrl.u32 %v3771_v2, 16  ;;  %v617_v28 = vshll.u32 %v3771_v2, 16  ;;  %v3402_v9 = vld [vmem:[%s4623_s1 + $0x120] sm:$0xff]  }
  0x2d   : > { %3114 = vmatprep.subr.bf16.mxu0 %v3384_v29  ;;  %2175 = vmatprep.mubr.bf16.mxu1 %v2863_v44  ;;  %v304_v12 = vsel %vm3674_vm4, %v299_v61, %v303_v40  ;;  %v2855_v25 = vcombine.low %v494_v5, %v497_v18  ;;  %v322_v26 = vor.u32 %v321_v14, %v317_v13  ;;  %v327_v27 = vrot.slane %v325_v15, 5  ;;  %v3836_v61 = vld [vmem:[%s3639_s27 + $0x34] sm:$0xf] }
  0x2e   : > { %3177 = vmatpush3.bf16.msra.mxu1 %v3391_v46  ;;  %v2847_v17 = vcombine.low %v294_v60, %v304_v12  ;;  %v313_v29 = vrot.slane %v312_v20, 4  ;;  %v3798_v30 = vrot.slane %v614_v23, 4  ;;  %v627_v31 = vshrl.u32 %v3774_v3, 16  ;;  %v3817_v46 = vld [vmem:[%s3639_s27 + $0x24] sm:$0xf]  ;;  %v3403_v18 = vld [vmem:[%s4623_s1 + $0x190] sm:$0xff]  }
  0x2f   : > { %3178 = vmatprep.subr.bf16.mxu1 %v3395_v11  ;;  %v2864_v32 = vcombine.low %v3771_v2, %v3774_v3  ;;  %v323_v34 = vrot.slane %v322_v26, 4  ;;  %v2752_v35 = vrot.slane %v451_v10, 9  ;;  %v500_v40 = vrot.slane %v3754_v51, 5  ;;  %v2764_v60 = vld [vmem:[%s3639_s27 + $0x30] sm:$0xf] }
  0x30   : > { %3115 = vmatpush3.bf16.msra.mxu0 %v3385_v39  ;;  %2078 = vmatprep.mubr.bf16.mxu0 %v2847_v17  ;;  %v318_v39 = vsel %vm3674_vm4, %v313_v29, %v317_v13  ;;  %v503_v44 = vrot.slane %v3762_v55, 5  ;;  %v2840_v48 = vcombine.low %v3746_v45, %v3754_v51  ;;  %v333_v53 = vshll.u32 %v3817_v46, 16  ;;  %v452_v2 = vld [vmem:[%s3639_s27 + $0x24] sm:$0xe] }
  0x31   : > { %3116 = vmatprep.subr.bf16.mxu0 %v3388_v52  ;;  %v328_v47 = vsel %vm3674_vm4, %v323_v34, %v327_v27  ;;  %v330_v52 = vshrl.u32 %v3817_v46, 16  ;;  %v501_v55 = vsel %vm3684_vm5, %v2752_v35, %v500_v40  ;;  %v502_v57 = vrot.slane %v500_v40, 4  ;;  %v3406_v34 = vld [vmem:[%s4623_s1 + $0x168] sm:$0xff]  }
  0x32   : > { %3179 = vmatpush3.bf16.msra.mxu1 %v3397_v24  ;;  %v2848_v54 = vcombine.low %v318_v39, %v328_v47  ;;  %v335_v51 = vrot.slane %v333_v53, 5  ;;  %v349_v63 = vshll.u32 %v3827_v50, 16  ;;  %v638_v6 = vshrl.u32 %v2764_v60, 16 }
  0x33   : > { %2079 = vmatmul.mubr.bf16.gmra.mrb[4].mxu0 %v2839_v49  ;;  %v3824_v49 = vld [vmem:[%s3639_s27 + $0x28] sm:$0xf]  ;;  %3180 = vmatprep.subr.bf16.mxu1 %v3401_v37  ;;  %v332_v45 = vrot.slane %v330_v52, 4  ;;  %v641_v7 = vshll.u32 %v2764_v60, 16  ;;  %v3846_v10 = vrot.slane %v617_v28, 5  ;;  %v2865_v17 = vcombine.low %v2764_v60, %v3836_v61 }
  0x34   : > { %3117 = vmatpush3.bf16.msra.mxu0 %v3390_v4  ;;  %2176 = vmatmul.mubr.bf16.gmra.mrb[4].mxu1 %v2855_v25  ;;  %v339_v58 = vshll.u32 %v3824_v49, 16  ;;  %v343_v62 = vshrl.u32 %v3824_v49, 16  ;;  %v504_v4 = vsel %vm3684_vm5, %v502_v57, %v503_v44  ;;  %v351_v14 = vrot.slane %v349_v63, 5  ;;  %v250_v37 = vld [vmem:[%s3639_s27 + $0x38] sm:$0x1]  ;;  %v3408_v52 = vld [vmem:[%s4623_s1 + $0x128] sm:$0xff]  }
  0x35   : > { %2183 = vmatprep.mubr.bf16.mxu1 %v2864_v32  ;;  %3118 = vmatprep.subr.bf16.mxu0 %v3394_v16  ;;  %v2856_v11 = vcombine.low %v501_v55, %v504_v4  ;;  %v336_v12 = vor.u32 %v335_v51, %v332_v45  ;;  %v3848_v15 = vrot.slane %v638_v6, 4  ;;  %v3850_v16 = vrot.slane %v641_v7, 5  ;;  %v3863_v32 = vld [vmem:[%s3639_s27 + $0x30] sm:$0xf]  ;;  %v3407_v44 = vld [vmem:[%s4623_s1 + $0x1d8] sm:$0xff]  }
  0x36   : > { %2086 = vmatprep.mubr.bf16.mxu0 %v2848_v54  ;;  %v341_v5 = vrot.slane %v339_v58, 5  ;;  %v345_v13 = vrot.slane %v343_v62, 4  ;;  %v2753_v24 = vrot.slane %v452_v2, 9  ;;  %v507_v25 = vrot.slane %v3824_v49, 5  ;;  %3181 = vmatpush3.bf16.msra.mxu1 %v3403_v18  ;;  %v3892_v58 = vld [vmem:[%s3639_s27 + $0x40] sm:$0xf] }
  0x37   : > { %v337_v20 = vrot.slane %v336_v12, 4  ;;  %v510_v26 = vrot.slane %v3827_v50, 5  ;;  %v2841_v29 = vcombine.low %v3817_v46, %v3824_v49  ;;  %v354_v39 = vshrl.u32 %v3863_v32, 16  ;;  %v3884_v50 = vld [vmem:[%s3639_s27 + $0x3c] sm:$0xf]  ;;  %3182 = vmatprep.subr.bf16.mxu1 %v3407_v44 }
  0x38   : > { %3119 = vmatpush3.bf16.msra.mxu0 %v3396_v33  ;;  %v346_v23 = vor.u32 %v345_v13, %v341_v5  ;;  %v3866_v33 = vld [vmem:[%s3639_s27 + $0x34] sm:$0xf]  ;;  %v508_v35 = vsel %vm3684_vm5, %v2753_v24, %v507_v25  ;;  %v357_v40 = vshll.u32 %v3863_v32, 16  ;;  %v373_v49 = vshll.u32 %v250_v37, 16  ;;  %v453_v60 = vld [vmem:[%s3639_s27 + $0x30] sm:$0xe] }
  0x39   : > { %3120 = vmatprep.subr.bf16.mxu0 %v3400_v36  ;;  %v342_v27 = vsel %vm3674_vm4, %v337_v20, %v341_v5  ;;  %v509_v36 = vrot.slane %v507_v25, 4  ;;  %v363_v47 = vshll.u32 %v3866_v33, 16  ;;  %v356_v55 = vrot.slane %v354_v39, 4  ;;  %v3409_v2 = vld [vmem:[%s4623_s1 + $0x198] sm:$0xff]   ;;  %v251_v39 = vld [vmem:[%s3639_s27 + $0x44] sm:$0x1] }
  0x3a   : > { %v347_v28 = vrot.slane %v346_v23, 4  ;;  %v359_v57 = vrot.slane %v357_v40, 5  ;;  %v651_v45 = vshrl.u32 %v3836_v61, 16  ;;  %v375_v5 = vrot.slane %v373_v49, 5  ;;  %3183 = vmatpush3.bf16.msra.mxu1 %v3409_v2 }
  0x3b   : > { %2087 = vmatmul.mubr.bf16.gmra.mrb[8].mxu0 %v2840_v48  ;;  %v367_v48 = vshrl.u32 %v3866_v33, 16  ;;  %v511_v54 = vsel %vm3684_vm5, %v509_v36, %v510_v26  ;;  %v365_v62 = vrot.slane %v363_v47, 5  ;;  %v662_v6 = vshrl.u32 %v3884_v50, 16 }
  0x3c   : > { %3121 = vmatpush3.bf16.msra.mxu0 %v3402_v9  ;;  %2184 = vmatmul.mubr.bf16.gmra.mrb[8].mxu1 %v2856_v11  ;;  %v352_v46 = vsel %vm3674_vm4, %v347_v28, %v351_v14  ;;  %v2857_v51 = vcombine.low %v508_v35, %v511_v54  ;;  %v360_v4 = vor.u32 %v359_v57, %v356_v55  ;;  %v665_v7 = vshll.u32 %v3884_v50, 16  ;;  %v3412_v9 = vld [vmem:[%s4623_s1 + $0x170] sm:$0xff]   ;;  %v3413_v14 = vld [vmem:[%s4623_s1 + $0x1e0] sm:$0xff]   ;;  %v454_v55 = vld [vmem:[%s3639_s27 + $0x3c] sm:$0xe] }
  0x3d   : > { %2191 = vmatprep.mubr.bf16.mxu1 %v2865_v17  ;;  %3122 = vmatprep.subr.bf16.mxu0 %v3406_v34  ;;  %v2849_v53 = vcombine.low %v342_v27, %v352_v46  ;;  %v369_v63 = vrot.slane %v367_v48, 4  ;;  %v2866_v12 = vcombine.low %v3884_v50, %v3892_v58  ;;  %v2754_v13 = vrot.slane %v453_v60, 9  ;;  %v3414_v34 = vld [vmem:[%s4623_s1 + $0x130] sm:$0xff]   ;;  %v2768_v50 = vld [vmem:[%s3639_s27 + $0x48] sm:$0xf]  ;;  %v3415_v57 = vld [vmem:[%s4623_s1 + $0x1a0] sm:$0xff]  }
  0x3e   : > { %v361_v17 = vrot.slane %v360_v4, 4  ;;  %v3909_v18 = vrot.slane %v662_v6, 4  ;;  %v675_v20 = vshrl.u32 %v3892_v58, 16  ;;  %v514_v23 = vrot.slane %v3866_v33, 5  ;;  %3184 = vmatprep.subr.bf16.mxu1 %v3413_v14 }
  0x3f   : > { %2094 = vmatprep.mubr.bf16.mxu0 %v2849_v53  ;;  %v370_v11 = vor.u32 %v369_v63, %v365_v62  ;;  %v517_v25 = vrot.slane %v250_v37, 5  ;;  %v2842_v36 = vcombine.low %v3863_v32, %v3866_v33  ;;  %v3928_v37 = vld [vmem:[%s3639_s27 + $0x40] sm:$0xf]  ;;  %v397_v54 = vshll.u32 %v251_v39, 16  ;;  %3185 = vmatpush3.bf16.msra.mxu1 %v3415_v57 }
  0x40   : > { %3123 = vmatpush3.bf16.msra.mxu0 %v3408_v52  ;;  %v366_v26 = vsel %vm3674_vm4, %v361_v17, %v365_v62  ;;  %v515_v27 = vsel %vm3684_vm5, %v2754_v13, %v514_v23  ;;  %v516_v28 = vrot.slane %v514_v23, 4  ;;  %v387_v48 = vshll.u32 %v3928_v37, 16  ;;  %v3939_v52 = vld [vmem:[%s3639_s27 + $0x4c] sm:$0xf] }
  0x41   : > { %3124 = vmatprep.subr.bf16.mxu0 %v3412_v9  ;;  %v371_v24 = vrot.slane %v370_v11, 4  ;;  %v391_v49 = vshrl.u32 %v3928_v37, 16  ;;  %v3945_v60 = vrot.slane %v665_v7, 5  ;;  %v686_v63 = vshrl.u32 %v2768_v50, 16 }
  0x42   : > { %v518_v47 = vsel %vm3684_vm5, %v516_v28, %v517_v25  ;;  %v399_v4 = vrot.slane %v397_v54, 5  ;;  %v2867_v6 = vcombine.low %v2768_v50, %v3939_v52  ;;  %v2755_v13 = vrot.slane %v454_v55, 9 }
  0x43   : > { %2095 = vmatmul.mubr.bf16.gmra.mrb[12].mxu0 %v2841_v29  ;;  %v3918_v29 = vld [vmem:[%s3639_s27 + $0x3c] sm:$0xf]  ;;  %v376_v35 = vsel %vm3674_vm4, %v371_v24, %v375_v5  ;;  %v2858_v32 = vcombine.low %v515_v27, %v518_v47  ;;  %v393_v62 = vrot.slane %v391_v49, 4  ;;  %v689_v5 = vshll.u32 %v2768_v50, 16  ;;  %v3416_v24 = vld [vmem:[%s4623_s1 + $0x1e8] sm:$0xff]  }
  0x44   : > { %2192 = vmatmul.mubr.bf16.gmra.mrb[12].mxu1 %v2857_v51  ;;  %v378_v40 = vshrl.u32 %v3918_v29, 16  ;;  %v381_v44 = vshll.u32 %v3918_v29, 16  ;;  %v2850_v46 = vcombine.low %v366_v26, %v376_v35  ;;  %3125 = vmatpush3.bf16.msra.mxu0 %v3414_v34  ;;  %v389_v51 = vrot.slane %v387_v48, 5  ;;  %v3962_v34 = vld [vmem:[%s3639_s27 + $0x48] sm:$0xf] }
  0x45   : > { %2199 = vmatprep.mubr.bf16.mxu1 %v2866_v12  ;;  %v3948_v11 = vrot.slane %v686_v63, 4  ;;  %v699_v12 = vshrl.u32 %v3939_v52, 16  ;;  %v521_v14 = vrot.slane %v3928_v37, 5  ;;  %v524_v17 = vrot.slane %v251_v39, 5  ;;  %v3965_v35 = vld [vmem:[%s3639_s27 + $0x4c] sm:$0xf]  ;;  %3186 = vmatprep.subr.bf16.mxu1 %v3416_v24 }
  0x46   : > { %v380_v33 = vrot.slane %v378_v40, 4  ;;  %v383_v53 = vrot.slane %v381_v44, 5  ;;  %2102 = vmatprep.mubr.bf16.mxu0 %v2850_v46  ;;  %v394_v9 = vor.u32 %v393_v62, %v389_v51  ;;  %v2843_v26 = vcombine.low %v3918_v29, %v3928_v37  ;;  %v252_v40 = vld [vmem:[%s3639_s27 + $0x50] sm:$0x1]  ;;  %v3420_v46 = vld [vmem:[%s4623_s1 + $0x178] sm:$0xff]  }
  0x47   : > { %v522_v27 = vsel %vm3684_vm5, %v2755_v13, %v521_v14  ;;  %v523_v28 = vrot.slane %v521_v14, 4  ;;  %v402_v29 = vshrl.u32 %v3962_v34, 16  ;;  %v405_v37 = vshll.u32 %v3962_v34, 16  ;;  %3126 = vmatprep.subr.bf16.mxu0 %v3420_v46  ;;  %v3421_v62 = vld [vmem:[%s4623_s1 + $0x1f0] sm:$0xff]   ;;  %v3422_v14 = vld [vmem:[%s4623_s1 + $0x138] sm:$0xff]  }
  0x48   : > { %v384_v2 = vor.u32 %v383_v53, %v380_v33  ;;  %v395_v23 = vrot.slane %v394_v9, 4  ;;  %v411_v44 = vshll.u32 %v3965_v35, 16  ;;  %v415_v49 = vshrl.u32 %v3965_v35, 16  ;;  %v3984_v33 = vld [vmem:[%s3639_s27 + $0x58] sm:$0xf]  ;;  %3127 = vmatpush3.bf16.msra.mxu0 %v3422_v14 }
  0x49   : > { %v525_v48 = vsel %vm3684_vm5, %v523_v28, %v524_v17  ;;  %v421_v50 = vshll.u32 %v252_v40, 16  ;;  %v404_v54 = vrot.slane %v402_v29, 4  ;;  %v407_v55 = vrot.slane %v405_v37, 5  ;;  %v3425_v29 = vld [vmem:[%s4623_s1 + $0x1b8] sm:$0xff]   ;;  %v4106_v24 = vld [vmem:[%s3639_s27 + $0x24] sm:$0xf] }
  0x4a   : > { %v385_v7 = vrot.slane %v384_v2, 4  ;;  %v400_v39 = vsel %vm3674_vm4, %v395_v23, %v399_v4  ;;  %v2859_v53 = vcombine.low %v522_v27, %v525_v48  ;;  %v413_v57 = vrot.slane %v411_v44, 5 }
  0x4b   : > { %2103 = vmatmul.mubr.bf16.gmra.mrb[16].mxu0 %v2842_v36  ;;  %v3417_v36 = vld [vmem:[%s4623_s1 + $0x1a8] sm:$0xff]   ;;  %v3990_v63 = vrot.slane %v689_v5, 5  ;;  %v417_v2 = vrot.slane %v415_v49, 4  ;;  %v423_v4 = vrot.slane %v421_v50, 5  ;;  %v408_v9 = vor.u32 %v407_v55, %v404_v54  ;;  %v253_v54 = vld [vmem:[%s3639_s27 + $0x5c] sm:$0x1] }
  0x4c   : > { %2200 = vmatmul.mubr.bf16.gmra.mrb[16].mxu1 %v2858_v32  ;;  %v390_v25 = vsel %vm3674_vm4, %v385_v7, %v389_v51  ;;  %v2770_v32 = vld [vmem:[%s3639_s27 + $0x54] sm:$0xf]  ;;  %v455_v51 = vld [vmem:[%s3639_s27 + $0x48] sm:$0xe]  ;;  %v528_v27 = vrot.slane %v3965_v35, 5  ;;  %v531_v28 = vrot.slane %v252_v40, 5  ;;  %v2844_v48 = vcombine.low %v3962_v34, %v3965_v35 }
  0x4d   : > { %2207 = vmatprep.mubr.bf16.mxu1 %v2867_v6  ;;  %v2851_v47 = vcombine.low %v390_v25, %v400_v39  ;;  %3187 = vmatpush3.bf16.msra.mxu1 %v3417_v36  ;;  %v710_v6 = vshrl.u32 %v2770_v32, 16  ;;  %v713_v7 = vshll.u32 %v2770_v32, 16  ;;  %v2868_v13 = vcombine.low %v2770_v32, %v3984_v33  ;;  %v3423_v25 = vld [vmem:[%s4623_s1 + $0x1b0] sm:$0xff]   ;;  %v3424_v36 = vld [vmem:[%s4623_s1 + $0x1f8] sm:$0xff]   ;;  %v4035_v34 = vld [vmem:[%s4623_s1 + $0x200] sm:$0xff]  }
  0x4e   : > { %v418_v17 = vor.u32 %v417_v2, %v413_v57  ;;  %v2756_v5 = vrot.slane %v455_v51, 9  ;;  %3188 = vmatprep.subr.bf16.mxu1 %v3421_v62  ;;  %v530_v46 = vrot.slane %v528_v27, 4  ;;  %v4022_v32 = vld [vmem:[%s3639_s27 + $0x54] sm:$0xf]  ;;  %v2772_v2 = vld [vmem:[%s3639_s27 + $0x60] sm:$0xf]  ;;  %3256 = vmatprep.subr.bf16.mxu0 %v4035_v34 }
  0x4f   : > { %2110 = vmatprep.mubr.bf16.mxu0 %v2851_v47  ;;  %v3996_v23 = vrot.slane %v710_v6, 4  ;;  %v4011_v44 = vrot.slane %v713_v7, 5  ;;  %v429_v51 = vshll.u32 %v4022_v32, 16  ;;  %v4039_v6 = vld [vmem:[%s3639_s27 + $0x64] sm:$0xf]  ;;  %v737_v7 = vshll.u32 %v2772_v2, 16 }
  0x50   : > { %v419_v39 = vrot.slane %v418_v17, 4  ;;  %v529_v40 = vsel %vm3684_vm5, %v2756_v5, %v528_v27  ;;  %v532_v50 = vsel %vm3684_vm5, %v530_v46, %v531_v28  ;;  %v456_v5 = vld [vmem:[%s3639_s27 + $0x54] sm:$0xe]  ;;  %v898_v8 = vshll.u32 %v4106_v24, 16 }
  0x51   : > { %3189 = vmatpush3.bf16.msra.mxu1 %v3423_v25  ;;  %v2860_v55 = vcombine.low %v529_v40, %v532_v50  ;;  %v431_v14 = vrot.slane %v429_v51, 5  ;;  %v793_v25 = vrot.slane %v791_v0, 4  ;;  %v2757_v40 = vrot.slane %v456_v5, 9 }
  0x52   : > { %3190 = vmatprep.subr.bf16.mxu1 %v3424_v36  ;;  %v424_v47 = vsel %vm3674_vm4, %v419_v39, %v423_v4  ;;  %v445_v4 = vshll.u32 %v253_v54, 16  ;;  %v798_v50 = vrot.slane %v3716_v19, 5  ;;  %v4084_v36 = vld [vmem:[%s3639_s27 + $0x1c] sm:$0xf] }
  0x53   : > { %2111 = vmatmul.mubr.bf16.gmra.mrb[20].mxu0 %v2843_v26  ;;  %v409_v26 = vrot.slane %v408_v9, 4  ;;  %v734_v9 = vshrl.u32 %v2772_v2, 16 }
  0x54   : > { %2208 = vmatmul.mubr.bf16.gmra.mrb[20].mxu1 %v2859_v53  ;;  %v4025_v53 = vld [vmem:[%s3639_s27 + $0x58] sm:$0xf]  ;;  %v447_v27 = vrot.slane %v445_v4, 5  ;;  %v668_v4 = vor.u32 %v3945_v60, %v3909_v18  ;;  %v677_v18 = vrot.slane %v675_v20, 4 }
  0x55   : > { %2215 = vmatprep.mubr.bf16.mxu1 %v2868_v13  ;;  %v414_v37 = vsel %vm3674_vm4, %v409_v26, %v413_v57  ;;  %v426_v57 = vshrl.u32 %v4022_v32, 16  ;;  %v435_v62 = vshll.u32 %v4025_v53, 16  ;;  %3191 = vmatpush3.bf16.msra.mxu1 %v3425_v29  ;;  %v439_v35 = vshrl.u32 %v4025_v53, 16  ;;  %v4308_v20 = vld [vmem:[%s3639_s27 + $0x58] sm:$0xf] }
  0x56   : > { %v2852_v49 = vcombine.low %v414_v37, %v424_v47  ;;  %v4044_v28 = vrot.slane %v734_v9, 4  ;;  %3288 = vmatprep.subr.bf16.mxu1 %v4035_v34  ;;  %v4049_v29 = vrot.slane %v737_v7, 5  ;;  %v2869_v37 = vcombine.low %v2772_v2, %v4039_v6 }
  0x57   : > { %v428_v13 = vrot.slane %v426_v57, 4  ;;  %v437_v17 = vrot.slane %v435_v62, 5  ;;  %v441_v26 = vrot.slane %v439_v35, 4  ;;  %v535_v47 = vrot.slane %v4025_v53, 5 }
  0x58   : > { %2118 = vmatprep.mubr.bf16.mxu0 %v2852_v49  ;;  %v620_v57 = vor.u32 %v3846_v10, %v3798_v30  ;;  %v692_v9 = vor.u32 %v3990_v63, %v3948_v11  ;;  %v716_v7 = vor.u32 %v4011_v44, %v3996_v23  ;;  %v629_v30 = vrot.slane %v627_v31, 4  ;;  %v4343_v63 = vld [vmem:[%s3639_s27 + $0x60] sm:$0xf] }
  0x59   : > { %v432_v39 = vor.u32 %v431_v14, %v428_v13  ;;  %v442_v46 = vor.u32 %v441_v26, %v437_v17  ;;  %v536_v62 = vsel %vm3684_vm5, %v2757_v40, %v535_v47  ;;  %v537_v2 = vrot.slane %v535_v47, 4  ;;  %v2782_v26 = vld [vmem:[%s3639_s27 + $0xc] sm:$0xe] }
  0x5a   : > { %v2845_v14 = vcombine.low %v4022_v32, %v4025_v53  ;;  %v840_v23 = vrot.slane %v4039_v6, 5 }
  0x5b   : > { %2119 = vmatmul.mubr.bf16.gmra.mrb[24].mxu0 %v2844_v48  ;;  %v538_v48 = vrot.slane %v253_v54, 5  ;;  %v433_v49 = vrot.slane %v432_v39, 4  ;;  %v443_v51 = vrot.slane %v442_v46, 4  ;;  %v644_v54 = vor.u32 %v3850_v16, %v3848_v15  ;;  %v4079_v39 = vld [vmem:[%s3639_s27 + $0x18] sm:$0xf] }
  0x5c   : > { %2216 = vmatmul.mubr.bf16.gmra.mrb[24].mxu1 %v2860_v55  ;;  %v596_v55 = vor.u32 %v3742_v42, %v3740_v41  ;;  %v871_v53 = vshrl.u32 %v4079_v39, 16  ;;  %v4249_v15 = vld [vmem:[%s3639_s27 + $0x44] sm:$0x1]  ;;  %v4252_v16 = vld [vmem:[%s3639_s27 + $0x48] sm:$0xf] }
  0x5d   : > { %2223 = vmatprep.mubr.bf16.mxu1 %v2869_v37  ;;  %v438_v35 = vsel %vm3674_vm4, %v433_v49, %v437_v17  ;;  %v448_v13 = vsel %vm3674_vm4, %v443_v51, %v447_v27  ;;  %v539_v5 = vsel %vm3684_vm5, %v537_v2, %v538_v48  ;;  %v2774_v17 = vld [vmem:[%s3639_s27 + $0x14] sm:$0x1]  ;;  %v2790_v49 = vrot.slane %v2782_v26, 9  ;;  %v4087_v27 = vld [vmem:[%s3639_s27 + $0x20] sm:$0x1] }
  0x5e   : > { %v2853_v40 = vcombine.low %v438_v35, %v448_v13  ;;  %v2861_v46 = vcombine.low %v536_v62, %v539_v5  ;;  %v585_v47 = vshll.u32 %v2774_v17, 16  ;;  %v794_v32 = vrot.slane %v2774_v17, 5 }
  0x5f   : > { %v874_v48 = vshll.u32 %v4079_v39, 16  ;;  %v880_v51 = vshll.u32 %v4084_v36, 16  ;;  %v792_v62 = vsel %vm3684_vm5, %v2790_v49, %v791_v0  ;;  %v884_v35 = vshrl.u32 %v4084_v36, 16  ;;  %v2783_v49 = vld [vmem:[%s3639_s27 + $0x18] sm:$0xe] }
  0x60   : > { %2126 = vmatprep.mubr.bf16.mxu0 %v2853_v40  ;;  %v587_v2 = vrot.slane %v585_v47, 5  ;;  %v890_v13 = vshll.u32 %v4087_v27, 16  ;;  %v795_v5 = vsel %vm3684_vm5, %v793_v25, %v794_v32  ;;  %v873_v17 = vrot.slane %v871_v53, 4 }
  0x61   : > { %v876_v26 = vrot.slane %v874_v48, 5  ;;  %v882_v40 = vrot.slane %v880_v51, 5  ;;  %v2878_v47 = vcombine.low %v792_v62, %v795_v5  ;;  %v886_v37 = vrot.slane %v884_v35, 4  ;;  %v4116_v48 = vld [vmem:[%s3639_s27 + $0x28] sm:$0xf] }
  0x62   : > { %v892_v43 = vrot.slane %v890_v13, 5  ;;  %v588_v0 = vsel %vm3674_vm4, %v3722_v22, %v587_v2  ;;  %v2886_v32 = vcombine.low %v4079_v39, %v4084_v36  ;;  %v2791_v53 = vrot.slane %v2783_v49, 9  ;;  %v4119_v51 = vld [vmem:[%s3639_s27 + $0x2c] sm:$0x1] }
  0x63   : > { %2127 = vmatmul.mubr.bf16.gmra.mrb[28].mxu0 %v2845_v14  ;;  %v877_v14 = vor.u32 %v876_v26, %v873_v17  ;;  %v2870_v25 = vcombine.low %v578_v21, %v588_v0  ;;  %v887_v22 = vor.u32 %v886_v37, %v882_v40  ;;  %v800_v2 = vrot.slane %v798_v50, 4 }
  0x64   : > { %2224 = vmatmul.mubr.bf16.gmra.mrb[28].mxu1 %v2861_v46  ;;  %v2775_v46 = vld [vmem:[%s3639_s27 + $0x20] sm:$0x1]  ;;  %2264 = vmatprep.mubr.bf16.mxu0 %v2878_v47  ;;  %v895_v35 = vshrl.u32 %v4106_v24, 16  ;;  %v799_v59 = vsel %vm3684_vm5, %v2791_v53, %v798_v50  ;;  %v904_v21 = vshll.u32 %v4116_v48, 16  ;;  %v908_v37 = vshrl.u32 %v4116_v48, 16  ;;  %v3429_v50 = vld [vmem:[%s4623_s1 + $0x208] sm:$0xff]  }
  0x65   : > { %v801_v62 = vrot.slane %v2775_v46, 5  ;;  %v878_v13 = vrot.slane %v877_v14, 4  ;;  %v888_v39 = vrot.slane %v887_v22, 4  ;;  %v900_v0 = vrot.slane %v898_v8, 5  ;;  %v4135_v14 = vld [vmem:[%s3639_s27 + $0x2c] sm:$0x1] }
  0x66   : > { %v897_v17 = vrot.slane %v895_v35, 4  ;;  %v906_v49 = vrot.slane %v904_v21, 5  ;;  %v910_v22 = vrot.slane %v908_v37, 4  ;;  %v2784_v35 = vld [vmem:[%s3639_s27 + $0x24] sm:$0xe]  ;;  %v599_v8 = vshll.u32 %v3716_v19, 16 }
  0x67   : > { %v802_v5 = vsel %vm3684_vm5, %v800_v2, %v801_v62  ;;  %v883_v26 = vsel %vm3674_vm4, %v878_v13, %v882_v40  ;;  %v893_v53 = vsel %vm3674_vm4, %v888_v39, %v892_v43  ;;  %v914_v2 = vshll.u32 %v4119_v51, 16  ;;  %v4147_v21 = vld [vmem:[%s3639_s27 + $0x30] sm:$0xf] }
  0x68   : > { %v2879_v47 = vcombine.low %v799_v59, %v802_v5  ;;  %v1106_v62 = vrot.slane %v4119_v51, 5  ;;  %v2894_v40 = vcombine.low %v883_v26, %v893_v53  ;;  %v901_v13 = vor.u32 %v900_v0, %v897_v17 }
  0x69   : > { %v597_v59 = vrot.slane %v596_v55, 4  ;;  %v911_v43 = vor.u32 %v910_v22, %v906_v49  ;;  %v916_v39 = vrot.slane %v914_v2, 5  ;;  %v605_v5 = vrot.slane %v603_v38, 4  ;;  %v3431_v55 = vld [vmem:[%s4623_s1 + $0x210] sm:$0xff]   ;;  %v4167_v22 = vld [vmem:[%s3639_s27 + $0x38] sm:$0x1] }
  0x6a   : > { %v609_v37 = vshll.u32 %v2775_v46, 16  ;;  %2361 = vmatprep.mubr.bf16.mxu1 %v2894_v40  ;;  %v601_v17 = vrot.slane %v599_v8, 5  ;;  %v2887_v41 = vcombine.low %v4106_v24, %v4116_v48  ;;  %v2792_v42 = vrot.slane %v2784_v35, 9  ;;  %v4160_v46 = vld [vmem:[%s3639_s27 + $0x34] sm:$0xf] }
  0x6b   : > { %2265 = vmatmul.mubr.bf16.vlgmr.msra.gmra.mrb[32].mxu0 %v2870_v25  ;;  %v902_v25 = vrot.slane %v901_v13, 4  ;;  %v912_v26 = vrot.slane %v911_v43, 4  ;;  %v805_v19 = vrot.slane %v3774_v3, 5  ;;  %v808_v38 = vrot.slane %v4135_v14, 5 }
  0x6c   : > { %3257 = vmatpush3.bf16.msra.mxu0 %v4035_v34  ;;  %2272 = vmatprep.mubr.bf16.mxu0 %v2879_v47  ;;  %v611_v47 = vrot.slane %v609_v37, 5  ;;  %v602_v24 = vsel %vm3674_vm4, %v597_v59, %v601_v17  ;;  %v606_v53 = vor.u32 %v605_v5, %v601_v17  ;;  %v919_v2 = vshrl.u32 %v4147_v21, 16 }
  0x6d   : > { %3258 = vmatprep.subr.bf16.mxu0 %v3429_v50  ;;  %2362 = vmatmul.mubr.bf16.vlgmr.msra.gmra.mrb[32].mxu1 %v2886_v32  ;;  %v907_v0 = vsel %vm3674_vm4, %v902_v25, %v906_v49  ;;  %v917_v32 = vsel %vm3674_vm4, %v912_v26, %v916_v39  ;;  %v806_v35 = vsel %vm3684_vm5, %v2792_v42, %v805_v19  ;;  %v807_v40 = vrot.slane %v805_v19, 4 }
  0x6e   : > { %3296 = vmatpush3.bf16.msra.mxu1 %v4035_v34  ;;  %v922_v49 = vshll.u32 %v4147_v21, 16  ;;  %v2895_v13 = vcombine.low %v907_v0, %v917_v32  ;;  %v607_v59 = vrot.slane %v606_v53, 4  ;;  %v921_v8 = vrot.slane %v919_v2, 4  ;;  %v3433_v34 = vld [vmem:[%s4623_s1 + $0x218] sm:$0xff]   ;;  %v2785_v0 = vld [vmem:[%s3639_s27 + $0x30] sm:$0xe] }
  0x6f   : > { %3289 = vmatprep.subr.bf16.mxu1 %v3429_v50  ;;  %v928_v43 = vshll.u32 %v4160_v46, 16  ;;  %v809_v39 = vsel %vm3684_vm5, %v807_v40, %v808_v38  ;;  %v932_v37 = vshrl.u32 %v4160_v46, 16  ;;  %v938_v25 = vshll.u32 %v4167_v22, 16  ;;  %v4193_v40 = vld [vmem:[%s3639_s27 + $0x38] sm:$0x1] }
  0x70   : > { %3259 = vmatpush3.bf16.msra.mxu0 %v3429_v50  ;;  %v924_v5 = vrot.slane %v922_v49, 5  ;;  %2369 = vmatprep.mubr.bf16.mxu1 %v2895_v13  ;;  %v612_v17 = vsel %vm3674_vm4, %v607_v59, %v611_v47  ;;  %v2880_v42 = vcombine.low %v806_v35, %v809_v39  ;;  %v4189_v19 = vrot.slane %v620_v57, 4  ;;  %v4196_v49 = vld [vmem:[%s3639_s27 + $0x3c] sm:$0xf] }
  0x71   : > { %3260 = vmatprep.subr.bf16.mxu0 %v3431_v55  ;;  %v930_v26 = vrot.slane %v928_v43, 5  ;;  %v2871_v38 = vcombine.low %v602_v24, %v612_v17  ;;  %v934_v2 = vrot.slane %v932_v37, 4  ;;  %v940_v32 = vrot.slane %v938_v25, 5  ;;  %v4221_v17 = vld [vmem:[%s3639_s27 + $0x44] sm:$0x1] }
  0x72   : > { %3297 = vmatpush3.bf16.msra.mxu1 %v3429_v50  ;;  %v925_v53 = vor.u32 %v924_v5, %v921_v8  ;;  %v623_v47 = vshll.u32 %v3774_v3, 16  ;;  %v633_v10 = vshll.u32 %v4135_v14, 16  ;;  %v2888_v57 = vcombine.low %v4147_v21, %v4160_v46  ;;  %v3435_v50 = vld [vmem:[%s4623_s1 + $0x220] sm:$0xff]  }
  0x73   : > { %3290 = vmatprep.subr.bf16.mxu1 %v3431_v55  ;;  %2273 = vmatmul.mubr.bf16.gmra.mrb[36].mxu0 %v2871_v38  ;;  %v935_v35 = vor.u32 %v934_v2, %v930_v26  ;;  %v2793_v13 = vrot.slane %v2785_v0, 9  ;;  %v812_v59 = vrot.slane %v3836_v61, 5  ;;  %v815_v14 = vrot.slane %v4193_v40, 5  ;;  %v4210_v8 = vld [vmem:[%s3639_s27 + $0x40] sm:$0xf] }
  0x74   : > { %3261 = vmatpush3.bf16.msra.mxu0 %v3431_v55  ;;  %v926_v24 = vrot.slane %v925_v53, 4  ;;  %2280 = vmatprep.mubr.bf16.mxu0 %v2880_v42  ;;  %v625_v3 = vrot.slane %v623_v47, 5  ;;  %v635_v31 = vrot.slane %v633_v10, 5  ;;  %v943_v21 = vshrl.u32 %v4196_v49, 16 }
  0x75   : > { %3262 = vmatprep.subr.bf16.mxu0 %v3433_v34  ;;  %2370 = vmatmul.mubr.bf16.gmra.mrb[36].mxu1 %v2887_v41  ;;  %v936_v41 = vrot.slane %v935_v35, 4  ;;  %v813_v39 = vsel %vm3684_vm5, %v2793_v13, %v812_v59  ;;  %v814_v5 = vrot.slane %v812_v59, 4  ;;  %v956_v53 = vshrl.u32 %v4210_v8, 16  ;;  %v2786_v59 = vld [vmem:[%s3639_s27 + $0x3c] sm:$0xe] }
  0x76   : > { %3298 = vmatpush3.bf16.msra.mxu1 %v3431_v55  ;;  %v931_v43 = vsel %vm3674_vm4, %v926_v24, %v930_v26  ;;  %v626_v37 = vsel %vm3674_vm4, %v4189_v19, %v625_v3  ;;  %v630_v25 = vor.u32 %v629_v30, %v625_v3  ;;  %v945_v42 = vrot.slane %v943_v21, 4  ;;  %v3437_v26 = vld [vmem:[%s4623_s1 + $0x228] sm:$0xff]   ;;  %v4241_v3 = vld [vmem:[%s4623_s1 + $0x230] sm:$0xff]  }
  0x77   : > { %3291 = vmatprep.subr.bf16.mxu1 %v3433_v34  ;;  %v946_v55 = vshll.u32 %v4196_v49, 16  ;;  %v941_v0 = vsel %vm3674_vm4, %v936_v41, %v940_v32  ;;  %v816_v38 = vsel %vm3684_vm5, %v814_v5, %v815_v14  ;;  %v952_v19 = vshll.u32 %v4210_v8, 16 }
  0x78   : > { %3263 = vmatpush3.bf16.msra.mxu0 %v3433_v34  ;;  %v2896_v2 = vcombine.low %v931_v43, %v941_v0  ;;  %v631_v47 = vrot.slane %v630_v25, 4  ;;  %v2881_v30 = vcombine.low %v813_v39, %v816_v38  ;;  %v958_v35 = vrot.slane %v956_v53, 4 }
  0x79   : > { %3264 = vmatprep.subr.bf16.mxu0 %v3435_v50  ;;  %v948_v10 = vrot.slane %v946_v55, 5  ;;  %v954_v24 = vrot.slane %v952_v19, 5  ;;  %v962_v13 = vshll.u32 %v4221_v17, 16  ;;  %v645_v32 = vrot.slane %v644_v54, 4  ;;  %v4267_v19 = vld [vmem:[%s3639_s27 + $0x50] sm:$0x1] }
  0x7a   : > { %3299 = vmatpush3.bf16.msra.mxu1 %v3433_v34  ;;  %2377 = vmatprep.mubr.bf16.mxu1 %v2896_v2  ;;  %v636_v34 = vsel %vm3674_vm4, %v631_v47, %v635_v31  ;;  %v647_v21 = vshll.u32 %v3836_v61, 16  ;;  %v653_v43 = vrot.slane %v651_v45, 4  ;;  %v657_v5 = vshll.u32 %v4193_v40, 16 }
  0x7b   : > { %3292 = vmatprep.subr.bf16.mxu1 %v3435_v50  ;;  %v949_v14 = vor.u32 %v948_v10, %v945_v42  ;;  %v2872_v54 = vcombine.low %v626_v37, %v636_v34  ;;  %v959_v41 = vor.u32 %v958_v35, %v954_v24  ;;  %v964_v39 = vrot.slane %v962_v13, 5  ;;  %v3441_v10 = vld [vmem:[%s4623_s1 + $0x238] sm:$0xff]  }
  0x7c   : > { %3265 = vmatpush3.bf16.msra.mxu0 %v3435_v50  ;;  %v649_v31 = vrot.slane %v647_v21, 5  ;;  %v2889_v42 = vcombine.low %v4196_v49, %v4210_v8  ;;  %v2794_v61 = vrot.slane %v2786_v59, 9  ;;  %v659_v55 = vrot.slane %v657_v5, 5 }
  0x7d   : > { %3266 = vmatprep.subr.bf16.mxu0 %v3437_v26  ;;  %2378 = vmatmul.mubr.bf16.gmra.mrb[40].mxu1 %v2888_v57  ;;  %v950_v25 = vrot.slane %v949_v14, 4  ;;  %v960_v45 = vrot.slane %v959_v41, 4  ;;  %v819_v0 = vrot.slane %v3892_v58, 5  ;;  %v822_v37 = vrot.slane %v4249_v15, 5  ;;  %v4260_v57 = vld [vmem:[%s3639_s27 + $0x4c] sm:$0xf] }
  0x7e   : > { %3300 = vmatpush3.bf16.msra.mxu1 %v3435_v50  ;;  %2281 = vmatmul.mubr.bf16.gmra.mrb[40].mxu0 %v2872_v54  ;;  %v650_v38 = vsel %vm3674_vm4, %v645_v32, %v649_v31  ;;  %v654_v49 = vor.u32 %v653_v43, %v649_v31  ;;  %v967_v50 = vshrl.u32 %v4252_v16, 16  ;;  %v976_v32 = vshll.u32 %v4260_v57, 16 }
  0x7f   : > { %3293 = vmatprep.subr.bf16.mxu1 %v3437_v26  ;;  %2288 = vmatprep.mubr.bf16.mxu0 %v2881_v30  ;;  %v955_v40 = vsel %vm3674_vm4, %v950_v25, %v954_v24  ;;  %v965_v53 = vsel %vm3674_vm4, %v960_v45, %v964_v39  ;;  %v820_v2 = vsel %vm3684_vm5, %v2794_v61, %v819_v0  ;;  %v821_v47 = vrot.slane %v819_v0, 4  ;;  %v2787_v39 = vld [vmem:[%s3639_s27 + $0x48] sm:$0xe]  ;;  %v4293_v45 = vld [vmem:[%s3639_s27 + $0x50] sm:$0x1] }
  0x80   : > { %3267 = vmatpush3.bf16.msra.mxu0 %v3437_v26  ;;  %v970_v30 = vshll.u32 %v4252_v16, 16  ;;  %v2897_v24 = vcombine.low %v955_v40, %v965_v53  ;;  %v655_v35 = vrot.slane %v654_v49, 4  ;;  %v969_v13 = vrot.slane %v967_v50, 4  ;;  %v4296_v0 = vld [vmem:[%s3639_s27 + $0x54] sm:$0xf] }
  0x81   : > { %3268 = vmatprep.subr.bf16.mxu0 %v4241_v3  ;;  %v823_v59 = vsel %vm3684_vm5, %v821_v47, %v822_v37  ;;  %v980_v14 = vshrl.u32 %v4260_v57, 16  ;;  %v986_v21 = vshll.u32 %v4267_v19, 16  ;;  %v978_v41 = vrot.slane %v976_v32, 5 }
  0x82   : > { %3301 = vmatpush3.bf16.msra.mxu1 %v3437_v26  ;;  %v972_v34 = vrot.slane %v970_v30, 5  ;;  %2385 = vmatprep.mubr.bf16.mxu1 %v2897_v24  ;;  %v660_v43 = vsel %vm3674_vm4, %v655_v35, %v659_v55  ;;  %v2882_v54 = vcombine.low %v820_v2, %v823_v59  ;;  %v669_v26 = vrot.slane %v668_v4, 4  ;;  %v4318_v24 = vld [vmem:[%s3639_s27 + $0x5c] sm:$0x1] }
  0x83   : > { %3294 = vmatprep.subr.bf16.mxu1 %v4241_v3  ;;  %v2873_v5 = vcombine.low %v650_v38, %v660_v43  ;;  %v982_v31 = vrot.slane %v980_v14, 4  ;;  %v988_v61 = vrot.slane %v986_v21, 5  ;;  %v671_v55 = vshll.u32 %v3892_v58, 16 }
  0x84   : > { %3269 = vmatpush3.bf16.msra.mxu0 %v4241_v3  ;;  %v973_v25 = vor.u32 %v972_v34, %v969_v13  ;;  %v681_v60 = vshll.u32 %v4249_v15, 16  ;;  %v2890_v4 = vcombine.low %v4252_v16, %v4260_v57  ;;  %v2795_v40 = vrot.slane %v2787_v39, 9 }
  0x85   : > { %2386 = vmatmul.mubr.bf16.gmra.mrb[44].mxu1 %v2889_v42  ;;  %3270 = vmatprep.subr.bf16.mxu0 %v3441_v10  ;;  %v983_v37 = vor.u32 %v982_v31, %v978_v41  ;;  %v826_v38 = vrot.slane %v3939_v52, 5  ;;  %v673_v49 = vrot.slane %v671_v55, 5  ;;  %v829_v58 = vrot.slane %v4293_v45, 5 }
  0x86   : > { %3302 = vmatpush3.bf16.msra.mxu1 %v4241_v3  ;;  %2289 = vmatmul.mubr.bf16.gmra.mrb[44].mxu0 %v2873_v5  ;;  %v974_v42 = vrot.slane %v973_v25, 4  ;;  %v683_v50 = vrot.slane %v681_v60, 5  ;;  %v991_v15 = vshrl.u32 %v4296_v0, 16  ;;  %v994_v13 = vshll.u32 %v4296_v0, 16  ;;  %v2788_v60 = vld [vmem:[%s3639_s27 + $0x54] sm:$0xe] }
  0x87   : > { %3295 = vmatprep.subr.bf16.mxu1 %v3441_v10  ;;  %2296 = vmatprep.mubr.bf16.mxu0 %v2882_v54  ;;  %v984_v16 = vrot.slane %v983_v37, 4  ;;  %v827_v53 = vsel %vm3684_vm5, %v2795_v40, %v826_v38  ;;  %v828_v2 = vrot.slane %v826_v38, 4  ;;  %v674_v47 = vsel %vm3674_vm4, %v669_v26, %v673_v49 }
  0x88   : > { %3271 = vmatpush3.bf16.msra.mxu0 %v3441_v10  ;;  %v979_v3 = vsel %vm3674_vm4, %v974_v42, %v978_v41  ;;  %v678_v30 = vor.u32 %v677_v18, %v673_v49  ;;  %v993_v35 = vrot.slane %v991_v15, 4  ;;  %v1000_v34 = vshll.u32 %v4308_v20, 16  ;;  %v2780_v18 = vld [vmem:[%s3639_s27 + $0x5c] sm:$0x1] }
  0x89   : > { %v989_v32 = vsel %vm3674_vm4, %v984_v16, %v988_v61  ;;  %v830_v59 = vsel %vm3684_vm5, %v828_v2, %v829_v58  ;;  %v1004_v14 = vshrl.u32 %v4308_v20, 16  ;;  %v996_v41 = vrot.slane %v994_v13, 5  ;;  %v4347_v16 = vld [vmem:[%s3639_s27 + $0x64] sm:$0xf] }
  0x8a   : > { %3303 = vmatpush3.bf16.msra.mxu1 %v3441_v10  ;;  %v2898_v21 = vcombine.low %v979_v3, %v989_v32  ;;  %v679_v43 = vrot.slane %v678_v30, 4  ;;  %v2883_v54 = vcombine.low %v827_v53, %v830_v59  ;;  %v1002_v26 = vrot.slane %v1000_v34, 5 }
  0x8b   : > { %v1006_v39 = vrot.slane %v1004_v14, 4  ;;  %v1010_v10 = vshll.u32 %v4318_v24, 16  ;;  %v1134_v5 = vrot.slane %v4318_v24, 5  ;;  %v997_v31 = vor.u32 %v996_v41, %v993_v35 }
  0x8c   : > { %2393 = vmatprep.mubr.bf16.mxu1 %v2898_v21  ;;  %v684_v25 = vsel %vm3674_vm4, %v679_v43, %v683_v50  ;;  %v693_v61 = vrot.slane %v692_v9, 4  ;;  %v695_v55 = vshll.u32 %v3939_v52, 16  ;;  %v701_v38 = vrot.slane %v699_v12, 4 }
  0x8d   : > { %v2874_v42 = vcombine.low %v674_v47, %v684_v25  ;;  %2394 = vmatmul.mubr.bf16.gmra.mrb[48].mxu1 %v2890_v4  ;;  %v1007_v37 = vor.u32 %v1006_v39, %v1002_v26  ;;  %v1012_v40 = vrot.slane %v1010_v10, 5  ;;  %v998_v49 = vrot.slane %v997_v31, 4  ;;  %v2789_v25 = vld [vmem:[%s3639_s27 + $0x60] sm:$0xe] }
  0x8e   : > { %v697_v50 = vrot.slane %v695_v55, 5  ;;  %v705_v58 = vshll.u32 %v4293_v45, 16  ;;  %v2891_v11 = vcombine.low %v4296_v0, %v4308_v20  ;;  %v2796_v15 = vrot.slane %v2788_v60, 9  ;;  %v4354_v0 = vld [vmem:[%s3639_s27 + $0x68] sm:$0x1] }
  0x8f   : > { %2297 = vmatmul.mubr.bf16.gmra.mrb[48].mxu0 %v2874_v42  ;;  %v1008_v9 = vrot.slane %v1007_v37, 4  ;;  %v833_v4 = vrot.slane %v3984_v33, 5  ;;  %v836_v3 = vrot.slane %v2780_v18, 5  ;;  %v1003_v52 = vsel %vm3674_vm4, %v998_v49, %v1002_v26  ;;  %v2781_v42 = vld [vmem:[%s3639_s27 + $0x68] sm:$0x1] }
  0x90   : > { %2304 = vmatprep.mubr.bf16.mxu0 %v2883_v54  ;;  %v698_v12 = vsel %vm3674_vm4, %v693_v61, %v697_v50  ;;  %v702_v45 = vor.u32 %v701_v38, %v697_v50  ;;  %v707_v53 = vrot.slane %v705_v58, 5  ;;  %v1015_v35 = vshrl.u32 %v4343_v63, 16  ;;  %v4378_v58 = vld [vmem:[%s3639_s27 + $0x6c] sm:$0xf] }
  0x91   : > { %v1013_v2 = vsel %vm3674_vm4, %v1008_v9, %v1012_v40  ;;  %v834_v47 = vsel %vm3684_vm5, %v2796_v15, %v833_v4  ;;  %v835_v30 = vrot.slane %v833_v4, 4  ;;  %v1018_v59 = vshll.u32 %v4343_v63, 16 }
  0x92   : > { %v2899_v13 = vcombine.low %v1003_v52, %v1013_v2  ;;  %v703_v32 = vrot.slane %v702_v45, 4  ;;  %v1024_v34 = vshll.u32 %v4347_v16, 16  ;;  %v1017_v21 = vrot.slane %v1015_v35, 4  ;;  %v4384_v52 = vld [vmem:[%s3639_s27 + $0x70] sm:$0xf] }
  0x93   : > { %v837_v14 = vsel %vm3684_vm5, %v835_v30, %v836_v3  ;;  %v1028_v43 = vshrl.u32 %v4347_v16, 16  ;;  %v1034_v54 = vshll.u32 %v4354_v0, 16  ;;  %v1020_v39 = vrot.slane %v1018_v59, 5 }
  0x94   : > { %2401 = vmatprep.mubr.bf16.mxu1 %v2899_v13  ;;  %v708_v41 = vsel %vm3674_vm4, %v703_v32, %v707_v53  ;;  %v2884_v26 = vcombine.low %v834_v47, %v837_v14  ;;  %v1026_v10 = vrot.slane %v1024_v34, 5  ;;  %v717_v60 = vrot.slane %v716_v7, 4  ;;  %v4394_v47 = vld [vmem:[%s3639_s27 + $0x74] sm:$0x1] }
  0x95   : > { %v2875_v31 = vcombine.low %v698_v12, %v708_v41  ;;  %2402 = vmatmul.mubr.bf16.gmra.mrb[52].mxu1 %v2891_v11  ;;  %v1030_v61 = vrot.slane %v1028_v43, 4  ;;  %v1036_v55 = vrot.slane %v1034_v54, 5  ;;  %v1021_v37 = vor.u32 %v1020_v39, %v1017_v21 }
  0x96   : > { %v719_v40 = vshll.u32 %v3984_v33, 16  ;;  %v4630_v38 = vshrl.u32 %v3984_v33, 16  ;;  %v729_v50 = vshll.u32 %v2780_v18, 16  ;;  %v2892_v11 = vcombine.low %v4343_v63, %v4347_v16 }
  0x97   : > { %2305 = vmatmul.mubr.bf16.gmra.mrb[52].mxu0 %v2875_v31  ;;  %v1031_v9 = vor.u32 %v1030_v61, %v1026_v10  ;;  %v2797_v15 = vrot.slane %v2789_v25, 9  ;;  %v1022_v44 = vrot.slane %v1021_v37, 4  ;;  %v843_v3 = vrot.slane %v2781_v42, 5  ;;  %v2822_v25 = vld [vmem:[%s3639_s27 + $0x18] sm:$0xe] }
  0x98   : > { %v725_v49 = vrot.slane %v4630_v38, 4  ;;  %2312 = vmatprep.mubr.bf16.mxu0 %v2884_v26  ;;  %v721_v7 = vrot.slane %v719_v40, 5  ;;  %v731_v4 = vrot.slane %v729_v50, 5  ;;  %v842_v12 = vrot.slane %v840_v23, 4 }
  0x99   : > { %v1032_v33 = vrot.slane %v1031_v9, 4  ;;  %v841_v18 = vsel %vm3684_vm5, %v2797_v15, %v840_v23  ;;  %v1039_v45 = vshrl.u32 %v4378_v58, 16  ;;  %v1027_v63 = vsel %vm3674_vm4, %v1022_v44, %v1026_v10  ;;  %v2826_v9 = vld [vmem:[%s3639_s27 + $0x48] sm:$0xe] }
  0x9a   : > { %v722_v53 = vsel %vm3674_vm4, %v717_v60, %v721_v7  ;;  %v726_v2 = vor.u32 %v725_v49, %v721_v7  ;;  %v1042_v30 = vshll.u32 %v4378_v58, 16  ;;  %v844_v13 = vsel %vm3684_vm5, %v842_v12, %v843_v3  ;;  %v2823_v3 = vld [vmem:[%s3639_s27 + $0x24] sm:$0xe] }
  0x9b   : > { %v1037_v35 = vsel %vm3674_vm4, %v1032_v33, %v1036_v55  ;;  %v1041_v32 = vrot.slane %v1039_v45, 4  ;;  %v1048_v59 = vshll.u32 %v4384_v52, 16  ;;  %v2885_v21 = vcombine.low %v841_v18, %v844_v13 }
  0x9c   : > { %v2900_v34 = vcombine.low %v1027_v63, %v1037_v35  ;;  %v727_v14 = vrot.slane %v726_v2, 4  ;;  %v1044_v43 = vrot.slane %v1042_v30, 5  ;;  %v1052_v41 = vshrl.u32 %v4384_v52, 16  ;;  %v2827_v30 = vld [vmem:[%s3639_s27 + $0x54] sm:$0xe] }
  0x9d   : > { %v1050_v54 = vrot.slane %v1048_v59, 5  ;;  %v1058_v26 = vshll.u32 %v4394_v47, 16  ;;  %v4631_v39 = vor.u32 %v4049_v29, %v4044_v28  ;;  %v743_v55 = vshll.u32 %v4039_v6, 16 }
  0x9e   : > { %2409 = vmatprep.mubr.bf16.mxu1 %v2900_v34  ;;  %v732_v31 = vsel %vm3674_vm4, %v727_v14, %v731_v4  ;;  %v1045_v61 = vor.u32 %v1044_v43, %v1041_v32  ;;  %v4632_v60 = vshrl.u32 %v4039_v6, 16  ;;  %v1054_v38 = vrot.slane %v1052_v41, 4  ;;  %v2824_v34 = vld [vmem:[%s3639_s27 + $0x30] sm:$0xe] }
  0x9f   : > { %v741_v10 = vrot.slane %v4631_v39, 4  ;;  %v2876_v40 = vcombine.low %v722_v53, %v732_v31  ;;  %2410 = vmatmul.mubr.bf16.gmra.mrb[56].mxu1 %v2892_v11  ;;  %v1060_v49 = vrot.slane %v1058_v26, 5  ;;  %v753_v50 = vshll.u32 %v2781_v42, 16 }
  0xa0   : > { %v749_v37 = vrot.slane %v4632_v60, 4  ;;  %v1046_v28 = vrot.slane %v1045_v61, 4  ;;  %v745_v29 = vrot.slane %v743_v55, 5  ;;  %v2893_v15 = vcombine.low %v4378_v58, %v4384_v52 }
  0xa1   : > { %v2830_v23 = vrot.slane %v2822_v25, 9  ;;  %2313 = vmatmul.mubr.bf16.gmra.mrb[56].mxu0 %v2876_v40  ;;  %v1055_v44 = vor.u32 %v1054_v38, %v1050_v54  ;;  %v755_v7 = vrot.slane %v753_v50, 5  ;;  %v1096_v4 = vrot.slane %v4084_v36, 5  ;;  %v2829_v50 = vld [vmem:[%s3639_s27 + $0x6c] sm:$0xe] }
  0xa2   : > { %v1099_v6 = vrot.slane %v4087_v27, 5  ;;  %2320 = vmatprep.mubr.bf16.mxu0 %v2885_v21  ;;  %v1051_v42 = vsel %vm3674_vm4, %v1046_v28, %v1050_v54  ;;  %v746_v11 = vsel %vm3674_vm4, %v741_v10, %v745_v29  ;;  %v750_v33 = vor.u32 %v749_v37, %v745_v29  ;;  %v2828_v21 = vld [vmem:[%s3639_s27 + $0x60] sm:$0xe]  ;;  %v2825_v37 = vld [vmem:[%s3639_s27 + $0x3c] sm:$0xe]  ;;  %s2745_s27 = sshll.u32 %s3464_s12, 4 }
  0xa3   : > { %v2834_v58 = vrot.slane %v2826_v9, 9  ;;  %v1056_v18 = vrot.slane %v1055_v44, 4  ;;  %v1097_v12 = vsel %vm3684_vm5, %v2830_v23, %v1096_v4  ;;  %v1098_v45 = vrot.slane %v1096_v4, 4  ;;  %p214_p7 = scmp.lt.s32.totalorder %s2745_s27, 31 }
  0xa4   : > { %v1124_v36 = vrot.slane %v4260_v57, 5  ;;  %v751_v27 = vrot.slane %v750_v33, 4  ;;  %v1127_v63 = vrot.slane %v4267_v19, 5  ;;  %v2831_v53 = vrot.slane %v2823_v3, 9 }
  0xa5   : > { %v1103_v2 = vrot.slane %v4116_v48, 5  ;;  %v1061_v35 = vsel %vm3674_vm4, %v1056_v18, %v1060_v49  ;;  %v1100_v13 = vsel %vm3684_vm5, %v1098_v45, %v1099_v6  ;;  %v2835_v26 = vrot.slane %v2827_v30, 9  ;;  %s4646_s27 = smov (!%p214_p7, %s2745_s27), 31 }
  0xa6   : > { %v1125_v32 = vsel %vm3684_vm5, %v2834_v58, %v1124_v36  ;;  %v1126_v59 = vrot.slane %v1124_v36, 4  ;;  %v2901_v14 = vcombine.low %v1051_v42, %v1061_v35  ;;  %v756_v57 = vsel %vm3674_vm4, %v751_v27, %v755_v7  ;;  %s217_s12 = sadd.s32 %s2746_s11, %s4646_s27 }
  0xa7   : > { %v2902_v19 = vcombine.low %v1097_v12, %v1100_v13  ;;  %v1104_v48 = vsel %vm3684_vm5, %v2831_v53, %v1103_v2  ;;  %v2877_v43 = vcombine.low %v746_v11, %v756_v57  ;;  %v1105_v41 = vrot.slane %v1103_v2, 4  ;;  %s2747_s21 = sshll.u32 %s217_s12, 3 }
  0xa8   : > { %v1128_v54 = vsel %vm3684_vm5, %v1126_v59, %v1127_v63  ;;  %2417 = vmatprep.mubr.bf16.mxu1 %v2901_v14  ;;  %v1131_v10 = vrot.slane %v4308_v20, 5  ;;  %v2832_v25 = vrot.slane %v2824_v34, 9  ;;  %v1110_v56 = vrot.slane %v4160_v46, 5  ;;  %s4555_s25 = scalar_lea.vmem %s4624_s2, %s2747_s21 }
  0xa9   : > { %v2906_v39 = vcombine.low %v1125_v32, %v1128_v54  ;;  %2321 = vmatmul.mubr.bf16.gmra.mrb[60].mxu0 %v2877_v43  ;;  %2418 = vmatmul.mubr.bf16.gmra.mrb[60].mxu1 %v2893_v15  ;;  %v1107_v31 = vsel %vm3684_vm5, %v1105_v41, %v1106_v62  ;;  %v1113_v61 = vrot.slane %v4167_v22, 5  ;;  %v2836_v55 = vrot.slane %v2828_v21, 9 }
  0xaa   : > { %v1138_v60 = vrot.slane %v4347_v16, 5  ;;  %3272 = vmatprep.mubr.bf16.mxu0 %v2902_v19  ;;  %v2903_v20 = vcombine.low %v1104_v48, %v1107_v31  ;;  %v1132_v46 = vsel %vm3684_vm5, %v2835_v26, %v1131_v10  ;;  %v1133_v40 = vrot.slane %v1131_v10, 4 }
  0xab   : > { %3280 = vmatprep.mubr.bf16.mxu1 %v2906_v39  ;;  %v1111_v51 = vsel %vm3684_vm5, %v2832_v25, %v1110_v56  ;;  %v1112_v38 = vrot.slane %v1110_v56, 4  ;;  %v1141_v22 = vrot.slane %v4354_v0, 5  ;;  %v2833_v9 = vrot.slane %v2825_v37, 9 }
  0xac   : > { %v1139_v62 = vsel %vm3684_vm5, %v2836_v55, %v1138_v60  ;;  %v1140_v49 = vrot.slane %v1138_v60, 4  ;;  %v1135_v16 = vsel %vm3684_vm5, %v1133_v40, %v1134_v5  ;;  %v1117_v28 = vrot.slane %v4210_v8, 5 }
  0xad   : > { %v2907_v29 = vcombine.low %v1132_v46, %v1135_v16  ;;  %v1114_v15 = vsel %vm3684_vm5, %v1112_v38, %v1113_v61  ;;  %v1120_v44 = vrot.slane %v4221_v17, 5  ;;  %v2837_v6 = vrot.slane %v2829_v50, 9 }
  0xae   : > { %v1142_v23 = vsel %vm3684_vm5, %v1140_v49, %v1141_v22  ;;  %v2904_v7 = vcombine.low %v1111_v51, %v1114_v15  ;;  %v1119_v4 = vrot.slane %v1117_v28, 4  ;;  %v1145_v24 = vrot.slane %v4384_v52, 5 }
  0xaf   : > { %v2908_v0 = vcombine.low %v1139_v62, %v1142_v23  ;;  %v1148_v5 = vrot.slane %v4394_v47, 5  ;;  %v1118_v3 = vsel %vm3684_vm5, %v2833_v9, %v1117_v28 }
  0xb0   : > { %v1147_v8 = vrot.slane %v1145_v24, 4  ;;  %v1121_v42 = vsel %vm3684_vm5, %v1119_v4, %v1120_v44  ;;  %v1146_v17 = vsel %vm3684_vm5, %v2837_v6, %v1145_v24 }
  0xb1   : > { %3273 = vmatmul.mubr.bf16.vlgmr.msra.gmra.mrb[64].mxu0 %v2903_v20  ;;  %3281 = vmatmul.mubr.bf16.vlgmr.msra.gmra.mrb[64].mxu1 %v2907_v29  ;;  %v2905_v52 = vcombine.low %v1118_v3, %v1121_v42 }
  0xb2   : > { %3276 = vmatprep.mubr.bf16.mxu0 %v2904_v7  ;;  %3284 = vmatprep.mubr.bf16.mxu1 %v2908_v0  ;;  %v1149_v11 = vsel %vm3684_vm5, %v1147_v8, %v1148_v5 }
  0xb3   : > { %v2909_v33 = vcombine.low %v1146_v17, %v1149_v11 }
  0xb9   : > { %3277 = vmatmul.mubr.bf16.gmra.mrb[68].mxu0 %v2905_v52  ;;  %3285 = vmatmul.mubr.bf16.gmra.mrb[68].mxu1 %v2909_v33 }
  0xfe   : > { %v3000_v47 = vpop.f32.mrb[0].mxu0 }
  0xff   : > { %v3064_v58 = vpop.f32.mrb[0].mxu1  ;;  %v3001_v18 = vpop.f32.mrb[1].mxu0 }
 0x100   : > { %v3002_v12 = vadd.f32 %v3001_v18, %v3000_v47  ;;  %v3065_v45 = vpop.f32.mrb[1].mxu1  ;;  %v3003_v36 = vpop.f32.mrb[2].mxu0 }
 0x101   : > { %v3066_v27 = vadd.f32 %v3065_v45, %v3064_v58  ;;  %v3067_v63 = vpop.f32.mrb[2].mxu1  ;;  %v3004_v53 = vpop.f32.mrb[3].mxu0 }
 0x102   : > { %v3005_v2 = vadd.f32 %v3004_v53, %v3003_v36  ;;  %v3068_v30 = vpop.f32.mrb[3].mxu1 }
 0x103   : > { %v4480_v35 = vadd.f32 %v3066_v27, %v3002_v12  ;;  %v3069_v13 = vadd.f32 %v3068_v30, %v3067_v63 }
 0x105   : > { %v4482_v1 = vadd.f32 %v3069_v13, %v3005_v2 }
 0x106   : > { %v3006_v32 = vpop.f32.mrb[4].mxu0 }
 0x107   : > { %v3070_v59 = vpop.f32.mrb[4].mxu1  ;;  %v3007_v34 = vpop.f32.mrb[5].mxu0 }
 0x108   : > { %v3071_v14 = vpop.f32.mrb[5].mxu1  ;;  %v3008_v57 = vadd.f32 %v3007_v34, %v3006_v32  ;;  %v3009_v48 = vpop.f32.mrb[6].mxu0 }
 0x109   : > { %v3072_v19 = vadd.f32 %v3071_v14, %v3070_v59  ;;  %v3073_v21 = vpop.f32.mrb[6].mxu1  ;;  %v3010_v43 = vpop.f32.mrb[7].mxu0 }
 0x10a   : > { %v3074_v54 = vpop.f32.mrb[7].mxu1  ;;  %v3011_v26 = vadd.f32 %v3010_v43, %v3009_v48 }
 0x10b   : > { %v4484_v41 = vadd.f32 %v3072_v19, %v3008_v57  ;;  %v3075_v39 = vadd.f32 %v3074_v54, %v3073_v21 }
 0x10d   : > { %v4486_v10 = vadd.f32 %v3075_v39, %v3011_v26 }
 0x10e   : > { %v3012_v25 = vpop.f32.mrb[8].mxu0 }
 0x10f   : > { %v3076_v56 = vpop.f32.mrb[8].mxu1  ;;  %v3013_v31 = vpop.f32.mrb[9].mxu0 }
 0x110   : > { %v3077_v61 = vpop.f32.mrb[9].mxu1  ;;  %v3014_v55 = vadd.f32 %v3013_v31, %v3012_v25  ;;  %v3015_v37 = vpop.f32.mrb[10].mxu0 }
 0x111   : > { %v3078_v60 = vadd.f32 %v3077_v61, %v3076_v56  ;;  %v3079_v20 = vpop.f32.mrb[10].mxu1  ;;  %v3016_v46 = vpop.f32.mrb[11].mxu0 }
 0x112   : > { %v3080_v40 = vpop.f32.mrb[11].mxu1  ;;  %v3017_v38 = vadd.f32 %v3016_v46, %v3015_v37 }
 0x113   : > { %v4488_v51 = vadd.f32 %v3078_v60, %v3014_v55  ;;  %v3081_v62 = vadd.f32 %v3080_v40, %v3079_v20 }
 0x115   : > { %v4490_v49 = vadd.f32 %v3081_v62, %v3017_v38 }
 0x116   : > { %v3018_v22 = vpop.f32.mrb[12].mxu0 }
 0x117   : > { %v3082_v50 = vpop.f32.mrb[12].mxu1  ;;  %v3019_v16 = vpop.f32.mrb[13].mxu0 }
 0x118   : > { %v3083_v9 = vpop.f32.mrb[13].mxu1  ;;  %v3020_v28 = vadd.f32 %v3019_v16, %v3018_v22  ;;  %v3021_v15 = vpop.f32.mrb[14].mxu0 }
 0x119   : > { %v3084_v29 = vadd.f32 %v3083_v9, %v3082_v50  ;;  %v3085_v23 = vpop.f32.mrb[14].mxu1  ;;  %v3022_v44 = vpop.f32.mrb[15].mxu0 }
 0x11a   : > { %v3086_v7 = vpop.f32.mrb[15].mxu1  ;;  %v3023_v4 = vadd.f32 %v3022_v44, %v3021_v15 }
 0x11b   : > { %v4492_v0 = vadd.f32 %v3084_v29, %v3020_v28  ;;  %v3087_v6 = vadd.f32 %v3086_v7, %v3085_v23 }
 0x11d   : > { %v4494_v24 = vadd.f32 %v3087_v6, %v3023_v4 }
 0x11e   : > { %v3024_v5 = vpop.f32.mrb[16].mxu0 }
 0x11f   : > { %v3088_v8 = vpop.f32.mrb[16].mxu1  ;;  %v3025_v3 = vpop.f32.mrb[17].mxu0 }
 0x120   : > { %v3089_v42 = vpop.f32.mrb[17].mxu1  ;;  %v3026_v17 = vadd.f32 %v3025_v3, %v3024_v5  ;;  %v3027_v52 = vpop.f32.mrb[18].mxu0 }
 0x121   : > { %v3090_v11 = vadd.f32 %v3089_v42, %v3088_v8  ;;  %v3091_v33 = vpop.f32.mrb[18].mxu1  ;;  %v3028_v47 = vpop.f32.mrb[19].mxu0 }
 0x122   : > { %v3092_v58 = vpop.f32.mrb[19].mxu1  ;;  %v3029_v12 = vadd.f32 %v3028_v47, %v3027_v52 }
 0x123   : > { %v4496_v18 = vadd.f32 %v3090_v11, %v3026_v17  ;;  %v3093_v45 = vadd.f32 %v3092_v58, %v3091_v33 }
 0x125   : > { %v4498_v36 = vadd.f32 %v3093_v45, %v3029_v12 }
 0x126   : > { %v3030_v27 = vpop.f32.mrb[20].mxu0 }
 0x127   : > { %v3094_v63 = vpop.f32.mrb[20].mxu1  ;;  %v3031_v53 = vpop.f32.mrb[21].mxu0 }
 0x128   : > { %v3095_v2 = vpop.f32.mrb[21].mxu1  ;;  %v3032_v30 = vadd.f32 %v3031_v53, %v3030_v27  ;;  %v3033_v32 = vpop.f32.mrb[22].mxu0 }
 0x129   : > { %v3096_v13 = vadd.f32 %v3095_v2, %v3094_v63  ;;  %v3097_v59 = vpop.f32.mrb[22].mxu1  ;;  %v3034_v34 = vpop.f32.mrb[23].mxu0 }
 0x12a   : > { %v3098_v14 = vpop.f32.mrb[23].mxu1  ;;  %v3035_v19 = vadd.f32 %v3034_v34, %v3033_v32 }
 0x12b   : > { %v4500_v57 = vadd.f32 %v3096_v13, %v3032_v30  ;;  %v3099_v48 = vadd.f32 %v3098_v14, %v3097_v59 }
 0x12d   : > { %v4502_v21 = vadd.f32 %v3099_v48, %v3035_v19 }
 0x12e   : > { %v3036_v43 = vpop.f32.mrb[24].mxu0 }
 0x12f   : > { %v3100_v54 = vpop.f32.mrb[24].mxu1  ;;  %v3037_v26 = vpop.f32.mrb[25].mxu0 }
 0x130   : > { %v3101_v39 = vpop.f32.mrb[25].mxu1  ;;  %v3038_v25 = vadd.f32 %v3037_v26, %v3036_v43  ;;  %v3039_v31 = vpop.f32.mrb[26].mxu0 }
 0x131   : > { %v3102_v56 = vadd.f32 %v3101_v39, %v3100_v54  ;;  %v3103_v61 = vpop.f32.mrb[26].mxu1  ;;  %v3040_v55 = vpop.f32.mrb[27].mxu0 }
 0x132   : > { %v3104_v60 = vpop.f32.mrb[27].mxu1  ;;  %v3041_v20 = vadd.f32 %v3040_v55, %v3039_v31 }
 0x133   : > { %v4504_v37 = vadd.f32 %v3102_v56, %v3038_v25  ;;  %v3105_v46 = vadd.f32 %v3104_v60, %v3103_v61 }
 0x135   : > { %v4506_v40 = vadd.f32 %v3105_v46, %v3041_v20 }
 0x136   : > { %v3042_v62 = vpop.f32.mrb[28].mxu0 }
 0x137   : > { %v3106_v38 = vpop.f32.mrb[28].mxu1  ;;  %v3043_v50 = vpop.f32.mrb[29].mxu0 }
 0x138   : > { %v3107_v22 = vpop.f32.mrb[29].mxu1  ;;  %v3044_v28 = vadd.f32 %v3043_v50, %v3042_v62  ;;  %v3045_v29 = vpop.f32.mrb[30].mxu0 }
 0x139   : > { %v3108_v16 = vadd.f32 %v3107_v22, %v3106_v38  ;;  %v3109_v9 = vpop.f32.mrb[30].mxu1  ;;  %v3046_v23 = vpop.f32.mrb[31].mxu0 }
 0x13a   : > { %v3110_v15 = vpop.f32.mrb[31].mxu1  ;;  %v3047_v4 = vadd.f32 %v3046_v23, %v3045_v29 }
 0x13b   : > { %v3111_v44 = vadd.f32 %v3110_v15, %v3109_v9  ;;  %v4508_v7 = vadd.f32 %v3108_v16, %v3044_v28 }
 0x13d   : > { %v4510_v6 = vadd.f32 %v3111_v44, %v3047_v4 }
 0x13e   : > { %v3128_v5 = vpop.f32.mrb[32].mxu0 }
 0x13f   : > { %v3129_v8 = vpop.f32.mrb[33].mxu0 }
 0x140   : > { %v3130_v3 = vadd.f32 %v3129_v8, %v3128_v5  ;;  %v3131_v42 = vpop.f32.mrb[34].mxu0  ;;  %v3192_v17 = vpop.f32.mrb[32].mxu1 }
 0x141   : > { %v3132_v11 = vpop.f32.mrb[35].mxu0  ;;  %v3193_v47 = vpop.f32.mrb[33].mxu1 }
 0x142   : > { %v2267_v52 = vadd.f32 %v3130_v3, %v4480_v35  ;;  %v3133_v33 = vadd.f32 %v3132_v11, %v3131_v42  ;;  %v3194_v58 = vadd.f32 %v3193_v47, %v3192_v17  ;;  %v3195_v12 = vpop.f32.mrb[34].mxu1 }
 0x143   : > { %v3196_v27 = vpop.f32.mrb[35].mxu1 }
 0x144   : > { %v2270_v45 = vadd.f32 %v3133_v33, %v4482_v1  ;;  %v3197_v63 = vadd.f32 %v3196_v27, %v3195_v12  ;;  %v4514_v53 = vadd.f32 %v3194_v58, %v2267_v52 }
 0x146   : > { %v4516_v2 = vadd.f32 %v3197_v63, %v2270_v45  ;;  %v3134_v30 = vpop.f32.mrb[36].mxu0 }
 0x147   : > { %v3135_v32 = vpop.f32.mrb[37].mxu0 }
 0x148   : > { %v3198_v13 = vpop.f32.mrb[36].mxu1  ;;  %v3136_v34 = vadd.f32 %v3135_v32, %v3134_v30  ;;  %v3137_v14 = vpop.f32.mrb[38].mxu0 }
 0x149   : > { %v3199_v59 = vpop.f32.mrb[37].mxu1  ;;  %v3138_v48 = vpop.f32.mrb[39].mxu0 }
 0x14a   : > { %v3200_v19 = vadd.f32 %v3199_v59, %v3198_v13  ;;  %v3201_v35 = vpop.f32.mrb[38].mxu1  ;;  %v2275_v54 = vadd.f32 %v3136_v34, %v4484_v41  ;;  %v3139_v26 = vadd.f32 %v3138_v48, %v3137_v14 }
 0x14b   : > { %v3202_v43 = vpop.f32.mrb[39].mxu1 }
 0x14c   : > { %v3203_v1 = vadd.f32 %v3202_v43, %v3201_v35  ;;  %v2278_v39 = vadd.f32 %v3139_v26, %v4486_v10  ;;  %v4520_v25 = vadd.f32 %v3200_v19, %v2275_v54 }
 0x14e   : > { %v4522_v31 = vadd.f32 %v3203_v1, %v2278_v39 }
 0x150   : > { %v3204_v56 = vpop.f32.mrb[40].mxu1 }
 0x151   : > { %v3205_v61 = vpop.f32.mrb[41].mxu1  ;;  %v3140_v55 = vpop.f32.mrb[40].mxu0 }
 0x152   : > { %v3206_v60 = vadd.f32 %v3205_v61, %v3204_v56  ;;  %v3207_v20 = vpop.f32.mrb[42].mxu1  ;;  %v3141_v46 = vpop.f32.mrb[41].mxu0 }
 0x153   : > { %v3208_v38 = vpop.f32.mrb[43].mxu1  ;;  %v3142_v62 = vadd.f32 %v3141_v46, %v3140_v55  ;;  %v3143_v22 = vpop.f32.mrb[42].mxu0 }
 0x154   : > { %v3209_v50 = vadd.f32 %v3208_v38, %v3207_v20  ;;  %v3144_v16 = vpop.f32.mrb[43].mxu0 }
 0x155   : > { %v2283_v41 = vadd.f32 %v3142_v62, %v4488_v51  ;;  %v3145_v9 = vadd.f32 %v3144_v16, %v3143_v22 }
 0x157   : > { %v2286_v10 = vadd.f32 %v3145_v9, %v4490_v49  ;;  %v4526_v29 = vadd.f32 %v3206_v60, %v2283_v41 }
 0x158   : > { %v3210_v28 = vpop.f32.mrb[44].mxu1 }
 0x159   : > { %v3211_v15 = vpop.f32.mrb[45].mxu1  ;;  %v3146_v23 = vpop.f32.mrb[44].mxu0  ;;  %v4528_v5 = vadd.f32 %v3209_v50, %v2286_v10 }
 0x15a   : > { %v3212_v44 = vadd.f32 %v3211_v15, %v3210_v28  ;;  %v3213_v4 = vpop.f32.mrb[46].mxu1  ;;  %v3147_v8 = vpop.f32.mrb[45].mxu0 }
 0x15b   : > { %v3214_v3 = vpop.f32.mrb[47].mxu1  ;;  %v3148_v42 = vadd.f32 %v3147_v8, %v3146_v23  ;;  %v3149_v17 = vpop.f32.mrb[46].mxu0 }
 0x15c   : > { %v3215_v11 = vadd.f32 %v3214_v3, %v3213_v4  ;;  %v3150_v52 = vpop.f32.mrb[47].mxu0 }
 0x15d   : > { %v2291_v51 = vadd.f32 %v3148_v42, %v4492_v0  ;;  %v3151_v33 = vadd.f32 %v3150_v52, %v3149_v17 }
 0x15f   : > { %v2294_v49 = vadd.f32 %v3151_v33, %v4494_v24  ;;  %v4532_v47 = vadd.f32 %v3212_v44, %v2291_v51 }
 0x160   : > { %v3216_v58 = vpop.f32.mrb[48].mxu1 }
 0x161   : > { %v4534_v12 = vadd.f32 %v3215_v11, %v2294_v49  ;;  %v3217_v45 = vpop.f32.mrb[49].mxu1 }
 0x162   : > { %v3152_v27 = vpop.f32.mrb[48].mxu0  ;;  %v3218_v63 = vadd.f32 %v3217_v45, %v3216_v58  ;;  %v3219_v30 = vpop.f32.mrb[50].mxu1 }
 0x163   : > { %v3153_v13 = vpop.f32.mrb[49].mxu0  ;;  %v3220_v32 = vpop.f32.mrb[51].mxu1 }
 0x164   : > { %v3154_v59 = vadd.f32 %v3153_v13, %v3152_v27  ;;  %v3155_v34 = vpop.f32.mrb[50].mxu0  ;;  %v3221_v14 = vadd.f32 %v3220_v32, %v3219_v30 }
 0x165   : > { %v3156_v19 = vpop.f32.mrb[51].mxu0 }
 0x166   : > { %v2299_v0 = vadd.f32 %v3154_v59, %v4496_v18  ;;  %v3157_v35 = vadd.f32 %v3156_v19, %v3155_v34 }
 0x168   : > { %v2302_v24 = vadd.f32 %v3157_v35, %v4498_v36  ;;  %v3222_v48 = vpop.f32.mrb[52].mxu1  ;;  %v4538_v43 = vadd.f32 %v3218_v63, %v2299_v0 }
 0x169   : > { %v3223_v54 = vpop.f32.mrb[53].mxu1 }
 0x16a   : > { %v3158_v26 = vpop.f32.mrb[52].mxu0  ;;  %v3224_v1 = vadd.f32 %v3223_v54, %v3222_v48  ;;  %v3225_v39 = vpop.f32.mrb[54].mxu1  ;;  %v4540_v56 = vadd.f32 %v3221_v14, %v2302_v24 }
 0x16b   : > { %v3159_v61 = vpop.f32.mrb[53].mxu0  ;;  %v3226_v55 = vpop.f32.mrb[55].mxu1 }
 0x16c   : > { %v3160_v60 = vadd.f32 %v3159_v61, %v3158_v26  ;;  %v3161_v20 = vpop.f32.mrb[54].mxu0  ;;  %v3227_v46 = vadd.f32 %v3226_v55, %v3225_v39 }
 0x16d   : > { %v3162_v38 = vpop.f32.mrb[55].mxu0 }
 0x16e   : > { %v2307_v18 = vadd.f32 %v3160_v60, %v4500_v57  ;;  %v3163_v62 = vadd.f32 %v3162_v38, %v3161_v20 }
 0x170   : > { %v2310_v36 = vadd.f32 %v3163_v62, %v4502_v21  ;;  %v2404_v22 = vadd.f32 %v3224_v1, %v2307_v18 }
 0x172   : > { %v3228_v50 = vpop.f32.mrb[56].mxu1  ;;  %v2407_v16 = vadd.f32 %v3227_v46, %v2310_v36 }
 0x173   : > { %v3229_v41 = vpop.f32.mrb[57].mxu1 }
 0x174   : > { %v3164_v9 = vpop.f32.mrb[56].mxu0  ;;  %v3230_v10 = vadd.f32 %v3229_v41, %v3228_v50  ;;  %v3231_v28 = vpop.f32.mrb[58].mxu1 }
 0x175   : > { %v3165_v15 = vpop.f32.mrb[57].mxu0  ;;  %v3232_v23 = vpop.f32.mrb[59].mxu1 }
 0x176   : > { %v3166_v44 = vadd.f32 %v3165_v15, %v3164_v9  ;;  %v3167_v4 = vpop.f32.mrb[58].mxu0  ;;  %v3233_v8 = vadd.f32 %v3232_v23, %v3231_v28 }
 0x177   : > { %v3168_v3 = vpop.f32.mrb[59].mxu0 }
 0x178   : > { %v2315_v57 = vadd.f32 %v3166_v44, %v4504_v37  ;;  %v3169_v42 = vadd.f32 %v3168_v3, %v3167_v4 }
 0x17a   : > { %v2318_v21 = vadd.f32 %v3169_v42, %v4506_v40  ;;  %v2412_v17 = vadd.f32 %v3230_v10, %v2315_v57 }
 0x17c   : > { %v3170_v11 = vpop.f32.mrb[60].mxu0  ;;  %v3234_v52 = vpop.f32.mrb[60].mxu1  ;;  %v4548_v51 = vadd.f32 %v3233_v8, %v2318_v21 }
 0x17d   : > { %v3171_v33 = vpop.f32.mrb[61].mxu0  ;;  %v3235_v49 = vpop.f32.mrb[61].mxu1 }
 0x17e   : > { %v3172_v58 = vadd.f32 %v3171_v33, %v3170_v11  ;;  %v3173_v45 = vpop.f32.mrb[62].mxu0  ;;  %v3236_v27 = vadd.f32 %v3235_v49, %v3234_v52  ;;  %v3237_v63 = vpop.f32.mrb[62].mxu1 }
 0x17f   : > { %v3174_v30 = vpop.f32.mrb[63].mxu0  ;;  %v3238_v13 = vpop.f32.mrb[63].mxu1 }
 0x180   : > { %v2323_v37 = vadd.f32 %v3172_v58, %v4508_v7  ;;  %v3175_v32 = vadd.f32 %v3174_v30, %v3173_v45  ;;  %v3239_v40 = vadd.f32 %v3238_v13, %v3237_v63 }
 0x182   : > { %v2326_v59 = vadd.f32 %v3175_v32, %v4510_v6  ;;  %v2420_v34 = vadd.f32 %v3236_v27, %v2323_v37 }
 0x184   : > { %v3274_v14 = vpop.f32.mrb[64].mxu0  ;;  %v3282_v19 = vpop.f32.mrb[64].mxu1  ;;  %v2423_v0 = vadd.f32 %v3239_v40, %v2326_v59 }
 0x185   : > { %v2469_v7 = vadd.f32 %v3274_v14, %v4520_v25  ;;  %v4558_v35 = vadd.f32 %v3282_v19, %v2404_v22  ;;  %v2460_v24 = vpop.f32.mrb[65].mxu0  ;;  %v2492_v6 = vpop.f32.mrb[65].mxu1 }
 0x186   : > { %v2461_v48 = vadd.f32 %v2460_v24, %v4514_v53  ;;  %v4562_v54 = vadd.f32 %v2492_v6, %v4538_v43  ;;  %v3275_v26 = vpop.f32.mrb[66].mxu0  ;;  %v3283_v1 = vpop.f32.mrb[66].mxu1 }
 0x187   : > { %2525 = vst [vmem:[%s4555_s25 + $0x10] sm:$0xff] %v2469_v7  ;;  %2533 = vst [vmem:[%s4555_s25 + $0x50] sm:$0xff] %v4558_v35  ;;  %v2472_v25 = vadd.f32 %v3275_v26, %v4522_v31  ;;  %v4568_v39 = vadd.f32 %v3283_v1, %v2407_v16  ;;  %v2463_v61 = vpop.f32.mrb[67].mxu0  ;;  %v2495_v55 = vpop.f32.mrb[67].mxu1  ;;  %v2563_v31 = vmul.f32 %v2469_v7, %v2469_v7 }
 0x188   : > { %2523 = vst [vmem:[%s4555_s25] sm:$0xff] %v2461_v48  ;;  %2531 = vst [vmem:[%s4555_s25 + $0x40] sm:$0xff] %v4562_v54  ;;  %v2464_v53 = vadd.f32 %v2463_v61, %v4516_v2  ;;  %v2496_v43 = vadd.f32 %v2495_v55, %v4540_v56  ;;  %v2561_v60 = vmul.f32 %v2461_v48, %v2461_v48 }
 0x189   : > { %2526 = vst [vmem:[%s4555_s25 + $0x18] sm:$0xff] %v2472_v25  ;;  %2534 = vst [vmem:[%s4555_s25 + $0x58] sm:$0xff] %v4568_v39  ;;  %v2564_v22 = vmul.f32 %v2472_v25, %v2472_v25  ;;  %v2569_v63 = vmul.f32 %v4562_v54, %v4562_v54  ;;  %v2571_v32 = vmul.f32 %v4558_v35, %v4558_v35 }
 0x18a   : > { %2524 = vst [vmem:[%s4555_s25 + $0x8] sm:$0xff] %v2464_v53  ;;  %v2539_v20 = vadd.f32 %v2464_v53, %v2461_v48  ;;  %v2562_v46 = vmul.f32 %v2464_v53, %v2464_v53  ;;  %2532 = vst [vmem:[%s4555_s25 + $0x48] sm:$0xff] %v2496_v43 }
 0x18c   : > { %v2540_v38 = vadd.f32 %v2539_v20, %v2469_v7  ;;  %v2577_v18 = vadd.f32 %v2562_v46, %v2561_v60  ;;  %v3278_v62 = vpop.f32.mrb[68].mxu0  ;;  %v3286_v36 = vpop.f32.mrb[68].mxu1 }
 0x18d   : > { %v2485_v2 = vadd.f32 %v3278_v62, %v4532_v47  ;;  %v2517_v56 = vadd.f32 %v3286_v36, %v2420_v34  ;;  %v2476_v50 = vpop.f32.mrb[69].mxu0  ;;  %v2508_v16 = vpop.f32.mrb[69].mxu1  ;;  %v2572_v34 = vmul.f32 %v4568_v39, %v4568_v39 }
 0x18e   : > { %v2578_v41 = vadd.f32 %v2577_v18, %v2563_v31  ;;  %v2477_v9 = vadd.f32 %v2476_v50, %v4526_v29  ;;  %v2541_v10 = vadd.f32 %v2540_v38, %v2472_v25  ;;  %v2509_v28 = vadd.f32 %v2508_v16, %v2412_v17  ;;  %v3279_v15 = vpop.f32.mrb[70].mxu0  ;;  %v3287_v23 = vpop.f32.mrb[70].mxu1 }
 0x18f   : > { %2529 = vst [vmem:[%s4555_s25 + $0x30] sm:$0xff] %v2485_v2  ;;  %2537 = vst [vmem:[%s4555_s25 + $0x70] sm:$0xff] %v2517_v56  ;;  %v2488_v44 = vadd.f32 %v3279_v15, %v4534_v12  ;;  %v2520_v47 = vadd.f32 %v3287_v23, %v2423_v0  ;;  %v2479_v4 = vpop.f32.mrb[71].mxu0  ;;  %v2511_v8 = vpop.f32.mrb[71].mxu1  ;;  %v2567_v12 = vmul.f32 %v2485_v2, %v2485_v2 }
 0x190   : > { %2527 = vst [vmem:[%s4555_s25 + $0x20] sm:$0xff] %v2477_v9  ;;  %v2542_v3 = vadd.f32 %v2541_v10, %v2477_v9  ;;  %v2565_v57 = vmul.f32 %v2477_v9, %v2477_v9  ;;  %v2579_v42 = vadd.f32 %v2578_v41, %v2564_v22  ;;  %2535 = vst [vmem:[%s4555_s25 + $0x60] sm:$0xff] %v2509_v28 }
 0x191   : > { %2530 = vst [vmem:[%s4555_s25 + $0x38] sm:$0xff] %v2488_v44  ;;  %2538 = vst [vmem:[%s4555_s25 + $0x78] sm:$0xff] %v2520_v47  ;;  %v2480_v29 = vadd.f32 %v2479_v4, %v4528_v5  ;;  %v2512_v21 = vadd.f32 %v2511_v8, %v4548_v51  ;;  %v2568_v58 = vmul.f32 %v2488_v44, %v2488_v44 }
 0x192   : > { %v2580_v17 = vadd.f32 %v2579_v42, %v2565_v57  ;;  %v2570_v5 = vmul.f32 %v2496_v43, %v2496_v43  ;;  %v2573_v0 = vmul.f32 %v2509_v28, %v2509_v28  ;;  %v2575_v26 = vmul.f32 %v2517_v56, %v2517_v56 }
 0x193   : > { %2528 = vst [vmem:[%s4555_s25 + $0x28] sm:$0xff] %v2480_v29  ;;  %v2543_v11 = vadd.f32 %v2542_v3, %v2480_v29  ;;  %v2566_v52 = vmul.f32 %v2480_v29, %v2480_v29  ;;  %2536 = vst [vmem:[%s4555_s25 + $0x68] sm:$0xff] %v2512_v21  ;;  %v2574_v48 = vmul.f32 %v2512_v21, %v2512_v21 }
 0x194   : > { %v2576_v61 = vmul.f32 %v2520_v47, %v2520_v47 }
 0x195   : > { %v2544_v33 = vadd.f32 %v2543_v11, %v2485_v2  ;;  %v2581_v49 = vadd.f32 %v2580_v17, %v2566_v52 }
 0x197   : > { %v2545_v45 = vadd.f32 %v2544_v33, %v2488_v44  ;;  %v2582_v27 = vadd.f32 %v2581_v49, %v2567_v12 }
 0x199   : > { %v2546_v30 = vadd.f32 %v2545_v45, %v4562_v54  ;;  %v2583_v13 = vadd.f32 %v2582_v27, %v2568_v58 }
 0x19b   : > { %v2584_v37 = vadd.f32 %v2583_v13, %v2569_v63  ;;  %v2547_v51 = vadd.f32 %v2546_v30, %v2496_v43 }
 0x19d   : > { %v2548_v40 = vadd.f32 %v2547_v51, %v4558_v35  ;;  %v2585_v59 = vadd.f32 %v2584_v37, %v2570_v5 }
 0x19f   : > { %v2549_v14 = vadd.f32 %v2548_v40, %v4568_v39  ;;  %v2586_v19 = vadd.f32 %v2585_v59, %v2571_v32 }
 0x1a1   : > { %v2550_v7 = vadd.f32 %v2549_v14, %v2509_v28  ;;  %v2587_v24 = vadd.f32 %v2586_v19, %v2572_v34 }
 0x1a3   : > { %v2551_v6 = vadd.f32 %v2550_v7, %v2512_v21  ;;  %v2588_v54 = vadd.f32 %v2587_v24, %v2573_v0 }
 0x1a5   : > { %v2552_v1 = vadd.f32 %v2551_v6, %v2517_v56  ;;  %v2589_v25 = vadd.f32 %v2588_v54, %v2574_v48 }
 0x1a7   : > { %v2553_v35 = vadd.f32 %v2552_v1, %v2520_v47  ;;  %v2590_v55 = vadd.f32 %v2589_v25, %v2575_v26 }
 0x1a9   : > { %v2554_v53 = vrot.slane %v2553_v35, 4  ;;  %v2591_v43 = vadd.f32 %v2590_v55, %v2576_v61 }
 0x1ab   : > { %v2555_v60 = vadd.f32 %v2554_v53, %v2553_v35  ;;  %v2592_v20 = vrot.slane %v2591_v43, 4 }
 0x1ad   : > { %v2556_v39 = vrot.slane %v2555_v60, 2  ;;  %v2593_v46 = vadd.f32 %v2592_v20, %v2591_v43 }
 0x1af   : > { %v2557_v31 = vadd.f32 %v2556_v39, %v2555_v60  ;;  %v2594_v38 = vrot.slane %v2593_v46, 2 }
 0x1b1   : > { %v2558_v18 = vrot.slane %v2557_v31, 1  ;;  %v2595_v62 = vadd.f32 %v2594_v38, %v2593_v46 }
 0x1b3   : > { %v2559_v36 = vadd.f32 %v2558_v18, %v2557_v31  ;;  %v2596_v22 = vrot.slane %v2595_v62, 1 }
 0x1b5   : > { %2560 = vst [vmem:[%s228_s6] sm:$0x1] %v2559_v36  ;;  %v2597_v2 = vadd.f32 %v2596_v22, %v2595_v62 }
 0x1b7   : > { %2598 = vst [vmem:[%s228_s6 + $0x1] sm:$0x1] %v2597_v2 }
 0x1b8 PF: > { %s14_s16 = sadd.s32 1, %s3480_s16   ;;  %s4633_s12 = smov %s3472_s14 }
 0x1b9   : > { %p11_p8 = scmp.ge.s32.totalorder %s14_s16, 6   ;;  %s4634_s13 = smov %s3476_s15 }
 0x1ba   : > { %s4635_s14 = smov %s4638_s17  ;;  %s4636_s15 = smov %s4642_s18 }
 0x1bb   :  { %13 = sbr.rel (!%p11_p8) target bundleno = 3 (0x3), region = 72 }

</bundles_post_ra>
